<compile_context>
chip_gen: v6e
topology: v6e:2x2x1
jax: 0.10.0
libtpu: 0.0.40
codegen_flags: <defaults>
</compile_context>

<pallas_src>
import math

import jax
import jax.numpy as jnp
from jax.experimental import pallas as pl
from jax.experimental.pallas import tpu as pltpu


def _round_up(x, m):
    return (x + m - 1) // m * m


def _conv_meta(input_dim, conv_configs, T):
    meta = []
    cin, t = input_dim, T
    for (cout, k, pad) in conv_configs:
        t_out = t + 2 * pad - k + 1
        meta.append((k, pad, cin, cout, t, t_out))
        cin, t = cout, t_out
    return meta


# ----------------------------------------------------------------------------
# Fused kernel factory (one grid step = one batch block of size Bb)
# ----------------------------------------------------------------------------
def _make_fused_kernel(Bb, T0, conv_meta, gru_hidden, num_gru_heads,
                       attention_heads):
    n_conv = len(conv_meta)
    HH = num_gru_heads * gru_hidden          # concatenated GRU width == attn embed dim
    E = HH
    Hp = _round_up(HH, 128)                  # lane-padded per-gate / hidden width
    Dh = E // attention_heads
    Dp = 128                                 # lane-padded per-attention-head width
    NHa = attention_heads
    T_seq = conv_meta[-1][5] if n_conv else T0

    def kernel(*refs):
        i = 0
        x_ref = refs[i]; i += 1
        conv_refs = []
        for _ in range(n_conv):
            conv_refs.append(refs[i:i + 4]); i += 4
        wih_ref, whh_ref, bih_ref, bhn_ref = refs[i:i + 4]; i += 4
        wqkv_ref, bqkv_ref, wo_ref, bo_ref = refs[i:i + 4]; i += 4
        w1_ref, b1_ref, w2_ref, b2_ref = refs[i:i + 4]; i += 4
        o_ref = refs[i]; i += 1
        pad_scr = refs[i:i + n_conv]; i += n_conv
        comb_scr = refs[i]

        bf16 = jnp.bfloat16

        # ---------------- Conv1d -> ReLU -> BatchNorm1d(eval) blocks ----------------
        h = x_ref[...]                                            # (Bb, T, Cin) f32
        for (K, pad, Cin, Cout, T_in, T_out), (w_ref, b_ref, sc_ref, sh_ref), xp_ref in zip(
                conv_meta, conv_refs, pad_scr):
            # halo-only zeroing of the padded scratch, then interior store
            if pad > 0:
                xp_ref[:, :pad, :] = jnp.zeros((Bb, pad, Cin), jnp.float32)
                xp_ref[:, pad + T_in:pad + T_in + pad, :] = jnp.zeros(
                    (Bb, pad, Cin), jnp.float32)
            xp_ref[:, pad:pad + T_in, :] = h
            # K accumulated per-tap matmuls (no lane-domain im2col concatenate)
            acc = None
            for k in range(K):
                xk = xp_ref[:, k:k + T_out, :].reshape(Bb * T_out, Cin).astype(bf16)
                part = jnp.dot(xk, w_ref[k], preferred_element_type=jnp.float32)
                acc = part if acc is None else acc + part
            y = jnp.maximum(acc + b_ref[...], 0.0)                # ReLU (module order: Conv->ReLU->BN)
            y = y * sc_ref[...] + sh_ref[...]                     # BatchNorm1d eval (folded)
            h = y.reshape(Bb, T_out, Cout)

        Cgru = conv_meta[-1][3] if n_conv else x_ref.shape[-1]

        # ---------------- Multi-head GRU (heads fused, lane-aligned gates) ----------
        x_flat = h.reshape(Bb * T_seq, Cgru).astype(bf16)
        # gate-major [r | z | n], each gate padded to Hp lanes; b_hr/b_hz already folded
        gx_all = (jnp.dot(x_flat, wih_ref[...], preferred_element_type=jnp.float32)
                  + bih_ref[...]).reshape(Bb, T_seq, 3 * Hp)
        whh = whh_ref[...]                                        # (Hp, 3*Hp) bf16, block-diag
        bhn = bhn_ref[...]                                        # (1, Hp) f32
        hstate = jnp.zeros((Bb, Hp), jnp.float32)
        # NOTE: static unroll is fine at T_seq=8; switch to lax.fori_loop for large T.
        for t in range(T_seq):
            gx = gx_all[:, t, :]
            gh = jnp.dot(hstate.astype(bf16), whh,
                         preferred_element_type=jnp.float32)
            r = jax.nn.sigmoid(gx[:, 0:Hp] + gh[:, 0:Hp])
            z = jax.nn.sigmoid(gx[:, Hp:2 * Hp] + gh[:, Hp:2 * Hp])
            n = jnp.tanh(gx[:, 2 * Hp:3 * Hp] + r * (gh[:, 2 * Hp:3 * Hp] + bhn))
            hstate = (1.0 - z) * n + z * hstate
            comb_scr[:, t, :] = hstate                            # 128-lane unmasked store

        # ---------------- MultiheadAttention (self) + mean + FC head ----------------
        comb = comb_scr[...].reshape(Bb * T_seq, Hp).astype(bf16)
        # Q/K/V per head padded to 128 lanes (zero pad is exact); scale folded into Q.
        qkv = jnp.dot(comb, wqkv_ref[...],
                      preferred_element_type=jnp.float32) + bqkv_ref[...]
        attn = jnp.zeros((Bb * T_seq, E), jnp.float32)
        for hd in range(NHa):
            q0 = hd * Dp
            k0 = NHa * Dp + hd * Dp
            v0 = 2 * NHa * Dp + hd * Dp
            qh = qkv[:, q0:q0 + Dp].reshape(Bb, T_seq, Dp).astype(bf16)
            kh = qkv[:, k0:k0 + Dp].reshape(Bb, T_seq, Dp).astype(bf16)
            vh = qkv[:, v0:v0 + Dp].reshape(Bb, T_seq, Dp).astype(bf16)
            s = jnp.einsum("bqd,bkd->bqk", qh, kh,
                           preferred_element_type=jnp.float32)
            s = s - jnp.max(s, axis=-1, keepdims=True)
            es = jnp.exp(s)
            p = es / jnp.sum(es, axis=-1, keepdims=True)          # exact softmax
            oh = jnp.einsum("bqk,bkd->bqd", p.astype(bf16), vh,
                            preferred_element_type=jnp.float32)
            # per-head out-projection accumulated (padded rows of wo are zero -> exact)
            attn = attn + jnp.dot(oh.reshape(Bb * T_seq, Dp).astype(bf16),
                                  wo_ref[hd], preferred_element_type=jnp.float32)
        attn = attn + bo_ref[...]
        ctx = jnp.mean(attn.reshape(Bb, T_seq, E), axis=1)        # (Bb, E)
        h1 = jnp.maximum(
            jnp.dot(ctx.astype(bf16), w1_ref[...],
                    preferred_element_type=jnp.float32) + b1_ref[...], 0.0)
        out = jnp.dot(h1.astype(bf16), w2_ref[...],
                      preferred_element_type=jnp.float32) + b2_ref[...]
        o_ref[...] = out.reshape(1, Bb, 1)

    return kernel


# ----------------------------------------------------------------------------
# Wrapper: one fused pallas_call; optional batch grid for v7x megacore
# ----------------------------------------------------------------------------
def combined_net_forward(x, params, conv_configs, gru_hidden, num_gru_heads,
                         attention_heads, batch_blocks=1):
    B, T, input_dim = x.shape
    assert B % batch_blocks == 0
    Bb = B // batch_blocks
    meta = _conv_meta(input_dim, conv_configs, T)
    T_seq = meta[-1][5] if meta else T
    Hp = _round_up(num_gru_heads * gru_hidden, 128)

    kernel = _make_fused_kernel(Bb, T, meta, gru_hidden, num_gru_heads,
                                attention_heads)

    def const_spec(a):
        nd = a.ndim
        return pl.BlockSpec(a.shape, lambda i, _nd=nd: (0,) * _nd)

    inputs = [x]
    in_specs = [pl.BlockSpec((Bb, T, input_dim), lambda i: (i, 0, 0))]
    for blk in params["conv_blocks"]:
        for a in blk:
            inputs.append(a)
            in_specs.append(const_spec(a))
    for name in ("gru_wih", "gru_whh", "gru_bih", "gru_bhn",
                 "mha_wqkv", "mha_bqkv", "mha_wo", "mha_bo",
                 "fc_w1", "fc_b1", "fc_w2", "fc_b2"):
        a = params[name]
        inputs.append(a)
        in_specs.append(const_spec(a))

    # Scratch: zero-padded conv activation per block (f32) + 128-lane GRU output.
    scratch = [pltpu.VMEM((Bb, m[4] + 2 * m[1], m[2]), jnp.float32) for m in meta]
    scratch.append(pltpu.VMEM((Bb, T_seq, Hp), jnp.float32))

    out = pl.pallas_call(
        kernel,
        grid=(batch_blocks,),
        in_specs=in_specs,
        out_specs=pl.BlockSpec((1, Bb, 1), lambda i: (i, 0, 0)),
        out_shape=jax.ShapeDtypeStruct((batch_blocks, Bb, 1), jnp.float32),
        scratch_shapes=scratch,
        compiler_params=pltpu.CompilerParams(
            dimension_semantics=("parallel",)),     # v7x: batch_blocks=2 uses both TCs
    )(*inputs)
    return out.reshape(B)                           # .squeeze(1)


# ----------------------------------------------------------------------------
# Parameter init (deterministic, synthetic) in kernel-ready, lane-aligned layouts
# ----------------------------------------------------------------------------
def init_params(key, input_dim, conv_configs, gru_hidden, fc_hidden,
                num_gru_heads, attention_heads, eps=1e-5):
    keys = iter(jax.random.split(key, 64))

    def nrm(shape, s=0.1):
        return jax.random.normal(next(keys), shape, jnp.float32) * s

    params = {}

    # Conv blocks: PyTorch Conv1d weight (Cout, Cin, K) -> per-tap (K, Cin, Cout) bf16.
    conv_blocks = []
    cin = input_dim
    for (cout, k, _pad) in conv_configs:
        w = nrm((cout, cin, k))
        b = nrm((cout,))
        gamma = 1.0 + nrm((cout,))
        beta = nrm((cout,))
        run_mean = jnp.zeros((cout,), jnp.float32)
        run_var = jnp.ones((cout,), jnp.float32)
        scale = gamma / jnp.sqrt(run_var + eps)
        shift = beta - run_mean * scale
        w_taps = jnp.transpose(w, (2, 1, 0)).astype(jnp.bfloat16)   # (K, Cin, Cout)
        conv_blocks.append((w_taps, b.reshape(1, -1),
                            scale.reshape(1, -1), shift.reshape(1, -1)))
        cin = cout
    params["conv_blocks"] = conv_blocks
    conv_out = cin

    # Multi-head GRU, fused gate-major / head-minor, each gate lane-padded to Hp=128.
    # b_hr / b_hz folded into the input bias; only b_hn kept for the per-step add.
    H, NH = gru_hidden, num_gru_heads
    HH = NH * H
    Hp = _round_up(HH, 128)
    wih = nrm((NH, 3 * H, conv_out))        # per head W_ih, gate order [r; z; n]
    whh = nrm((NH, 3 * H, H))
    bih = nrm((NH, 3 * H))
    bhh = nrm((NH, 3 * H))

    wih_pad = jnp.zeros((conv_out, 3 * Hp), jnp.float32)
    whh_pad = jnp.zeros((Hp, 3 * Hp), jnp.float32)
    bih_pad = jnp.zeros((1, 3 * Hp), jnp.float32)
    bhn_pad = jnp.zeros((1, Hp), jnp.float32)
    for g in range(3):                       # 0=r, 1=z, 2=n
        for h in range(NH):
            col = g * Hp + h * H
            wih_pad = wih_pad.at[:, col:col + H].set(wih[h, g * H:(g + 1) * H, :].T)
            whh_pad = whh_pad.at[h * H:(h + 1) * H, col:col + H].set(
                whh[h, g * H:(g + 1) * H, :].T)
            bg = bih[h, g * H:(g + 1) * H]
            if g < 2:                        # fold b_hr / b_hz
                bg = bg + bhh[h, g * H:(g + 1) * H]
            bih_pad = bih_pad.at[0, col:col + H].set(bg)
            if g == 2:
                bhn_pad = bhn_pad.at[0, h * H:(h + 1) * H].set(bhh[h, g * H:(g + 1) * H])
    params["gru_wih"] = wih_pad.astype(jnp.bfloat16)
    params["gru_whh"] = whh_pad.astype(jnp.bfloat16)
    params["gru_bih"] = bih_pad
    params["gru_bhn"] = bhn_pad

    # MultiheadAttention (batch_first, eval): per-head Q/K/V columns padded to 128
    # lanes; 1/sqrt(Dh) folded into Q weight+bias; per-head out-proj rows padded.
    E = HH
    assert E % attention_heads == 0
    Dh = E // attention_heads
    assert Dh <= 128
    Dp = 128
    NHa = attention_heads
    in_proj_w = nrm((3 * E, E))              # rows [q; k; v]
    in_proj_b = nrm((3 * E,))
    out_proj_w = nrm((E, E))
    out_proj_b = nrm((E,))
    scale = 1.0 / math.sqrt(Dh)

    wqkv = jnp.zeros((Hp, 3 * NHa * Dp), jnp.float32)
    bqkv = jnp.zeros((1, 3 * NHa * Dp), jnp.float32)
    for grp in range(3):                     # q, k, v
        wg = in_proj_w[grp * E:(grp + 1) * E, :]
        bg = in_proj_b[grp * E:(grp + 1) * E]
        if grp == 0:
            wg = wg * scale
            bg = bg * scale
        for hd in range(NHa):
            col = grp * NHa * Dp + hd * Dp
            wqkv = wqkv.at[:E, col:col + Dh].set(wg[hd * Dh:(hd + 1) * Dh, :].T)
            bqkv = bqkv.at[0, col:col + Dh].set(bg[hd * Dh:(hd + 1) * Dh])
    params["mha_wqkv"] = wqkv.astype(jnp.bfloat16)
    params["mha_bqkv"] = bqkv

    wo = jnp.zeros((NHa, Dp, E), jnp.float32)
    for hd in range(NHa):
        wo = wo.at[hd, :Dh, :].set(out_proj_w[:, hd * Dh:(hd + 1) * Dh].T)
    params["mha_wo"] = wo.astype(jnp.bfloat16)
    params["mha_bo"] = out_proj_b.reshape(1, -1)

    # FC head: Linear(E, F) -> ReLU -> Dropout(eval) -> Linear(F, 1)
    w1 = nrm((fc_hidden, E)); b1 = nrm((fc_hidden,))
    w2 = nrm((1, fc_hidden)); b2 = nrm((1,))
    params["fc_w1"] = w1.T.astype(jnp.bfloat16)
    params["fc_b1"] = b1.reshape(1, -1)
    params["fc_w2"] = w2.T.astype(jnp.bfloat16)
    params["fc_b2"] = b2.reshape(1, -1)
    return params


if __name__ == "__main__":
    # Small shapes consistent with the module's forward signature.
    B, T, input_dim = 2, 8, 4
    conv_configs = [(8, 3, 1), (16, 3, 1)]
    gru_hidden = 32
    fc_hidden = 16
    num_gru_heads = 3
    attention_heads = 4          # embed_dim = 32*3 = 96, head_dim = 24

    key = jax.random.PRNGKey(0)
    kx, kp = jax.random.split(key)
    x = jax.random.normal(kx, (B, T, input_dim), jnp.float32)
    params = init_params(kp, input_dim, conv_configs, gru_hidden, fc_hidden,
                         num_gru_heads, attention_heads)

    # Default path: whole batch in one kernel (best for single-TC v5e/v6e).
    out1 = combined_net_forward(x, params, conv_configs, gru_hidden,
                                num_gru_heads, attention_heads, batch_blocks=1)
    out1 = jax.block_until_ready(out1)
    # Megacore path (v7x): split the batch across the parallel grid.
    out2 = combined_net_forward(x, params, conv_configs, gru_hidden,
                                num_gru_heads, attention_heads, batch_blocks=2)
    out2 = jax.block_until_ready(out2)

    assert out1.shape == (B,) and out2.shape == (B,)
    assert bool(jnp.all(jnp.isfinite(out1)))
    assert bool(jnp.allclose(out1, out2, atol=5e-3, rtol=1e-3))
    print("KERNEL_OK")
</pallas_src>

<mosaic_0001>
module attributes {stable_mosaic.version = 11 : i64} {
  func.func @kernel(%arg0: i32, %arg1: memref<2x8x4xf32, #tpu.memory_space<vmem>>, %arg2: memref<3x4x8xbf16, #tpu.memory_space<vmem>>, %arg3: memref<1x8xf32, #tpu.memory_space<vmem>>, %arg4: memref<1x8xf32, #tpu.memory_space<vmem>>, %arg5: memref<1x8xf32, #tpu.memory_space<vmem>>, %arg6: memref<3x8x16xbf16, #tpu.memory_space<vmem>>, %arg7: memref<1x16xf32, #tpu.memory_space<vmem>>, %arg8: memref<1x16xf32, #tpu.memory_space<vmem>>, %arg9: memref<1x16xf32, #tpu.memory_space<vmem>>, %arg10: memref<16x384xbf16, #tpu.memory_space<vmem>>, %arg11: memref<128x384xbf16, #tpu.memory_space<vmem>>, %arg12: memref<1x384xf32, #tpu.memory_space<vmem>>, %arg13: memref<1x128xf32, #tpu.memory_space<vmem>>, %arg14: memref<128x1536xbf16, #tpu.memory_space<vmem>>, %arg15: memref<1x1536xf32, #tpu.memory_space<vmem>>, %arg16: memref<4x128x96xbf16, #tpu.memory_space<vmem>>, %arg17: memref<1x96xf32, #tpu.memory_space<vmem>>, %arg18: memref<96x16xbf16, #tpu.memory_space<vmem>>, %arg19: memref<1x16xf32, #tpu.memory_space<vmem>>, %arg20: memref<16x1xbf16, #tpu.memory_space<vmem>>, %arg21: memref<1x1xf32, #tpu.memory_space<vmem>>, %arg22: memref<1x2x1xf32, #tpu.memory_space<vmem>>, %arg23: memref<2x10x4xf32, #tpu.memory_space<vmem>>, %arg24: memref<2x10x8xf32, #tpu.memory_space<vmem>>, %arg25: memref<2x8x128xf32, #tpu.memory_space<vmem>>) attributes {dimension_semantics = [#tpu.dimension_semantics<parallel>], iteration_bounds = array<i64: 1>, scalar_prefetch = 0 : i64, scratch_operands = 3 : i64, tpu.core_type = #tpu.core_type<tc>, window_params = [{transform_indices = @transform_0, window_bounds = array<i64: 2, 8, 4>}, {pipeline_mode = #tpu.pipeline_mode<synchronous>, transform_indices = @transform_1, window_bounds = array<i64: 3, 4, 8>}, {pipeline_mode = #tpu.pipeline_mode<synchronous>, transform_indices = @transform_2, window_bounds = array<i64: 1, 8>}, {pipeline_mode = #tpu.pipeline_mode<synchronous>, transform_indices = @transform_3, window_bounds = array<i64: 1, 8>}, {pipeline_mode = #tpu.pipeline_mode<synchronous>, transform_indices = @transform_4, window_bounds = array<i64: 1, 8>}, {pipeline_mode = #tpu.pipeline_mode<synchronous>, transform_indices = @transform_5, window_bounds = array<i64: 3, 8, 16>}, {pipeline_mode = #tpu.pipeline_mode<synchronous>, transform_indices = @transform_6, window_bounds = array<i64: 1, 16>}, {pipeline_mode = #tpu.pipeline_mode<synchronous>, transform_indices = @transform_7, window_bounds = array<i64: 1, 16>}, {pipeline_mode = #tpu.pipeline_mode<synchronous>, transform_indices = @transform_8, window_bounds = array<i64: 1, 16>}, {pipeline_mode = #tpu.pipeline_mode<synchronous>, transform_indices = @transform_9, window_bounds = array<i64: 16, 384>}, {pipeline_mode = #tpu.pipeline_mode<synchronous>, transform_indices = @transform_10, window_bounds = array<i64: 128, 384>}, {pipeline_mode = #tpu.pipeline_mode<synchronous>, transform_indices = @transform_11, window_bounds = array<i64: 1, 384>}, {pipeline_mode = #tpu.pipeline_mode<synchronous>, transform_indices = @transform_12, window_bounds = array<i64: 1, 128>}, {pipeline_mode = #tpu.pipeline_mode<synchronous>, transform_indices = @transform_13, window_bounds = array<i64: 128, 1536>}, {pipeline_mode = #tpu.pipeline_mode<synchronous>, transform_indices = @transform_14, window_bounds = array<i64: 1, 1536>}, {pipeline_mode = #tpu.pipeline_mode<synchronous>, transform_indices = @transform_15, window_bounds = array<i64: 4, 128, 96>}, {pipeline_mode = #tpu.pipeline_mode<synchronous>, transform_indices = @transform_16, window_bounds = array<i64: 1, 96>}, {pipeline_mode = #tpu.pipeline_mode<synchronous>, transform_indices = @transform_17, window_bounds = array<i64: 96, 16>}, {pipeline_mode = #tpu.pipeline_mode<synchronous>, transform_indices = @transform_18, window_bounds = array<i64: 1, 16>}, {pipeline_mode = #tpu.pipeline_mode<synchronous>, transform_indices = @transform_19, window_bounds = array<i64: 16, 1>}, {pipeline_mode = #tpu.pipeline_mode<synchronous>, transform_indices = @transform_20, window_bounds = array<i64: 1, 1>}, {transform_indices = @transform_21, window_bounds = array<i64: 1, 2, 1>}]} {
    %c0 = arith.constant 0 : index
    %c0_0 = arith.constant 0 : index
    %c0_1 = arith.constant 0 : index
    %0 = vector.load %arg1[%c0, %c0_0, %c0_1] : memref<2x8x4xf32, #tpu.memory_space<vmem>>, vector<2x8x4xf32>
    %cst = arith.constant 0.000000e+00 : f32
    %1 = vector.broadcast %cst : f32 to vector<2x1x4xf32>
    %c0_2 = arith.constant 0 : index
    %c0_3 = arith.constant 0 : index
    %c0_4 = arith.constant 0 : index
    %2 = vector.load %arg23[%c0_2, %c0_3, %c0_4] : memref<2x10x4xf32, #tpu.memory_space<vmem>>, vector<2x1x4xf32>
    tpu.vector_store %arg23[%c0_2, %c0_3, %c0_4], %1 {strides = array<i32>} : memref<2x10x4xf32, #tpu.memory_space<vmem>>, vector<2x1x4xf32>,
    %cst_5 = arith.constant 0.000000e+00 : f32
    %3 = vector.broadcast %cst_5 : f32 to vector<2x1x4xf32>
    %c0_6 = arith.constant 0 : index
    %c9 = arith.constant 9 : index
    %c0_7 = arith.constant 0 : index
    %4 = vector.load %arg23[%c0_6, %c9, %c0_7] : memref<2x10x4xf32, #tpu.memory_space<vmem>>, vector<2x1x4xf32>
    tpu.vector_store %arg23[%c0_6, %c9, %c0_7], %3 {strides = array<i32>} : memref<2x10x4xf32, #tpu.memory_space<vmem>>, vector<2x1x4xf32>,
    %c0_8 = arith.constant 0 : index
    %c1 = arith.constant 1 : index
    %c0_9 = arith.constant 0 : index
    %5 = vector.load %arg23[%c0_8, %c1, %c0_9] : memref<2x10x4xf32, #tpu.memory_space<vmem>>, vector<2x8x4xf32>
    tpu.vector_store %arg23[%c0_8, %c1, %c0_9], %0 {strides = array<i32>} : memref<2x10x4xf32, #tpu.memory_space<vmem>>, vector<2x8x4xf32>,
    %c0_10 = arith.constant 0 : index
    %c0_11 = arith.constant 0 : index
    %c0_12 = arith.constant 0 : index
    %6 = vector.load %arg23[%c0_10, %c0_11, %c0_12] : memref<2x10x4xf32, #tpu.memory_space<vmem>>, vector<2x8x4xf32>
    %7 = vector.shape_cast %6 : vector<2x8x4xf32> to vector<16x4xf32>
    %8 = arith.truncf %7 : vector<16x4xf32> to vector<16x4xbf16>
    %c0_13 = arith.constant 0 : index
    %c0_14 = arith.constant 0 : index
    %c0_15 = arith.constant 0 : index
    %9 = vector.load %arg2[%c0_13, %c0_14, %c0_15] : memref<3x4x8xbf16, #tpu.memory_space<vmem>>, vector<1x4x8xbf16>
    %10 = vector.shape_cast %9 : vector<1x4x8xbf16> to vector<4x8xbf16>
    %cst_16 = arith.constant dense<0.000000e+00> : vector<16x8xf32>
    %11 = tpu.matmul %8, %10, %cst_16 {dimension_numbers = #tpu.dot_dimension_numbers<[1], [0], [0], [1], [0, 0, 1, 1], [], []>} : vector<16x4xbf16>, vector<4x8xbf16>, vector<16x8xf32> -> vector<16x8xf32>
    %c0_17 = arith.constant 0 : index
    %c1_18 = arith.constant 1 : index
    %c0_19 = arith.constant 0 : index
    %12 = vector.load %arg23[%c0_17, %c1_18, %c0_19] : memref<2x10x4xf32, #tpu.memory_space<vmem>>, vector<2x8x4xf32>
    %13 = vector.shape_cast %12 : vector<2x8x4xf32> to vector<16x4xf32>
    %14 = arith.truncf %13 : vector<16x4xf32> to vector<16x4xbf16>
    %c1_20 = arith.constant 1 : index
    %c0_21 = arith.constant 0 : index
    %c0_22 = arith.constant 0 : index
    %15 = vector.load %arg2[%c1_20, %c0_21, %c0_22] : memref<3x4x8xbf16, #tpu.memory_space<vmem>>, vector<1x4x8xbf16>
    %16 = vector.shape_cast %15 : vector<1x4x8xbf16> to vector<4x8xbf16>
    %cst_23 = arith.constant dense<0.000000e+00> : vector<16x8xf32>
    %17 = tpu.matmul %14, %16, %cst_23 {dimension_numbers = #tpu.dot_dimension_numbers<[1], [0], [0], [1], [0, 0, 1, 1], [], []>} : vector<16x4xbf16>, vector<4x8xbf16>, vector<16x8xf32> -> vector<16x8xf32>
    %18 = arith.addf %11, %17 : vector<16x8xf32>
    %c0_24 = arith.constant 0 : index
    %c2 = arith.constant 2 : index
    %c0_25 = arith.constant 0 : index
    %19 = vector.load %arg23[%c0_24, %c2, %c0_25] : memref<2x10x4xf32, #tpu.memory_space<vmem>>, vector<2x8x4xf32>
    %20 = vector.shape_cast %19 : vector<2x8x4xf32> to vector<16x4xf32>
    %21 = arith.truncf %20 : vector<16x4xf32> to vector<16x4xbf16>
    %c2_26 = arith.constant 2 : index
    %c0_27 = arith.constant 0 : index
    %c0_28 = arith.constant 0 : index
    %22 = vector.load %arg2[%c2_26, %c0_27, %c0_28] : memref<3x4x8xbf16, #tpu.memory_space<vmem>>, vector<1x4x8xbf16>
    %23 = vector.shape_cast %22 : vector<1x4x8xbf16> to vector<4x8xbf16>
    %cst_29 = arith.constant dense<0.000000e+00> : vector<16x8xf32>
    %24 = tpu.matmul %21, %23, %cst_29 {dimension_numbers = #tpu.dot_dimension_numbers<[1], [0], [0], [1], [0, 0, 1, 1], [], []>} : vector<16x4xbf16>, vector<4x8xbf16>, vector<16x8xf32> -> vector<16x8xf32>
    %25 = arith.addf %18, %24 : vector<16x8xf32>
    %c0_30 = arith.constant 0 : index
    %c0_31 = arith.constant 0 : index
    %26 = vector.load %arg3[%c0_30, %c0_31] : memref<1x8xf32, #tpu.memory_space<vmem>>, vector<1x8xf32>
    %27 = vector.broadcast %26 : vector<1x8xf32> to vector<16x8xf32>
    %28 = arith.addf %25, %27 : vector<16x8xf32>
    %cst_32 = arith.constant 0.000000e+00 : f32
    %29 = vector.broadcast %cst_32 : f32 to vector<16x8xf32>
    %30 = arith.maximumf %28, %29 : vector<16x8xf32>
    %c0_33 = arith.constant 0 : index
    %c0_34 = arith.constant 0 : index
    %31 = vector.load %arg4[%c0_33, %c0_34] : memref<1x8xf32, #tpu.memory_space<vmem>>, vector<1x8xf32>
    %32 = vector.broadcast %31 : vector<1x8xf32> to vector<16x8xf32>
    %33 = arith.mulf %30, %32 : vector<16x8xf32>
    %c0_35 = arith.constant 0 : index
    %c0_36 = arith.constant 0 : index
    %34 = vector.load %arg5[%c0_35, %c0_36] : memref<1x8xf32, #tpu.memory_space<vmem>>, vector<1x8xf32>
    %35 = vector.broadcast %34 : vector<1x8xf32> to vector<16x8xf32>
    %36 = arith.addf %33, %35 : vector<16x8xf32>
    %37 = vector.shape_cast %36 : vector<16x8xf32> to vector<2x8x8xf32>
    %cst_37 = arith.constant 0.000000e+00 : f32
    %38 = vector.broadcast %cst_37 : f32 to vector<2x1x8xf32>
    %c0_38 = arith.constant 0 : index
    %c0_39 = arith.constant 0 : index
    %c0_40 = arith.constant 0 : index
    %39 = vector.load %arg24[%c0_38, %c0_39, %c0_40] : memref<2x10x8xf32, #tpu.memory_space<vmem>>, vector<2x1x8xf32>
    tpu.vector_store %arg24[%c0_38, %c0_39, %c0_40], %38 {strides = array<i32>} : memref<2x10x8xf32, #tpu.memory_space<vmem>>, vector<2x1x8xf32>,
    %cst_41 = arith.constant 0.000000e+00 : f32
    %40 = vector.broadcast %cst_41 : f32 to vector<2x1x8xf32>
    %c0_42 = arith.constant 0 : index
    %c9_43 = arith.constant 9 : index
    %c0_44 = arith.constant 0 : index
    %41 = vector.load %arg24[%c0_42, %c9_43, %c0_44] : memref<2x10x8xf32, #tpu.memory_space<vmem>>, vector<2x1x8xf32>
    tpu.vector_store %arg24[%c0_42, %c9_43, %c0_44], %40 {strides = array<i32>} : memref<2x10x8xf32, #tpu.memory_space<vmem>>, vector<2x1x8xf32>,
    %c0_45 = arith.constant 0 : index
    %c1_46 = arith.constant 1 : index
    %c0_47 = arith.constant 0 : index
    %42 = vector.load %arg24[%c0_45, %c1_46, %c0_47] : memref<2x10x8xf32, #tpu.memory_space<vmem>>, vector<2x8x8xf32>
    tpu.vector_store %arg24[%c0_45, %c1_46, %c0_47], %37 {strides = array<i32>} : memref<2x10x8xf32, #tpu.memory_space<vmem>>, vector<2x8x8xf32>,
    %c0_48 = arith.constant 0 : index
    %c0_49 = arith.constant 0 : index
    %c0_50 = arith.constant 0 : index
    %43 = vector.load %arg24[%c0_48, %c0_49, %c0_50] : memref<2x10x8xf32, #tpu.memory_space<vmem>>, vector<2x8x8xf32>
    %44 = vector.shape_cast %43 : vector<2x8x8xf32> to vector<16x8xf32>
    %45 = arith.truncf %44 : vector<16x8xf32> to vector<16x8xbf16>
    %c0_51 = arith.constant 0 : index
    %c0_52 = arith.constant 0 : index
    %c0_53 = arith.constant 0 : index
    %46 = vector.load %arg6[%c0_51, %c0_52, %c0_53] : memref<3x8x16xbf16, #tpu.memory_space<vmem>>, vector<1x8x16xbf16>
    %47 = vector.shape_cast %46 : vector<1x8x16xbf16> to vector<8x16xbf16>
    %cst_54 = arith.constant dense<0.000000e+00> : vector<16x16xf32>
    %48 = tpu.matmul %45, %47, %cst_54 {dimension_numbers = #tpu.dot_dimension_numbers<[1], [0], [0], [1], [0, 0, 1, 1], [], []>} : vector<16x8xbf16>, vector<8x16xbf16>, vector<16x16xf32> -> vector<16x16xf32>
    %c0_55 = arith.constant 0 : index
    %c1_56 = arith.constant 1 : index
    %c0_57 = arith.constant 0 : index
    %49 = vector.load %arg24[%c0_55, %c1_56, %c0_57] : memref<2x10x8xf32, #tpu.memory_space<vmem>>, vector<2x8x8xf32>
    %50 = vector.shape_cast %49 : vector<2x8x8xf32> to vector<16x8xf32>
    %51 = arith.truncf %50 : vector<16x8xf32> to vector<16x8xbf16>
    %c1_58 = arith.constant 1 : index
    %c0_59 = arith.constant 0 : index
    %c0_60 = arith.constant 0 : index
    %52 = vector.load %arg6[%c1_58, %c0_59, %c0_60] : memref<3x8x16xbf16, #tpu.memory_space<vmem>>, vector<1x8x16xbf16>
    %53 = vector.shape_cast %52 : vector<1x8x16xbf16> to vector<8x16xbf16>
    %cst_61 = arith.constant dense<0.000000e+00> : vector<16x16xf32>
    %54 = tpu.matmul %51, %53, %cst_61 {dimension_numbers = #tpu.dot_dimension_numbers<[1], [0], [0], [1], [0, 0, 1, 1], [], []>} : vector<16x8xbf16>, vector<8x16xbf16>, vector<16x16xf32> -> vector<16x16xf32>
    %55 = arith.addf %48, %54 : vector<16x16xf32>
    %c0_62 = arith.constant 0 : index
    %c2_63 = arith.constant 2 : index
    %c0_64 = arith.constant 0 : index
    %56 = vector.load %arg24[%c0_62, %c2_63, %c0_64] : memref<2x10x8xf32, #tpu.memory_space<vmem>>, vector<2x8x8xf32>
    %57 = vector.shape_cast %56 : vector<2x8x8xf32> to vector<16x8xf32>
    %58 = arith.truncf %57 : vector<16x8xf32> to vector<16x8xbf16>
    %c2_65 = arith.constant 2 : index
    %c0_66 = arith.constant 0 : index
    %c0_67 = arith.constant 0 : index
    %59 = vector.load %arg6[%c2_65, %c0_66, %c0_67] : memref<3x8x16xbf16, #tpu.memory_space<vmem>>, vector<1x8x16xbf16>
    %60 = vector.shape_cast %59 : vector<1x8x16xbf16> to vector<8x16xbf16>
    %cst_68 = arith.constant dense<0.000000e+00> : vector<16x16xf32>
    %61 = tpu.matmul %58, %60, %cst_68 {dimension_numbers = #tpu.dot_dimension_numbers<[1], [0], [0], [1], [0, 0, 1, 1], [], []>} : vector<16x8xbf16>, vector<8x16xbf16>, vector<16x16xf32> -> vector<16x16xf32>
    %62 = arith.addf %55, %61 : vector<16x16xf32>
    %c0_69 = arith.constant 0 : index
    %c0_70 = arith.constant 0 : index
    %63 = vector.load %arg7[%c0_69, %c0_70] : memref<1x16xf32, #tpu.memory_space<vmem>>, vector<1x16xf32>
    %64 = vector.broadcast %63 : vector<1x16xf32> to vector<16x16xf32>
    %65 = arith.addf %62, %64 : vector<16x16xf32>
    %cst_71 = arith.constant 0.000000e+00 : f32
    %66 = vector.broadcast %cst_71 : f32 to vector<16x16xf32>
    %67 = arith.maximumf %65, %66 : vector<16x16xf32>
    %c0_72 = arith.constant 0 : index
    %c0_73 = arith.constant 0 : index
    %68 = vector.load %arg8[%c0_72, %c0_73] : memref<1x16xf32, #tpu.memory_space<vmem>>, vector<1x16xf32>
    %69 = vector.broadcast %68 : vector<1x16xf32> to vector<16x16xf32>
    %70 = arith.mulf %67, %69 : vector<16x16xf32>
    %c0_74 = arith.constant 0 : index
    %c0_75 = arith.constant 0 : index
    %71 = vector.load %arg9[%c0_74, %c0_75] : memref<1x16xf32, #tpu.memory_space<vmem>>, vector<1x16xf32>
    %72 = vector.broadcast %71 : vector<1x16xf32> to vector<16x16xf32>
    %73 = arith.addf %70, %72 : vector<16x16xf32>
    %74 = vector.shape_cast %73 : vector<16x16xf32> to vector<2x8x16xf32>
    %75 = vector.shape_cast %74 : vector<2x8x16xf32> to vector<16x16xf32>
    %76 = arith.truncf %75 : vector<16x16xf32> to vector<16x16xbf16>
    %c0_76 = arith.constant 0 : index
    %c0_77 = arith.constant 0 : index
    %77 = vector.load %arg10[%c0_76, %c0_77] : memref<16x384xbf16, #tpu.memory_space<vmem>>, vector<16x384xbf16>
    %cst_78 = arith.constant dense<0.000000e+00> : vector<16x384xf32>
    %78 = tpu.matmul %76, %77, %cst_78 {dimension_numbers = #tpu.dot_dimension_numbers<[1], [0], [0], [1], [0, 0, 1, 1], [], []>} : vector<16x16xbf16>, vector<16x384xbf16>, vector<16x384xf32> -> vector<16x384xf32>
    %c0_79 = arith.constant 0 : index
    %c0_80 = arith.constant 0 : index
    %79 = vector.load %arg12[%c0_79, %c0_80] : memref<1x384xf32, #tpu.memory_space<vmem>>, vector<1x384xf32>
    %80 = vector.broadcast %79 : vector<1x384xf32> to vector<16x384xf32>
    %81 = arith.addf %78, %80 : vector<16x384xf32>
    %82 = vector.shape_cast %81 : vector<16x384xf32> to vector<2x8x384xf32>
    %c0_81 = arith.constant 0 : index
    %c0_82 = arith.constant 0 : index
    %83 = vector.load %arg11[%c0_81, %c0_82] : memref<128x384xbf16, #tpu.memory_space<vmem>>, vector<128x384xbf16>
    %c0_83 = arith.constant 0 : index
    %c0_84 = arith.constant 0 : index
    %84 = vector.load %arg13[%c0_83, %c0_84] : memref<1x128xf32, #tpu.memory_space<vmem>>, vector<1x128xf32>
    %cst_85 = arith.constant 0.000000e+00 : f32
    %85 = vector.broadcast %cst_85 : f32 to vector<2x128xf32>
    %86 = vector.extract_strided_slice %82 {offsets = [0, 0, 0], sizes = [2, 1, 384], strides = [1, 1, 1]} : vector<2x8x384xf32> to vector<2x1x384xf32>
    %87 = vector.shape_cast %86 : vector<2x1x384xf32> to vector<2x384xf32>
    %88 = arith.truncf %85 : vector<2x128xf32> to vector<2x128xbf16>
    %cst_86 = arith.constant dense<0.000000e+00> : vector<2x384xf32>
    %89 = tpu.matmul %88, %83, %cst_86 {dimension_numbers = #tpu.dot_dimension_numbers<[1], [0], [0], [1], [0, 0, 1, 1], [], []>} : vector<2x128xbf16>, vector<128x384xbf16>, vector<2x384xf32> -> vector<2x384xf32>
    %90 = vector.extract_strided_slice %87 {offsets = [0, 0], sizes = [2, 128], strides = [1, 1]} : vector<2x384xf32> to vector<2x128xf32>
    %91 = vector.extract_strided_slice %89 {offsets = [0, 0], sizes = [2, 128], strides = [1, 1]} : vector<2x384xf32> to vector<2x128xf32>
    %92 = arith.addf %90, %91 : vector<2x128xf32>
    %93 = arith.negf %92 : vector<2x128xf32>
    %94 = math.exp %93 : vector<2x128xf32>
    %cst_87 = arith.constant 1.000000e+00 : f32
    %95 = vector.broadcast %cst_87 : f32 to vector<2x128xf32>
    %96 = arith.addf %95, %94 : vector<2x128xf32>
    %97 = arith.divf %95, %96 : vector<2x128xf32>
    %98 = vector.extract_strided_slice %87 {offsets = [0, 128], sizes = [2, 128], strides = [1, 1]} : vector<2x384xf32> to vector<2x128xf32>
    %99 = vector.extract_strided_slice %89 {offsets = [0, 128], sizes = [2, 128], strides = [1, 1]} : vector<2x384xf32> to vector<2x128xf32>
    %100 = arith.addf %98, %99 : vector<2x128xf32>
    %101 = arith.negf %100 : vector<2x128xf32>
    %102 = math.exp %101 : vector<2x128xf32>
    %cst_88 = arith.constant 1.000000e+00 : f32
    %103 = vector.broadcast %cst_88 : f32 to vector<2x128xf32>
    %104 = arith.addf %103, %102 : vector<2x128xf32>
    %105 = arith.divf %103, %104 : vector<2x128xf32>
    %106 = vector.extract_strided_slice %87 {offsets = [0, 256], sizes = [2, 128], strides = [1, 1]} : vector<2x384xf32> to vector<2x128xf32>
    %107 = vector.extract_strided_slice %89 {offsets = [0, 256], sizes = [2, 128], strides = [1, 1]} : vector<2x384xf32> to vector<2x128xf32>
    %108 = vector.broadcast %84 : vector<1x128xf32> to vector<2x128xf32>
    %109 = arith.addf %107, %108 : vector<2x128xf32>
    %110 = arith.mulf %97, %109 : vector<2x128xf32>
    %111 = arith.addf %106, %110 : vector<2x128xf32>
    %112 = math.tanh %111 : vector<2x128xf32>
    %cst_89 = arith.constant 1.000000e+00 : f32
    %113 = vector.broadcast %cst_89 : f32 to vector<2x128xf32>
    %114 = arith.subf %113, %105 : vector<2x128xf32>
    %115 = arith.mulf %114, %112 : vector<2x128xf32>
    %116 = arith.mulf %105, %85 : vector<2x128xf32>
    %117 = arith.addf %115, %116 : vector<2x128xf32>
    %c0_90 = arith.constant 0 : index
    %c0_91 = arith.constant 0 : index
    %c0_92 = arith.constant 0 : index
    %118 = vector.load %arg25[%c0_90, %c0_91, %c0_92] : memref<2x8x128xf32, #tpu.memory_space<vmem>>, vector<2x1x128xf32>
    %119 = vector.shape_cast %118 : vector<2x1x128xf32> to vector<2x128xf32>
    %120 = vector.shape_cast %117 : vector<2x128xf32> to vector<2x1x128xf32>
    tpu.vector_store %arg25[%c0_90, %c0_91, %c0_92], %120 {strides = array<i32>} : memref<2x8x128xf32, #tpu.memory_space<vmem>>, vector<2x1x128xf32>,
    %121 = vector.extract_strided_slice %82 {offsets = [0, 1, 0], sizes = [2, 1, 384], strides = [1, 1, 1]} : vector<2x8x384xf32> to vector<2x1x384xf32>
    %122 = vector.shape_cast %121 : vector<2x1x384xf32> to vector<2x384xf32>
    %123 = arith.truncf %117 : vector<2x128xf32> to vector<2x128xbf16>
    %cst_93 = arith.constant dense<0.000000e+00> : vector<2x384xf32>
    %124 = tpu.matmul %123, %83, %cst_93 {dimension_numbers = #tpu.dot_dimension_numbers<[1], [0], [0], [1], [0, 0, 1, 1], [], []>} : vector<2x128xbf16>, vector<128x384xbf16>, vector<2x384xf32> -> vector<2x384xf32>
    %125 = vector.extract_strided_slice %122 {offsets = [0, 0], sizes = [2, 128], strides = [1, 1]} : vector<2x384xf32> to vector<2x128xf32>
    %126 = vector.extract_strided_slice %124 {offsets = [0, 0], sizes = [2, 128], strides = [1, 1]} : vector<2x384xf32> to vector<2x128xf32>
    %127 = arith.addf %125, %126 : vector<2x128xf32>
    %128 = arith.negf %127 : vector<2x128xf32>
    %129 = math.exp %128 : vector<2x128xf32>
    %cst_94 = arith.constant 1.000000e+00 : f32
    %130 = vector.broadcast %cst_94 : f32 to vector<2x128xf32>
    %131 = arith.addf %130, %129 : vector<2x128xf32>
    %132 = arith.divf %130, %131 : vector<2x128xf32>
    %133 = vector.extract_strided_slice %122 {offsets = [0, 128], sizes = [2, 128], strides = [1, 1]} : vector<2x384xf32> to vector<2x128xf32>
    %134 = vector.extract_strided_slice %124 {offsets = [0, 128], sizes = [2, 128], strides = [1, 1]} : vector<2x384xf32> to vector<2x128xf32>
    %135 = arith.addf %133, %134 : vector<2x128xf32>
    %136 = arith.negf %135 : vector<2x128xf32>
    %137 = math.exp %136 : vector<2x128xf32>
    %cst_95 = arith.constant 1.000000e+00 : f32
    %138 = vector.broadcast %cst_95 : f32 to vector<2x128xf32>
    %139 = arith.addf %138, %137 : vector<2x128xf32>
    %140 = arith.divf %138, %139 : vector<2x128xf32>
    %141 = vector.extract_strided_slice %122 {offsets = [0, 256], sizes = [2, 128], strides = [1, 1]} : vector<2x384xf32> to vector<2x128xf32>
    %142 = vector.extract_strided_slice %124 {offsets = [0, 256], sizes = [2, 128], strides = [1, 1]} : vector<2x384xf32> to vector<2x128xf32>
    %143 = vector.broadcast %84 : vector<1x128xf32> to vector<2x128xf32>
    %144 = arith.addf %142, %143 : vector<2x128xf32>
    %145 = arith.mulf %132, %144 : vector<2x128xf32>
    %146 = arith.addf %141, %145 : vector<2x128xf32>
    %147 = math.tanh %146 : vector<2x128xf32>
    %cst_96 = arith.constant 1.000000e+00 : f32
    %148 = vector.broadcast %cst_96 : f32 to vector<2x128xf32>
    %149 = arith.subf %148, %140 : vector<2x128xf32>
    %150 = arith.mulf %149, %147 : vector<2x128xf32>
    %151 = arith.mulf %140, %117 : vector<2x128xf32>
    %152 = arith.addf %150, %151 : vector<2x128xf32>
    %c0_97 = arith.constant 0 : index
    %c1_98 = arith.constant 1 : index
    %c0_99 = arith.constant 0 : index
    %153 = vector.load %arg25[%c0_97, %c1_98, %c0_99] : memref<2x8x128xf32, #tpu.memory_space<vmem>>, vector<2x1x128xf32>
    %154 = vector.shape_cast %153 : vector<2x1x128xf32> to vector<2x128xf32>
    %155 = vector.shape_cast %152 : vector<2x128xf32> to vector<2x1x128xf32>
    tpu.vector_store %arg25[%c0_97, %c1_98, %c0_99], %155 {strides = array<i32>} : memref<2x8x128xf32, #tpu.memory_space<vmem>>, vector<2x1x128xf32>,
    %156 = vector.extract_strided_slice %82 {offsets = [0, 2, 0], sizes = [2, 1, 384], strides = [1, 1, 1]} : vector<2x8x384xf32> to vector<2x1x384xf32>
    %157 = vector.shape_cast %156 : vector<2x1x384xf32> to vector<2x384xf32>
    %158 = arith.truncf %152 : vector<2x128xf32> to vector<2x128xbf16>
    %cst_100 = arith.constant dense<0.000000e+00> : vector<2x384xf32>
    %159 = tpu.matmul %158, %83, %cst_100 {dimension_numbers = #tpu.dot_dimension_numbers<[1], [0], [0], [1], [0, 0, 1, 1], [], []>} : vector<2x128xbf16>, vector<128x384xbf16>, vector<2x384xf32> -> vector<2x384xf32>
    %160 = vector.extract_strided_slice %157 {offsets = [0, 0], sizes = [2, 128], strides = [1, 1]} : vector<2x384xf32> to vector<2x128xf32>
    %161 = vector.extract_strided_slice %159 {offsets = [0, 0], sizes = [2, 128], strides = [1, 1]} : vector<2x384xf32> to vector<2x128xf32>
    %162 = arith.addf %160, %161 : vector<2x128xf32>
    %163 = arith.negf %162 : vector<2x128xf32>
    %164 = math.exp %163 : vector<2x128xf32>
    %cst_101 = arith.constant 1.000000e+00 : f32
    %165 = vector.broadcast %cst_101 : f32 to vector<2x128xf32>
    %166 = arith.addf %165, %164 : vector<2x128xf32>
    %167 = arith.divf %165, %166 : vector<2x128xf32>
    %168 = vector.extract_strided_slice %157 {offsets = [0, 128], sizes = [2, 128], strides = [1, 1]} : vector<2x384xf32> to vector<2x128xf32>
    %169 = vector.extract_strided_slice %159 {offsets = [0, 128], sizes = [2, 128], strides = [1, 1]} : vector<2x384xf32> to vector<2x128xf32>
    %170 = arith.addf %168, %169 : vector<2x128xf32>
    %171 = arith.negf %170 : vector<2x128xf32>
    %172 = math.exp %171 : vector<2x128xf32>
    %cst_102 = arith.constant 1.000000e+00 : f32
    %173 = vector.broadcast %cst_102 : f32 to vector<2x128xf32>
    %174 = arith.addf %173, %172 : vector<2x128xf32>
    %175 = arith.divf %173, %174 : vector<2x128xf32>
    %176 = vector.extract_strided_slice %157 {offsets = [0, 256], sizes = [2, 128], strides = [1, 1]} : vector<2x384xf32> to vector<2x128xf32>
    %177 = vector.extract_strided_slice %159 {offsets = [0, 256], sizes = [2, 128], strides = [1, 1]} : vector<2x384xf32> to vector<2x128xf32>
    %178 = vector.broadcast %84 : vector<1x128xf32> to vector<2x128xf32>
    %179 = arith.addf %177, %178 : vector<2x128xf32>
    %180 = arith.mulf %167, %179 : vector<2x128xf32>
    %181 = arith.addf %176, %180 : vector<2x128xf32>
    %182 = math.tanh %181 : vector<2x128xf32>
    %cst_103 = arith.constant 1.000000e+00 : f32
    %183 = vector.broadcast %cst_103 : f32 to vector<2x128xf32>
    %184 = arith.subf %183, %175 : vector<2x128xf32>
    %185 = arith.mulf %184, %182 : vector<2x128xf32>
    %186 = arith.mulf %175, %152 : vector<2x128xf32>
    %187 = arith.addf %185, %186 : vector<2x128xf32>
    %c0_104 = arith.constant 0 : index
    %c2_105 = arith.constant 2 : index
    %c0_106 = arith.constant 0 : index
    %188 = vector.load %arg25[%c0_104, %c2_105, %c0_106] : memref<2x8x128xf32, #tpu.memory_space<vmem>>, vector<2x1x128xf32>
    %189 = vector.shape_cast %188 : vector<2x1x128xf32> to vector<2x128xf32>
    %190 = vector.shape_cast %187 : vector<2x128xf32> to vector<2x1x128xf32>
    tpu.vector_store %arg25[%c0_104, %c2_105, %c0_106], %190 {strides = array<i32>} : memref<2x8x128xf32, #tpu.memory_space<vmem>>, vector<2x1x128xf32>,
    %191 = vector.extract_strided_slice %82 {offsets = [0, 3, 0], sizes = [2, 1, 384], strides = [1, 1, 1]} : vector<2x8x384xf32> to vector<2x1x384xf32>
    %192 = vector.shape_cast %191 : vector<2x1x384xf32> to vector<2x384xf32>
    %193 = arith.truncf %187 : vector<2x128xf32> to vector<2x128xbf16>
    %cst_107 = arith.constant dense<0.000000e+00> : vector<2x384xf32>
    %194 = tpu.matmul %193, %83, %cst_107 {dimension_numbers = #tpu.dot_dimension_numbers<[1], [0], [0], [1], [0, 0, 1, 1], [], []>} : vector<2x128xbf16>, vector<128x384xbf16>, vector<2x384xf32> -> vector<2x384xf32>
    %195 = vector.extract_strided_slice %192 {offsets = [0, 0], sizes = [2, 128], strides = [1, 1]} : vector<2x384xf32> to vector<2x128xf32>
    %196 = vector.extract_strided_slice %194 {offsets = [0, 0], sizes = [2, 128], strides = [1, 1]} : vector<2x384xf32> to vector<2x128xf32>
    %197 = arith.addf %195, %196 : vector<2x128xf32>
    %198 = arith.negf %197 : vector<2x128xf32>
    %199 = math.exp %198 : vector<2x128xf32>
    %cst_108 = arith.constant 1.000000e+00 : f32
    %200 = vector.broadcast %cst_108 : f32 to vector<2x128xf32>
    %201 = arith.addf %200, %199 : vector<2x128xf32>
    %202 = arith.divf %200, %201 : vector<2x128xf32>
    %203 = vector.extract_strided_slice %192 {offsets = [0, 128], sizes = [2, 128], strides = [1, 1]} : vector<2x384xf32> to vector<2x128xf32>
    %204 = vector.extract_strided_slice %194 {offsets = [0, 128], sizes = [2, 128], strides = [1, 1]} : vector<2x384xf32> to vector<2x128xf32>
    %205 = arith.addf %203, %204 : vector<2x128xf32>
    %206 = arith.negf %205 : vector<2x128xf32>
    %207 = math.exp %206 : vector<2x128xf32>
    %cst_109 = arith.constant 1.000000e+00 : f32
    %208 = vector.broadcast %cst_109 : f32 to vector<2x128xf32>
    %209 = arith.addf %208, %207 : vector<2x128xf32>
    %210 = arith.divf %208, %209 : vector<2x128xf32>
    %211 = vector.extract_strided_slice %192 {offsets = [0, 256], sizes = [2, 128], strides = [1, 1]} : vector<2x384xf32> to vector<2x128xf32>
    %212 = vector.extract_strided_slice %194 {offsets = [0, 256], sizes = [2, 128], strides = [1, 1]} : vector<2x384xf32> to vector<2x128xf32>
    %213 = vector.broadcast %84 : vector<1x128xf32> to vector<2x128xf32>
    %214 = arith.addf %212, %213 : vector<2x128xf32>
    %215 = arith.mulf %202, %214 : vector<2x128xf32>
    %216 = arith.addf %211, %215 : vector<2x128xf32>
    %217 = math.tanh %216 : vector<2x128xf32>
    %cst_110 = arith.constant 1.000000e+00 : f32
    %218 = vector.broadcast %cst_110 : f32 to vector<2x128xf32>
    %219 = arith.subf %218, %210 : vector<2x128xf32>
    %220 = arith.mulf %219, %217 : vector<2x128xf32>
    %221 = arith.mulf %210, %187 : vector<2x128xf32>
    %222 = arith.addf %220, %221 : vector<2x128xf32>
    %c0_111 = arith.constant 0 : index
    %c3 = arith.constant 3 : index
    %c0_112 = arith.constant 0 : index
    %223 = vector.load %arg25[%c0_111, %c3, %c0_112] : memref<2x8x128xf32, #tpu.memory_space<vmem>>, vector<2x1x128xf32>
    %224 = vector.shape_cast %223 : vector<2x1x128xf32> to vector<2x128xf32>
    %225 = vector.shape_cast %222 : vector<2x128xf32> to vector<2x1x128xf32>
    tpu.vector_store %arg25[%c0_111, %c3, %c0_112], %225 {strides = array<i32>} : memref<2x8x128xf32, #tpu.memory_space<vmem>>, vector<2x1x128xf32>,
    %226 = vector.extract_strided_slice %82 {offsets = [0, 4, 0], sizes = [2, 1, 384], strides = [1, 1, 1]} : vector<2x8x384xf32> to vector<2x1x384xf32>
    %227 = vector.shape_cast %226 : vector<2x1x384xf32> to vector<2x384xf32>
    %228 = arith.truncf %222 : vector<2x128xf32> to vector<2x128xbf16>
    %cst_113 = arith.constant dense<0.000000e+00> : vector<2x384xf32>
    %229 = tpu.matmul %228, %83, %cst_113 {dimension_numbers = #tpu.dot_dimension_numbers<[1], [0], [0], [1], [0, 0, 1, 1], [], []>} : vector<2x128xbf16>, vector<128x384xbf16>, vector<2x384xf32> -> vector<2x384xf32>
    %230 = vector.extract_strided_slice %227 {offsets = [0, 0], sizes = [2, 128], strides = [1, 1]} : vector<2x384xf32> to vector<2x128xf32>
    %231 = vector.extract_strided_slice %229 {offsets = [0, 0], sizes = [2, 128], strides = [1, 1]} : vector<2x384xf32> to vector<2x128xf32>
    %232 = arith.addf %230, %231 : vector<2x128xf32>
    %233 = arith.negf %232 : vector<2x128xf32>
    %234 = math.exp %233 : vector<2x128xf32>
    %cst_114 = arith.constant 1.000000e+00 : f32
    %235 = vector.broadcast %cst_114 : f32 to vector<2x128xf32>
    %236 = arith.addf %235, %234 : vector<2x128xf32>
    %237 = arith.divf %235, %236 : vector<2x128xf32>
    %238 = vector.extract_strided_slice %227 {offsets = [0, 128], sizes = [2, 128], strides = [1, 1]} : vector<2x384xf32> to vector<2x128xf32>
    %239 = vector.extract_strided_slice %229 {offsets = [0, 128], sizes = [2, 128], strides = [1, 1]} : vector<2x384xf32> to vector<2x128xf32>
    %240 = arith.addf %238, %239 : vector<2x128xf32>
    %241 = arith.negf %240 : vector<2x128xf32>
    %242 = math.exp %241 : vector<2x128xf32>
    %cst_115 = arith.constant 1.000000e+00 : f32
    %243 = vector.broadcast %cst_115 : f32 to vector<2x128xf32>
    %244 = arith.addf %243, %242 : vector<2x128xf32>
    %245 = arith.divf %243, %244 : vector<2x128xf32>
    %246 = vector.extract_strided_slice %227 {offsets = [0, 256], sizes = [2, 128], strides = [1, 1]} : vector<2x384xf32> to vector<2x128xf32>
    %247 = vector.extract_strided_slice %229 {offsets = [0, 256], sizes = [2, 128], strides = [1, 1]} : vector<2x384xf32> to vector<2x128xf32>
    %248 = vector.broadcast %84 : vector<1x128xf32> to vector<2x128xf32>
    %249 = arith.addf %247, %248 : vector<2x128xf32>
    %250 = arith.mulf %237, %249 : vector<2x128xf32>
    %251 = arith.addf %246, %250 : vector<2x128xf32>
    %252 = math.tanh %251 : vector<2x128xf32>
    %cst_116 = arith.constant 1.000000e+00 : f32
    %253 = vector.broadcast %cst_116 : f32 to vector<2x128xf32>
    %254 = arith.subf %253, %245 : vector<2x128xf32>
    %255 = arith.mulf %254, %252 : vector<2x128xf32>
    %256 = arith.mulf %245, %222 : vector<2x128xf32>
    %257 = arith.addf %255, %256 : vector<2x128xf32>
    %c0_117 = arith.constant 0 : index
    %c4 = arith.constant 4 : index
    %c0_118 = arith.constant 0 : index
    %258 = vector.load %arg25[%c0_117, %c4, %c0_118] : memref<2x8x128xf32, #tpu.memory_space<vmem>>, vector<2x1x128xf32>
    %259 = vector.shape_cast %258 : vector<2x1x128xf32> to vector<2x128xf32>
    %260 = vector.shape_cast %257 : vector<2x128xf32> to vector<2x1x128xf32>
    tpu.vector_store %arg25[%c0_117, %c4, %c0_118], %260 {strides = array<i32>} : memref<2x8x128xf32, #tpu.memory_space<vmem>>, vector<2x1x128xf32>,
    %261 = vector.extract_strided_slice %82 {offsets = [0, 5, 0], sizes = [2, 1, 384], strides = [1, 1, 1]} : vector<2x8x384xf32> to vector<2x1x384xf32>
    %262 = vector.shape_cast %261 : vector<2x1x384xf32> to vector<2x384xf32>
    %263 = arith.truncf %257 : vector<2x128xf32> to vector<2x128xbf16>
    %cst_119 = arith.constant dense<0.000000e+00> : vector<2x384xf32>
    %264 = tpu.matmul %263, %83, %cst_119 {dimension_numbers = #tpu.dot_dimension_numbers<[1], [0], [0], [1], [0, 0, 1, 1], [], []>} : vector<2x128xbf16>, vector<128x384xbf16>, vector<2x384xf32> -> vector<2x384xf32>
    %265 = vector.extract_strided_slice %262 {offsets = [0, 0], sizes = [2, 128], strides = [1, 1]} : vector<2x384xf32> to vector<2x128xf32>
    %266 = vector.extract_strided_slice %264 {offsets = [0, 0], sizes = [2, 128], strides = [1, 1]} : vector<2x384xf32> to vector<2x128xf32>
    %267 = arith.addf %265, %266 : vector<2x128xf32>
    %268 = arith.negf %267 : vector<2x128xf32>
    %269 = math.exp %268 : vector<2x128xf32>
    %cst_120 = arith.constant 1.000000e+00 : f32
    %270 = vector.broadcast %cst_120 : f32 to vector<2x128xf32>
    %271 = arith.addf %270, %269 : vector<2x128xf32>
    %272 = arith.divf %270, %271 : vector<2x128xf32>
    %273 = vector.extract_strided_slice %262 {offsets = [0, 128], sizes = [2, 128], strides = [1, 1]} : vector<2x384xf32> to vector<2x128xf32>
    %274 = vector.extract_strided_slice %264 {offsets = [0, 128], sizes = [2, 128], strides = [1, 1]} : vector<2x384xf32> to vector<2x128xf32>
    %275 = arith.addf %273, %274 : vector<2x128xf32>
    %276 = arith.negf %275 : vector<2x128xf32>
    %277 = math.exp %276 : vector<2x128xf32>
    %cst_121 = arith.constant 1.000000e+00 : f32
    %278 = vector.broadcast %cst_121 : f32 to vector<2x128xf32>
    %279 = arith.addf %278, %277 : vector<2x128xf32>
    %280 = arith.divf %278, %279 : vector<2x128xf32>
    %281 = vector.extract_strided_slice %262 {offsets = [0, 256], sizes = [2, 128], strides = [1, 1]} : vector<2x384xf32> to vector<2x128xf32>
    %282 = vector.extract_strided_slice %264 {offsets = [0, 256], sizes = [2, 128], strides = [1, 1]} : vector<2x384xf32> to vector<2x128xf32>
    %283 = vector.broadcast %84 : vector<1x128xf32> to vector<2x128xf32>
    %284 = arith.addf %282, %283 : vector<2x128xf32>
    %285 = arith.mulf %272, %284 : vector<2x128xf32>
    %286 = arith.addf %281, %285 : vector<2x128xf32>
    %287 = math.tanh %286 : vector<2x128xf32>
    %cst_122 = arith.constant 1.000000e+00 : f32
    %288 = vector.broadcast %cst_122 : f32 to vector<2x128xf32>
    %289 = arith.subf %288, %280 : vector<2x128xf32>
    %290 = arith.mulf %289, %287 : vector<2x128xf32>
    %291 = arith.mulf %280, %257 : vector<2x128xf32>
    %292 = arith.addf %290, %291 : vector<2x128xf32>
    %c0_123 = arith.constant 0 : index
    %c5 = arith.constant 5 : index
    %c0_124 = arith.constant 0 : index
    %293 = vector.load %arg25[%c0_123, %c5, %c0_124] : memref<2x8x128xf32, #tpu.memory_space<vmem>>, vector<2x1x128xf32>
    %294 = vector.shape_cast %293 : vector<2x1x128xf32> to vector<2x128xf32>
    %295 = vector.shape_cast %292 : vector<2x128xf32> to vector<2x1x128xf32>
    tpu.vector_store %arg25[%c0_123, %c5, %c0_124], %295 {strides = array<i32>} : memref<2x8x128xf32, #tpu.memory_space<vmem>>, vector<2x1x128xf32>,
    %296 = vector.extract_strided_slice %82 {offsets = [0, 6, 0], sizes = [2, 1, 384], strides = [1, 1, 1]} : vector<2x8x384xf32> to vector<2x1x384xf32>
    %297 = vector.shape_cast %296 : vector<2x1x384xf32> to vector<2x384xf32>
    %298 = arith.truncf %292 : vector<2x128xf32> to vector<2x128xbf16>
    %cst_125 = arith.constant dense<0.000000e+00> : vector<2x384xf32>
    %299 = tpu.matmul %298, %83, %cst_125 {dimension_numbers = #tpu.dot_dimension_numbers<[1], [0], [0], [1], [0, 0, 1, 1], [], []>} : vector<2x128xbf16>, vector<128x384xbf16>, vector<2x384xf32> -> vector<2x384xf32>
    %300 = vector.extract_strided_slice %297 {offsets = [0, 0], sizes = [2, 128], strides = [1, 1]} : vector<2x384xf32> to vector<2x128xf32>
    %301 = vector.extract_strided_slice %299 {offsets = [0, 0], sizes = [2, 128], strides = [1, 1]} : vector<2x384xf32> to vector<2x128xf32>
    %302 = arith.addf %300, %301 : vector<2x128xf32>
    %303 = arith.negf %302 : vector<2x128xf32>
    %304 = math.exp %303 : vector<2x128xf32>
    %cst_126 = arith.constant 1.000000e+00 : f32
    %305 = vector.broadcast %cst_126 : f32 to vector<2x128xf32>
    %306 = arith.addf %305, %304 : vector<2x128xf32>
    %307 = arith.divf %305, %306 : vector<2x128xf32>
    %308 = vector.extract_strided_slice %297 {offsets = [0, 128], sizes = [2, 128], strides = [1, 1]} : vector<2x384xf32> to vector<2x128xf32>
    %309 = vector.extract_strided_slice %299 {offsets = [0, 128], sizes = [2, 128], strides = [1, 1]} : vector<2x384xf32> to vector<2x128xf32>
    %310 = arith.addf %308, %309 : vector<2x128xf32>
    %311 = arith.negf %310 : vector<2x128xf32>
    %312 = math.exp %311 : vector<2x128xf32>
    %cst_127 = arith.constant 1.000000e+00 : f32
    %313 = vector.broadcast %cst_127 : f32 to vector<2x128xf32>
    %314 = arith.addf %313, %312 : vector<2x128xf32>
    %315 = arith.divf %313, %314 : vector<2x128xf32>
    %316 = vector.extract_strided_slice %297 {offsets = [0, 256], sizes = [2, 128], strides = [1, 1]} : vector<2x384xf32> to vector<2x128xf32>
    %317 = vector.extract_strided_slice %299 {offsets = [0, 256], sizes = [2, 128], strides = [1, 1]} : vector<2x384xf32> to vector<2x128xf32>
    %318 = vector.broadcast %84 : vector<1x128xf32> to vector<2x128xf32>
    %319 = arith.addf %317, %318 : vector<2x128xf32>
    %320 = arith.mulf %307, %319 : vector<2x128xf32>
    %321 = arith.addf %316, %320 : vector<2x128xf32>
    %322 = math.tanh %321 : vector<2x128xf32>
    %cst_128 = arith.constant 1.000000e+00 : f32
    %323 = vector.broadcast %cst_128 : f32 to vector<2x128xf32>
    %324 = arith.subf %323, %315 : vector<2x128xf32>
    %325 = arith.mulf %324, %322 : vector<2x128xf32>
    %326 = arith.mulf %315, %292 : vector<2x128xf32>
    %327 = arith.addf %325, %326 : vector<2x128xf32>
    %c0_129 = arith.constant 0 : index
    %c6 = arith.constant 6 : index
    %c0_130 = arith.constant 0 : index
    %328 = vector.load %arg25[%c0_129, %c6, %c0_130] : memref<2x8x128xf32, #tpu.memory_space<vmem>>, vector<2x1x128xf32>
    %329 = vector.shape_cast %328 : vector<2x1x128xf32> to vector<2x128xf32>
    %330 = vector.shape_cast %327 : vector<2x128xf32> to vector<2x1x128xf32>
    tpu.vector_store %arg25[%c0_129, %c6, %c0_130], %330 {strides = array<i32>} : memref<2x8x128xf32, #tpu.memory_space<vmem>>, vector<2x1x128xf32>,
    %331 = vector.extract_strided_slice %82 {offsets = [0, 7, 0], sizes = [2, 1, 384], strides = [1, 1, 1]} : vector<2x8x384xf32> to vector<2x1x384xf32>
    %332 = vector.shape_cast %331 : vector<2x1x384xf32> to vector<2x384xf32>
    %333 = arith.truncf %327 : vector<2x128xf32> to vector<2x128xbf16>
    %cst_131 = arith.constant dense<0.000000e+00> : vector<2x384xf32>
    %334 = tpu.matmul %333, %83, %cst_131 {dimension_numbers = #tpu.dot_dimension_numbers<[1], [0], [0], [1], [0, 0, 1, 1], [], []>} : vector<2x128xbf16>, vector<128x384xbf16>, vector<2x384xf32> -> vector<2x384xf32>
    %335 = vector.extract_strided_slice %332 {offsets = [0, 0], sizes = [2, 128], strides = [1, 1]} : vector<2x384xf32> to vector<2x128xf32>
    %336 = vector.extract_strided_slice %334 {offsets = [0, 0], sizes = [2, 128], strides = [1, 1]} : vector<2x384xf32> to vector<2x128xf32>
    %337 = arith.addf %335, %336 : vector<2x128xf32>
    %338 = arith.negf %337 : vector<2x128xf32>
    %339 = math.exp %338 : vector<2x128xf32>
    %cst_132 = arith.constant 1.000000e+00 : f32
    %340 = vector.broadcast %cst_132 : f32 to vector<2x128xf32>
    %341 = arith.addf %340, %339 : vector<2x128xf32>
    %342 = arith.divf %340, %341 : vector<2x128xf32>
    %343 = vector.extract_strided_slice %332 {offsets = [0, 128], sizes = [2, 128], strides = [1, 1]} : vector<2x384xf32> to vector<2x128xf32>
    %344 = vector.extract_strided_slice %334 {offsets = [0, 128], sizes = [2, 128], strides = [1, 1]} : vector<2x384xf32> to vector<2x128xf32>
    %345 = arith.addf %343, %344 : vector<2x128xf32>
    %346 = arith.negf %345 : vector<2x128xf32>
    %347 = math.exp %346 : vector<2x128xf32>
    %cst_133 = arith.constant 1.000000e+00 : f32
    %348 = vector.broadcast %cst_133 : f32 to vector<2x128xf32>
    %349 = arith.addf %348, %347 : vector<2x128xf32>
    %350 = arith.divf %348, %349 : vector<2x128xf32>
    %351 = vector.extract_strided_slice %332 {offsets = [0, 256], sizes = [2, 128], strides = [1, 1]} : vector<2x384xf32> to vector<2x128xf32>
    %352 = vector.extract_strided_slice %334 {offsets = [0, 256], sizes = [2, 128], strides = [1, 1]} : vector<2x384xf32> to vector<2x128xf32>
    %353 = vector.broadcast %84 : vector<1x128xf32> to vector<2x128xf32>
    %354 = arith.addf %352, %353 : vector<2x128xf32>
    %355 = arith.mulf %342, %354 : vector<2x128xf32>
    %356 = arith.addf %351, %355 : vector<2x128xf32>
    %357 = math.tanh %356 : vector<2x128xf32>
    %cst_134 = arith.constant 1.000000e+00 : f32
    %358 = vector.broadcast %cst_134 : f32 to vector<2x128xf32>
    %359 = arith.subf %358, %350 : vector<2x128xf32>
    %360 = arith.mulf %359, %357 : vector<2x128xf32>
    %361 = arith.mulf %350, %327 : vector<2x128xf32>
    %362 = arith.addf %360, %361 : vector<2x128xf32>
    %c0_135 = arith.constant 0 : index
    %c7 = arith.constant 7 : index
    %c0_136 = arith.constant 0 : index
    %363 = vector.load %arg25[%c0_135, %c7, %c0_136] : memref<2x8x128xf32, #tpu.memory_space<vmem>>, vector<2x1x128xf32>
    %364 = vector.shape_cast %363 : vector<2x1x128xf32> to vector<2x128xf32>
    %365 = vector.shape_cast %362 : vector<2x128xf32> to vector<2x1x128xf32>
    tpu.vector_store %arg25[%c0_135, %c7, %c0_136], %365 {strides = array<i32>} : memref<2x8x128xf32, #tpu.memory_space<vmem>>, vector<2x1x128xf32>,
    %c0_137 = arith.constant 0 : index
    %c0_138 = arith.constant 0 : index
    %c0_139 = arith.constant 0 : index
    %366 = vector.load %arg25[%c0_137, %c0_138, %c0_139] : memref<2x8x128xf32, #tpu.memory_space<vmem>>, vector<2x8x128xf32>
    %367 = vector.shape_cast %366 : vector<2x8x128xf32> to vector<16x128xf32>
    %368 = arith.truncf %367 : vector<16x128xf32> to vector<16x128xbf16>
    %c0_140 = arith.constant 0 : index
    %c0_141 = arith.constant 0 : index
    %369 = vector.load %arg14[%c0_140, %c0_141] : memref<128x1536xbf16, #tpu.memory_space<vmem>>, vector<128x1536xbf16>
    %cst_142 = arith.constant dense<0.000000e+00> : vector<16x1536xf32>
    %370 = tpu.matmul %368, %369, %cst_142 {dimension_numbers = #tpu.dot_dimension_numbers<[1], [0], [0], [1], [0, 0, 1, 1], [], []>} : vector<16x128xbf16>, vector<128x1536xbf16>, vector<16x1536xf32> -> vector<16x1536xf32>
    %c0_143 = arith.constant 0 : index
    %c0_144 = arith.constant 0 : index
    %371 = vector.load %arg15[%c0_143, %c0_144] : memref<1x1536xf32, #tpu.memory_space<vmem>>, vector<1x1536xf32>
    %372 = vector.broadcast %371 : vector<1x1536xf32> to vector<16x1536xf32>
    %373 = arith.addf %370, %372 : vector<16x1536xf32>
    %cst_145 = arith.constant 0.000000e+00 : f32
    %374 = vector.broadcast %cst_145 : f32 to vector<16x96xf32>
    %375 = vector.extract_strided_slice %373 {offsets = [0, 0], sizes = [16, 128], strides = [1, 1]} : vector<16x1536xf32> to vector<16x128xf32>
    %376 = vector.shape_cast %375 : vector<16x128xf32> to vector<2x8x128xf32>
    %377 = arith.truncf %376 : vector<2x8x128xf32> to vector<2x8x128xbf16>
    %378 = vector.extract_strided_slice %373 {offsets = [0, 512], sizes = [16, 128], strides = [1, 1]} : vector<16x1536xf32> to vector<16x128xf32>
    %379 = vector.shape_cast %378 : vector<16x128xf32> to vector<2x8x128xf32>
    %380 = arith.truncf %379 : vector<2x8x128xf32> to vector<2x8x128xbf16>
    %381 = vector.extract_strided_slice %373 {offsets = [0, 1024], sizes = [16, 128], strides = [1, 1]} : vector<16x1536xf32> to vector<16x128xf32>
    %382 = vector.shape_cast %381 : vector<16x128xf32> to vector<2x8x128xf32>
    %383 = arith.truncf %382 : vector<2x8x128xf32> to vector<2x8x128xbf16>
    "tpu.trace_start"() <{level = 10 : i32, message = "bqd,bkd->bqk"}> : () -> ()
    %cst_146 = arith.constant dense<0.000000e+00> : vector<2x8x8xf32>
    %384 = tpu.matmul %377, %380, %cst_146 {dimension_numbers = #tpu.dot_dimension_numbers<[2], [2], [1], [1], [0, 0, 0, 1, 1, 1], [0], [0]>} : vector<2x8x128xbf16>, vector<2x8x128xbf16>, vector<2x8x8xf32> -> vector<2x8x8xf32>
    "tpu.trace_stop"() : () -> ()
    %cst_147 = arith.constant dense<0xFF800000> : vector<2x8xf32>
    %385 = vector.multi_reduction <maximumf>, %384, %cst_147 [2] : vector<2x8x8xf32> to vector<2x8xf32>
    %386 = vector.shape_cast %385 : vector<2x8xf32> to vector<2x8x1xf32>
    %387 = vector.broadcast %386 : vector<2x8x1xf32> to vector<2x8x8xf32>
    %388 = arith.subf %384, %387 : vector<2x8x8xf32>
    %389 = math.exp %388 : vector<2x8x8xf32>
    %cst_148 = arith.constant dense<0.000000e+00> : vector<2x8xf32>
    %390 = vector.multi_reduction <add>, %389, %cst_148 [2] : vector<2x8x8xf32> to vector<2x8xf32>
    %391 = vector.shape_cast %390 : vector<2x8xf32> to vector<2x8x1xf32>
    %392 = vector.broadcast %391 : vector<2x8x1xf32> to vector<2x8x8xf32>
    %393 = arith.divf %389, %392 : vector<2x8x8xf32>
    %394 = arith.truncf %393 : vector<2x8x8xf32> to vector<2x8x8xbf16>
    "tpu.trace_start"() <{level = 10 : i32, message = "bqk,bkd->bqd"}> : () -> ()
    %cst_149 = arith.constant dense<0.000000e+00> : vector<2x8x128xf32>
    %395 = tpu.matmul %394, %383, %cst_149 {dimension_numbers = #tpu.dot_dimension_numbers<[2], [1], [1], [2], [0, 0, 0, 1, 1, 2], [0], [0]>} : vector<2x8x8xbf16>, vector<2x8x128xbf16>, vector<2x8x128xf32> -> vector<2x8x128xf32>
    "tpu.trace_stop"() : () -> ()
    %396 = vector.shape_cast %395 : vector<2x8x128xf32> to vector<16x128xf32>
    %397 = arith.truncf %396 : vector<16x128xf32> to vector<16x128xbf16>
    %c0_150 = arith.constant 0 : index
    %c0_151 = arith.constant 0 : index
    %c0_152 = arith.constant 0 : index
    %398 = vector.load %arg16[%c0_150, %c0_151, %c0_152] : memref<4x128x96xbf16, #tpu.memory_space<vmem>>, vector<1x128x96xbf16>
    %399 = vector.shape_cast %398 : vector<1x128x96xbf16> to vector<128x96xbf16>
    %cst_153 = arith.constant dense<0.000000e+00> : vector<16x96xf32>
    %400 = tpu.matmul %397, %399, %cst_153 {dimension_numbers = #tpu.dot_dimension_numbers<[1], [0], [0], [1], [0, 0, 1, 1], [], []>} : vector<16x128xbf16>, vector<128x96xbf16>, vector<16x96xf32> -> vector<16x96xf32>
    %401 = arith.addf %374, %400 : vector<16x96xf32>
    %402 = vector.extract_strided_slice %373 {offsets = [0, 128], sizes = [16, 128], strides = [1, 1]} : vector<16x1536xf32> to vector<16x128xf32>
    %403 = vector.shape_cast %402 : vector<16x128xf32> to vector<2x8x128xf32>
    %404 = arith.truncf %403 : vector<2x8x128xf32> to vector<2x8x128xbf16>
    %405 = vector.extract_strided_slice %373 {offsets = [0, 640], sizes = [16, 128], strides = [1, 1]} : vector<16x1536xf32> to vector<16x128xf32>
    %406 = vector.shape_cast %405 : vector<16x128xf32> to vector<2x8x128xf32>
    %407 = arith.truncf %406 : vector<2x8x128xf32> to vector<2x8x128xbf16>
    %408 = vector.extract_strided_slice %373 {offsets = [0, 1152], sizes = [16, 128], strides = [1, 1]} : vector<16x1536xf32> to vector<16x128xf32>
    %409 = vector.shape_cast %408 : vector<16x128xf32> to vector<2x8x128xf32>
    %410 = arith.truncf %409 : vector<2x8x128xf32> to vector<2x8x128xbf16>
    "tpu.trace_start"() <{level = 10 : i32, message = "bqd,bkd->bqk"}> : () -> ()
    %cst_154 = arith.constant dense<0.000000e+00> : vector<2x8x8xf32>
    %411 = tpu.matmul %404, %407, %cst_154 {dimension_numbers = #tpu.dot_dimension_numbers<[2], [2], [1], [1], [0, 0, 0, 1, 1, 1], [0], [0]>} : vector<2x8x128xbf16>, vector<2x8x128xbf16>, vector<2x8x8xf32> -> vector<2x8x8xf32>
    "tpu.trace_stop"() : () -> ()
    %cst_155 = arith.constant dense<0xFF800000> : vector<2x8xf32>
    %412 = vector.multi_reduction <maximumf>, %411, %cst_155 [2] : vector<2x8x8xf32> to vector<2x8xf32>
    %413 = vector.shape_cast %412 : vector<2x8xf32> to vector<2x8x1xf32>
    %414 = vector.broadcast %413 : vector<2x8x1xf32> to vector<2x8x8xf32>
    %415 = arith.subf %411, %414 : vector<2x8x8xf32>
    %416 = math.exp %415 : vector<2x8x8xf32>
    %cst_156 = arith.constant dense<0.000000e+00> : vector<2x8xf32>
    %417 = vector.multi_reduction <add>, %416, %cst_156 [2] : vector<2x8x8xf32> to vector<2x8xf32>
    %418 = vector.shape_cast %417 : vector<2x8xf32> to vector<2x8x1xf32>
    %419 = vector.broadcast %418 : vector<2x8x1xf32> to vector<2x8x8xf32>
    %420 = arith.divf %416, %419 : vector<2x8x8xf32>
    %421 = arith.truncf %420 : vector<2x8x8xf32> to vector<2x8x8xbf16>
    "tpu.trace_start"() <{level = 10 : i32, message = "bqk,bkd->bqd"}> : () -> ()
    %cst_157 = arith.constant dense<0.000000e+00> : vector<2x8x128xf32>
    %422 = tpu.matmul %421, %410, %cst_157 {dimension_numbers = #tpu.dot_dimension_numbers<[2], [1], [1], [2], [0, 0, 0, 1, 1, 2], [0], [0]>} : vector<2x8x8xbf16>, vector<2x8x128xbf16>, vector<2x8x128xf32> -> vector<2x8x128xf32>
    "tpu.trace_stop"() : () -> ()
    %423 = vector.shape_cast %422 : vector<2x8x128xf32> to vector<16x128xf32>
    %424 = arith.truncf %423 : vector<16x128xf32> to vector<16x128xbf16>
    %c1_158 = arith.constant 1 : index
    %c0_159 = arith.constant 0 : index
    %c0_160 = arith.constant 0 : index
    %425 = vector.load %arg16[%c1_158, %c0_159, %c0_160] : memref<4x128x96xbf16, #tpu.memory_space<vmem>>, vector<1x128x96xbf16>
    %426 = vector.shape_cast %425 : vector<1x128x96xbf16> to vector<128x96xbf16>
    %cst_161 = arith.constant dense<0.000000e+00> : vector<16x96xf32>
    %427 = tpu.matmul %424, %426, %cst_161 {dimension_numbers = #tpu.dot_dimension_numbers<[1], [0], [0], [1], [0, 0, 1, 1], [], []>} : vector<16x128xbf16>, vector<128x96xbf16>, vector<16x96xf32> -> vector<16x96xf32>
    %428 = arith.addf %401, %427 : vector<16x96xf32>
    %429 = vector.extract_strided_slice %373 {offsets = [0, 256], sizes = [16, 128], strides = [1, 1]} : vector<16x1536xf32> to vector<16x128xf32>
    %430 = vector.shape_cast %429 : vector<16x128xf32> to vector<2x8x128xf32>
    %431 = arith.truncf %430 : vector<2x8x128xf32> to vector<2x8x128xbf16>
    %432 = vector.extract_strided_slice %373 {offsets = [0, 768], sizes = [16, 128], strides = [1, 1]} : vector<16x1536xf32> to vector<16x128xf32>
    %433 = vector.shape_cast %432 : vector<16x128xf32> to vector<2x8x128xf32>
    %434 = arith.truncf %433 : vector<2x8x128xf32> to vector<2x8x128xbf16>
    %435 = vector.extract_strided_slice %373 {offsets = [0, 1280], sizes = [16, 128], strides = [1, 1]} : vector<16x1536xf32> to vector<16x128xf32>
    %436 = vector.shape_cast %435 : vector<16x128xf32> to vector<2x8x128xf32>
    %437 = arith.truncf %436 : vector<2x8x128xf32> to vector<2x8x128xbf16>
    "tpu.trace_start"() <{level = 10 : i32, message = "bqd,bkd->bqk"}> : () -> ()
    %cst_162 = arith.constant dense<0.000000e+00> : vector<2x8x8xf32>
    %438 = tpu.matmul %431, %434, %cst_162 {dimension_numbers = #tpu.dot_dimension_numbers<[2], [2], [1], [1], [0, 0, 0, 1, 1, 1], [0], [0]>} : vector<2x8x128xbf16>, vector<2x8x128xbf16>, vector<2x8x8xf32> -> vector<2x8x8xf32>
    "tpu.trace_stop"() : () -> ()
    %cst_163 = arith.constant dense<0xFF800000> : vector<2x8xf32>
    %439 = vector.multi_reduction <maximumf>, %438, %cst_163 [2] : vector<2x8x8xf32> to vector<2x8xf32>
    %440 = vector.shape_cast %439 : vector<2x8xf32> to vector<2x8x1xf32>
    %441 = vector.broadcast %440 : vector<2x8x1xf32> to vector<2x8x8xf32>
    %442 = arith.subf %438, %441 : vector<2x8x8xf32>
    %443 = math.exp %442 : vector<2x8x8xf32>
    %cst_164 = arith.constant dense<0.000000e+00> : vector<2x8xf32>
    %444 = vector.multi_reduction <add>, %443, %cst_164 [2] : vector<2x8x8xf32> to vector<2x8xf32>
    %445 = vector.shape_cast %444 : vector<2x8xf32> to vector<2x8x1xf32>
    %446 = vector.broadcast %445 : vector<2x8x1xf32> to vector<2x8x8xf32>
    %447 = arith.divf %443, %446 : vector<2x8x8xf32>
    %448 = arith.truncf %447 : vector<2x8x8xf32> to vector<2x8x8xbf16>
    "tpu.trace_start"() <{level = 10 : i32, message = "bqk,bkd->bqd"}> : () -> ()
    %cst_165 = arith.constant dense<0.000000e+00> : vector<2x8x128xf32>
    %449 = tpu.matmul %448, %437, %cst_165 {dimension_numbers = #tpu.dot_dimension_numbers<[2], [1], [1], [2], [0, 0, 0, 1, 1, 2], [0], [0]>} : vector<2x8x8xbf16>, vector<2x8x128xbf16>, vector<2x8x128xf32> -> vector<2x8x128xf32>
    "tpu.trace_stop"() : () -> ()
    %450 = vector.shape_cast %449 : vector<2x8x128xf32> to vector<16x128xf32>
    %451 = arith.truncf %450 : vector<16x128xf32> to vector<16x128xbf16>
    %c2_166 = arith.constant 2 : index
    %c0_167 = arith.constant 0 : index
    %c0_168 = arith.constant 0 : index
    %452 = vector.load %arg16[%c2_166, %c0_167, %c0_168] : memref<4x128x96xbf16, #tpu.memory_space<vmem>>, vector<1x128x96xbf16>
    %453 = vector.shape_cast %452 : vector<1x128x96xbf16> to vector<128x96xbf16>
    %cst_169 = arith.constant dense<0.000000e+00> : vector<16x96xf32>
    %454 = tpu.matmul %451, %453, %cst_169 {dimension_numbers = #tpu.dot_dimension_numbers<[1], [0], [0], [1], [0, 0, 1, 1], [], []>} : vector<16x128xbf16>, vector<128x96xbf16>, vector<16x96xf32> -> vector<16x96xf32>
    %455 = arith.addf %428, %454 : vector<16x96xf32>
    %456 = vector.extract_strided_slice %373 {offsets = [0, 384], sizes = [16, 128], strides = [1, 1]} : vector<16x1536xf32> to vector<16x128xf32>
    %457 = vector.shape_cast %456 : vector<16x128xf32> to vector<2x8x128xf32>
    %458 = arith.truncf %457 : vector<2x8x128xf32> to vector<2x8x128xbf16>
    %459 = vector.extract_strided_slice %373 {offsets = [0, 896], sizes = [16, 128], strides = [1, 1]} : vector<16x1536xf32> to vector<16x128xf32>
    %460 = vector.shape_cast %459 : vector<16x128xf32> to vector<2x8x128xf32>
    %461 = arith.truncf %460 : vector<2x8x128xf32> to vector<2x8x128xbf16>
    %462 = vector.extract_strided_slice %373 {offsets = [0, 1408], sizes = [16, 128], strides = [1, 1]} : vector<16x1536xf32> to vector<16x128xf32>
    %463 = vector.shape_cast %462 : vector<16x128xf32> to vector<2x8x128xf32>
    %464 = arith.truncf %463 : vector<2x8x128xf32> to vector<2x8x128xbf16>
    "tpu.trace_start"() <{level = 10 : i32, message = "bqd,bkd->bqk"}> : () -> ()
    %cst_170 = arith.constant dense<0.000000e+00> : vector<2x8x8xf32>
    %465 = tpu.matmul %458, %461, %cst_170 {dimension_numbers = #tpu.dot_dimension_numbers<[2], [2], [1], [1], [0, 0, 0, 1, 1, 1], [0], [0]>} : vector<2x8x128xbf16>, vector<2x8x128xbf16>, vector<2x8x8xf32> -> vector<2x8x8xf32>
    "tpu.trace_stop"() : () -> ()
    %cst_171 = arith.constant dense<0xFF800000> : vector<2x8xf32>
    %466 = vector.multi_reduction <maximumf>, %465, %cst_171 [2] : vector<2x8x8xf32> to vector<2x8xf32>
    %467 = vector.shape_cast %466 : vector<2x8xf32> to vector<2x8x1xf32>
    %468 = vector.broadcast %467 : vector<2x8x1xf32> to vector<2x8x8xf32>
    %469 = arith.subf %465, %468 : vector<2x8x8xf32>
    %470 = math.exp %469 : vector<2x8x8xf32>
    %cst_172 = arith.constant dense<0.000000e+00> : vector<2x8xf32>
    %471 = vector.multi_reduction <add>, %470, %cst_172 [2] : vector<2x8x8xf32> to vector<2x8xf32>
    %472 = vector.shape_cast %471 : vector<2x8xf32> to vector<2x8x1xf32>
    %473 = vector.broadcast %472 : vector<2x8x1xf32> to vector<2x8x8xf32>
    %474 = arith.divf %470, %473 : vector<2x8x8xf32>
    %475 = arith.truncf %474 : vector<2x8x8xf32> to vector<2x8x8xbf16>
    "tpu.trace_start"() <{level = 10 : i32, message = "bqk,bkd->bqd"}> : () -> ()
    %cst_173 = arith.constant dense<0.000000e+00> : vector<2x8x128xf32>
    %476 = tpu.matmul %475, %464, %cst_173 {dimension_numbers = #tpu.dot_dimension_numbers<[2], [1], [1], [2], [0, 0, 0, 1, 1, 2], [0], [0]>} : vector<2x8x8xbf16>, vector<2x8x128xbf16>, vector<2x8x128xf32> -> vector<2x8x128xf32>
    "tpu.trace_stop"() : () -> ()
    %477 = vector.shape_cast %476 : vector<2x8x128xf32> to vector<16x128xf32>
    %478 = arith.truncf %477 : vector<16x128xf32> to vector<16x128xbf16>
    %c3_174 = arith.constant 3 : index
    %c0_175 = arith.constant 0 : index
    %c0_176 = arith.constant 0 : index
    %479 = vector.load %arg16[%c3_174, %c0_175, %c0_176] : memref<4x128x96xbf16, #tpu.memory_space<vmem>>, vector<1x128x96xbf16>
    %480 = vector.shape_cast %479 : vector<1x128x96xbf16> to vector<128x96xbf16>
    %cst_177 = arith.constant dense<0.000000e+00> : vector<16x96xf32>
    %481 = tpu.matmul %478, %480, %cst_177 {dimension_numbers = #tpu.dot_dimension_numbers<[1], [0], [0], [1], [0, 0, 1, 1], [], []>} : vector<16x128xbf16>, vector<128x96xbf16>, vector<16x96xf32> -> vector<16x96xf32>
    %482 = arith.addf %455, %481 : vector<16x96xf32>
    %c0_178 = arith.constant 0 : index
    %c0_179 = arith.constant 0 : index
    %483 = vector.load %arg17[%c0_178, %c0_179] : memref<1x96xf32, #tpu.memory_space<vmem>>, vector<1x96xf32>
    %484 = vector.broadcast %483 : vector<1x96xf32> to vector<16x96xf32>
    %485 = arith.addf %482, %484 : vector<16x96xf32>
    %486 = vector.shape_cast %485 : vector<16x96xf32> to vector<2x8x96xf32>
    %cst_180 = arith.constant dense<0.000000e+00> : vector<2x96xf32>
    %487 = vector.multi_reduction <add>, %486, %cst_180 [1] : vector<2x8x96xf32> to vector<2x96xf32>
    %cst_181 = arith.constant 8.000000e+00 : f32
    %488 = vector.broadcast %cst_181 : f32 to vector<2x96xf32>
    %489 = arith.divf %487, %488 : vector<2x96xf32>
    %490 = arith.truncf %489 : vector<2x96xf32> to vector<2x96xbf16>
    %c0_182 = arith.constant 0 : index
    %c0_183 = arith.constant 0 : index
    %491 = vector.load %arg18[%c0_182, %c0_183] : memref<96x16xbf16, #tpu.memory_space<vmem>>, vector<96x16xbf16>
    %cst_184 = arith.constant dense<0.000000e+00> : vector<2x16xf32>
    %492 = tpu.matmul %490, %491, %cst_184 {dimension_numbers = #tpu.dot_dimension_numbers<[1], [0], [0], [1], [0, 0, 1, 1], [], []>} : vector<2x96xbf16>, vector<96x16xbf16>, vector<2x16xf32> -> vector<2x16xf32>
    %c0_185 = arith.constant 0 : index
    %c0_186 = arith.constant 0 : index
    %493 = vector.load %arg19[%c0_185, %c0_186] : memref<1x16xf32, #tpu.memory_space<vmem>>, vector<1x16xf32>
    %494 = vector.broadcast %493 : vector<1x16xf32> to vector<2x16xf32>
    %495 = arith.addf %492, %494 : vector<2x16xf32>
    %cst_187 = arith.constant 0.000000e+00 : f32
    %496 = vector.broadcast %cst_187 : f32 to vector<2x16xf32>
    %497 = arith.maximumf %495, %496 : vector<2x16xf32>
    %498 = arith.truncf %497 : vector<2x16xf32> to vector<2x16xbf16>
    %c0_188 = arith.constant 0 : index
    %c0_189 = arith.constant 0 : index
    %499 = vector.load %arg20[%c0_188, %c0_189] : memref<16x1xbf16, #tpu.memory_space<vmem>>, vector<16x1xbf16>
    %cst_190 = arith.constant dense<0.000000e+00> : vector<2x1xf32>
    %500 = tpu.matmul %498, %499, %cst_190 {dimension_numbers = #tpu.dot_dimension_numbers<[1], [0], [0], [1], [0, 0, 1, 1], [], []>} : vector<2x16xbf16>, vector<16x1xbf16>, vector<2x1xf32> -> vector<2x1xf32>
    %c0_191 = arith.constant 0 : index
    %c0_192 = arith.constant 0 : index
    %501 = vector.load %arg21[%c0_191, %c0_192] : memref<1x1xf32, #tpu.memory_space<vmem>>, vector<1x1xf32>
    %502 = vector.broadcast %501 : vector<1x1xf32> to vector<2x1xf32>
    %503 = arith.addf %500, %502 : vector<2x1xf32>
    %504 = vector.shape_cast %503 : vector<2x1xf32> to vector<1x2x1xf32>
    %c0_193 = arith.constant 0 : index
    %c0_194 = arith.constant 0 : index
    %c0_195 = arith.constant 0 : index
    %505 = vector.load %arg22[%c0_193, %c0_194, %c0_195] : memref<1x2x1xf32, #tpu.memory_space<vmem>>, vector<1x2x1xf32>
    tpu.vector_store %arg22[%c0_193, %c0_194, %c0_195], %504 {strides = array<i32>} : memref<1x2x1xf32, #tpu.memory_space<vmem>>, vector<1x2x1xf32>,
    return
  }
  func.func @transform_0(%arg0: i32) -> (i32, i32, i32) {
    %c0_i32 = arith.constant 0 : i32
    %c0_i32_0 = arith.constant 0 : i32
    %c0_i32_1 = arith.constant 0 : i32
    return %arg0, %c0_i32, %c0_i32_0 : i32, i32, i32
  }
  func.func @transform_1(%arg0: i32) -> (i32, i32, i32) {
    %c0_i32 = arith.constant 0 : i32
    %c0_i32_0 = arith.constant 0 : i32
    %c0_i32_1 = arith.constant 0 : i32
    %c0_i32_2 = arith.constant 0 : i32
    return %c0_i32, %c0_i32_0, %c0_i32_1 : i32, i32, i32
  }
  func.func @transform_2(%arg0: i32) -> (i32, i32) {
    %c0_i32 = arith.constant 0 : i32
    %c0_i32_0 = arith.constant 0 : i32
    %c0_i32_1 = arith.constant 0 : i32
    return %c0_i32, %c0_i32_0 : i32, i32
  }
  func.func @transform_3(%arg0: i32) -> (i32, i32) {
    %c0_i32 = arith.constant 0 : i32
    %c0_i32_0 = arith.constant 0 : i32
    %c0_i32_1 = arith.constant 0 : i32
    return %c0_i32, %c0_i32_0 : i32, i32
  }
  func.func @transform_4(%arg0: i32) -> (i32, i32) {
    %c0_i32 = arith.constant 0 : i32
    %c0_i32_0 = arith.constant 0 : i32
    %c0_i32_1 = arith.constant 0 : i32
    return %c0_i32, %c0_i32_0 : i32, i32
  }
  func.func @transform_5(%arg0: i32) -> (i32, i32, i32) {
    %c0_i32 = arith.constant 0 : i32
    %c0_i32_0 = arith.constant 0 : i32
    %c0_i32_1 = arith.constant 0 : i32
    %c0_i32_2 = arith.constant 0 : i32
    return %c0_i32, %c0_i32_0, %c0_i32_1 : i32, i32, i32
  }
  func.func @transform_6(%arg0: i32) -> (i32, i32) {
    %c0_i32 = arith.constant 0 : i32
    %c0_i32_0 = arith.constant 0 : i32
    %c0_i32_1 = arith.constant 0 : i32
    return %c0_i32, %c0_i32_0 : i32, i32
  }
  func.func @transform_7(%arg0: i32) -> (i32, i32) {
    %c0_i32 = arith.constant 0 : i32
    %c0_i32_0 = arith.constant 0 : i32
    %c0_i32_1 = arith.constant 0 : i32
    return %c0_i32, %c0_i32_0 : i32, i32
  }
  func.func @transform_8(%arg0: i32) -> (i32, i32) {
    %c0_i32 = arith.constant 0 : i32
    %c0_i32_0 = arith.constant 0 : i32
    %c0_i32_1 = arith.constant 0 : i32
    return %c0_i32, %c0_i32_0 : i32, i32
  }
  func.func @transform_9(%arg0: i32) -> (i32, i32) {
    %c0_i32 = arith.constant 0 : i32
    %c0_i32_0 = arith.constant 0 : i32
    %c0_i32_1 = arith.constant 0 : i32
    return %c0_i32, %c0_i32_0 : i32, i32
  }
  func.func @transform_10(%arg0: i32) -> (i32, i32) {
    %c0_i32 = arith.constant 0 : i32
    %c0_i32_0 = arith.constant 0 : i32
    %c0_i32_1 = arith.constant 0 : i32
    return %c0_i32, %c0_i32_0 : i32, i32
  }
  func.func @transform_11(%arg0: i32) -> (i32, i32) {
    %c0_i32 = arith.constant 0 : i32
    %c0_i32_0 = arith.constant 0 : i32
    %c0_i32_1 = arith.constant 0 : i32
    return %c0_i32, %c0_i32_0 : i32, i32
  }
  func.func @transform_12(%arg0: i32) -> (i32, i32) {
    %c0_i32 = arith.constant 0 : i32
    %c0_i32_0 = arith.constant 0 : i32
    %c0_i32_1 = arith.constant 0 : i32
    return %c0_i32, %c0_i32_0 : i32, i32
  }
  func.func @transform_13(%arg0: i32) -> (i32, i32) {
    %c0_i32 = arith.constant 0 : i32
    %c0_i32_0 = arith.constant 0 : i32
    %c0_i32_1 = arith.constant 0 : i32
    return %c0_i32, %c0_i32_0 : i32, i32
  }
  func.func @transform_14(%arg0: i32) -> (i32, i32) {
    %c0_i32 = arith.constant 0 : i32
    %c0_i32_0 = arith.constant 0 : i32
    %c0_i32_1 = arith.constant 0 : i32
    return %c0_i32, %c0_i32_0 : i32, i32
  }
  func.func @transform_15(%arg0: i32) -> (i32, i32, i32) {
    %c0_i32 = arith.constant 0 : i32
    %c0_i32_0 = arith.constant 0 : i32
    %c0_i32_1 = arith.constant 0 : i32
    %c0_i32_2 = arith.constant 0 : i32
    return %c0_i32, %c0_i32_0, %c0_i32_1 : i32, i32, i32
  }
  func.func @transform_16(%arg0: i32) -> (i32, i32) {
    %c0_i32 = arith.constant 0 : i32
    %c0_i32_0 = arith.constant 0 : i32
    %c0_i32_1 = arith.constant 0 : i32
    return %c0_i32, %c0_i32_0 : i32, i32
  }
  func.func @transform_17(%arg0: i32) -> (i32, i32) {
    %c0_i32 = arith.constant 0 : i32
    %c0_i32_0 = arith.constant 0 : i32
    %c0_i32_1 = arith.constant 0 : i32
    return %c0_i32, %c0_i32_0 : i32, i32
  }
  func.func @transform_18(%arg0: i32) -> (i32, i32) {
    %c0_i32 = arith.constant 0 : i32
    %c0_i32_0 = arith.constant 0 : i32
    %c0_i32_1 = arith.constant 0 : i32
    return %c0_i32, %c0_i32_0 : i32, i32
  }
  func.func @transform_19(%arg0: i32) -> (i32, i32) {
    %c0_i32 = arith.constant 0 : i32
    %c0_i32_0 = arith.constant 0 : i32
    %c0_i32_1 = arith.constant 0 : i32
    return %c0_i32, %c0_i32_0 : i32, i32
  }
  func.func @transform_20(%arg0: i32) -> (i32, i32) {
    %c0_i32 = arith.constant 0 : i32
    %c0_i32_0 = arith.constant 0 : i32
    %c0_i32_1 = arith.constant 0 : i32
    return %c0_i32, %c0_i32_0 : i32, i32
  }
  func.func @transform_21(%arg0: i32) -> (i32, i32, i32) {
    %c0_i32 = arith.constant 0 : i32
    %c0_i32_0 = arith.constant 0 : i32
    %c0_i32_1 = arith.constant 0 : i32
    return %arg0, %c0_i32, %c0_i32_0 : i32, i32, i32
  }
}

</mosaic_0001>

<bundles_post_ra>
// kernel: tpu_custom_call.1
= control target key start
LH: loop header
LB: loop body
LE: loop exit
PB: predicated region body
PF: predicated region fallthrough
CT: control target
= control target key end

     0   :  { %s6984_s0 = inlined_call_operand.vmem [shape: f32[2,8,4], index: 0, kind: input, shape index: {}]   ;;  %s6985_s1 = inlined_call_operand.vmem [shape: bf16[3,4,8], index: 1, kind: input, shape index: {}]   ;;  %s6986_s2 = inlined_call_operand.vmem [shape: f32[1,8], index: 2, kind: input, shape index: {}]   ;;  %s6987_s3 = inlined_call_operand.vmem [shape: f32[1,8], index: 3, kind: input, shape index: {}]   ;;  %s6988_s4 = inlined_call_operand.vmem [shape: f32[1,8], index: 4, kind: input, shape index: {}]   ;;  %s6989_s5 = inlined_call_operand.vmem [shape: bf16[3,8,16], index: 5, kind: input, shape index: {}]   ;;  %s6990_s6 = inlined_call_operand.vmem [shape: f32[1,16], index: 6, kind: input, shape index: {}]   ;;  %s6991_s7 = inlined_call_operand.vmem [shape: f32[1,16], index: 7, kind: input, shape index: {}]   ;;  %s6992_s8 = inlined_call_operand.vmem [shape: f32[1,16], index: 8, kind: input, shape index: {}]   ;;  %s6993_s9 = inlined_call_operand.vmem [shape: bf16[16,384], index: 9, kind: input, shape index: {}]   ;;  %s6994_s10 = inlined_call_operand.vmem [shape: bf16[128,384], index: 10, kind: input, shape index: {}]   ;;  %s6995_s11 = inlined_call_operand.vmem [shape: f32[1,384], index: 11, kind: input, shape index: {}]   ;;  %s6996_s12 = inlined_call_operand.vmem [shape: f32[1,128], index: 12, kind: input, shape index: {}]   ;;  %s6997_s13 = inlined_call_operand.hbm [shape: bf16[128,1536], index: 13, kind: input, shape index: {}]   ;;  %s6998_s14 = inlined_call_operand.vmem [shape: f32[1,1536], index: 14, kind: input, shape index: {}]   ;;  %s6999_s15 = inlined_call_operand.vmem [shape: bf16[4,128,96], index: 15, kind: input, shape index: {}]   ;;  %s7000_s16 = inlined_call_operand.vmem [shape: f32[1,96], index: 16, kind: input, shape index: {}]   ;;  %s7001_s17 = inlined_call_operand.vmem [shape: bf16[96,16], index: 17, kind: input, shape index: {}]   ;;  %s7002_s18 = inlined_call_operand.vmem [shape: f32[1,16], index: 18, kind: input, shape index: {}]   ;;  %s7003_s19 = inlined_call_operand.vmem [shape: bf16[16,1], index: 19, kind: input, shape index: {}]   ;;  %s7004_s20 = inlined_call_operand.<no memory space> [shape: f32[1,1], index: 20, kind: input, shape index: {}]   ;;  %s7005_s21 = inlined_call_operand.vmem [shape: f32[1,2,1], index: 21, kind: output, shape index: {}]  }
   0x1   :  { %7009 = sst [smem:[#allocation9_spill]] %s6984_s0  ;;  %v26_v0 = vstv %s7004_s20 }
   0x2   :  { %7010 = sst [smem:[#allocation10_spill]] %s6985_s1  ;;  %27 = vst [vmem:[#allocation5] sm:$0x1] %v26_v0 }
   0x3   :  { %7011 = sst [smem:[#allocation11_spill]] %s6986_s2 }
   0x4   :  { %7012 = sst [smem:[#allocation12_spill]] %s6987_s3 }
   0x5   :  { %7013 = sst [smem:[#allocation13_spill]] %s6988_s4 }
   0x6   :  { %7014 = sst [smem:[#allocation14_spill]] %s6989_s5 }
   0x7   :  { %28 = vsyncpa [#allocation7], 0  ;;  %s5651_s26 = smov [#allocation6]  }
   0x8   :  { %s60_s27 = sshll.u32 %s5651_s26, 4  ;;  %s61_s27 = int_to_ptr.vmem [resolvable:$true] %s60_s27 }
   0x9   :  { %s5637_s3 = scalar_lea.vmem %s61_s27, 12288  ;;  %p5642_p1 = scmp.lt.s32.totalorder %s61_s27, %s61_s27 }
   0xa   :  { %p5638_p0 = scmp.ne.s32.totalorder %s61_s27, %s5637_s3  ;;  %p5643_p2 = scmp.lt.s32.totalorder %s5637_s3, %s5637_s3 }
   0xc   :  { %p5644_p3 = por %p5643_p2, %p5642_p1 }
   0xe   :  { %p5645_p4 = pnand %p5644_p3, %p5638_p0 }
  0x10   :  { %5648 = shalt.err (!%p5645_p4)
}
  0x11   :  { %s5652_s28 = smov 768   ;;  %s5653_s29 = smov 48  }
  0x12   :  { %66 = dma.hbm_to_vmem [thread:$0]  %s6997_s13, 12288, %s61_s27, [#allocation7], %s5652_s28, %s5652_s28, %s5653_s29  }
  0x13   :  { %5649 = dma.done.wait [#allocation7], 12288  }
  0x14   :  { %5650 = vsyncadd [#allocation7], 4294955008  ;;  %v5654_v1 = vmov 0.0   ;;  %vm87_vm0 = vcmask 24576   ;;  %vm5655_vm1 = vmmov 0   ;;  %vm107_vm2 = vcmask 1041408  }
  0x15   :  { %4787 = vmatprep.subr.bf16.mxu0 %v5654_v1  ;;  %4793 = vmatprep.subr.bf16.mxu1 %v5654_v1  ;;  %88 = vst.msk [vmem:[#allocation2] sm:$0x1] %vm87_vm0, %v5654_v1  ;;  %89 = vst.msk [vmem:[#allocation2 + $0x10] sm:$0x1] %vm87_vm0, %v5654_v1  ;;  %vm92_vm3 = vcmask 31744   ;;  %s7015_s30 = sld [smem:[#allocation10_spill]] }
  0x16   :  { %4789 = vmatprep.mubr.msk.bf16.mxu0 %vm5655_vm1, %v5654_v1  ;;  %4795 = vmatprep.mubr.msk.bf16.mxu1 %vm5655_vm1, %v5654_v1  ;;  %90 = vst.msk [vmem:[#allocation2 + $0x9] sm:$0x1] %vm87_vm0, %v5654_v1  ;;  %91 = vst.msk [vmem:[#allocation2 + $0x19] sm:$0x1] %vm87_vm0, %v5654_v1  ;;  %s7016_s24 = sld [smem:[#allocation9_spill]]  ;;  %vm282_vm4 = vcmask 57344  }
  0x17   :  { %283 = vst.msk [vmem:[#allocation3] sm:$0x1] %vm282_vm4, %v5654_v1  ;;  %284 = vst.msk [vmem:[#allocation3 + $0x10] sm:$0x1] %vm282_vm4, %v5654_v1  ;;  %s7017_s29 = sld [smem:[#allocation14_spill]]  ;;  %vm302_vm5 = vcmask 1043456  }
  0x18   :  { %285 = vst.msk [vmem:[#allocation3 + $0x9] sm:$0x1] %vm282_vm4, %v5654_v1  ;;  %286 = vst.msk [vmem:[#allocation3 + $0x19] sm:$0x1] %vm282_vm4, %v5654_v1  ;;  %s7019_s23 = sld [smem:[#allocation12_spill]]  ;;  %vm287_vm6 = vcmask 64512  }
  0x19   :  { %s7020_s2 = sld [smem:[#allocation13_spill]]  ;;  %v5195_v61 = vld [vmem:[%s6993_s9 + $0x4] ss:$12 sps:$4 sm:$0xff]   ;;  %v5193_v62 = vld [vmem:[%s6993_s9] ss:$12 sps:$4 sm:$0xff]   ;;  %vm515_vm7 = vcmask 130048  }
  0x1a   :  { %v5196_v63 = vld [vmem:[%s6993_s9 + $0x8] ss:$12 sps:$4 sm:$0xff]   ;;  %v5863_v0 = vld [vmem:[%s6994_s10 + $0xac] ss:$12 sps:$4 sm:$0xff]   ;;  %vm915_vm8 = vcmask 1041409   ;;  %vm4159_vm9 = vcmask 785408  }
  0x1b   :  { %v4350_v2 = vld [vmem:[%s7015_s30 + $0x2] sm:$0x3]  ;;  %v98_v3 = vld [vmem:[%s7015_s30] sm:$0x3]  ;;  %v4353_v8 = vld [vmem:[%s7015_s30 + $0x4] sm:$0x3] }
  0x1c   :  { %v85_v4 = vld [vmem:[%s7016_s24] sm:$0xff]  ;;  %v109_v5 = vsel %vm107_vm2, %v4350_v2, 0  ;;  %v156_v6 = vsel %vm107_vm2, %v98_v3, 0  ;;  %v86_v7 = vld [vmem:[%s7016_s24 + $0x8] sm:$0xff]  ;;  %v208_v15 = vsel %vm107_vm2, %v4353_v8, 0  ;;  %s7018_s30 = sld [smem:[#allocation11_spill]] }
  0x1d   :  { %93 = vst.msk [vmem:[#allocation2 + $0x1] sm:$0xff] %vm92_vm3, %v85_v4  ;;  %4788 = vmatpush3.bf16.msra.mxu0 %v109_v5  ;;  %4794 = vmatpush3.bf16.msra.mxu1 %v156_v6  ;;  %94 = vst.msk [vmem:[#allocation2 + $0x11] sm:$0xff] %vm92_vm3, %v86_v7  ;;  %v4358_v19 = vld [vmem:[%s7017_s29 + $0x4] sm:$0xf]  ;;  %v293_v20 = vld [vmem:[%s7017_s29] sm:$0xf] }
  0x1e   :  { %4799 = vmatprep.subr.bf16.mxu0 %v5654_v1  ;;  %4805 = vmatprep.subr.bf16.mxu1 %v5654_v1  ;;  %v304_v21 = vsel %vm302_vm5, %v4358_v19, 0  ;;  %v351_v22 = vsel %vm302_vm5, %v293_v20, 0  ;;  %v4356_v38 = vld [vmem:[%s7019_s23] ss:$0 sm:$0xff]  ;;  %v4361_v50 = vld [vmem:[%s7017_s29 + $0x8] sm:$0xf] }
  0x1f   :  { %v4357_v42 = vld [vmem:[%s7020_s2] ss:$0 sm:$0xff]  ;;  %v403_v57 = vsel %vm302_vm5, %v4361_v50, 0  ;;  %v5656_v2 = vmov 0   ;;  %vm4343_vm10 = vcmask 1024  }
  0x20   :  { %v6002_v50 = vld [vmem:[%s6994_s10 + $0x20] ss:$12 sps:$4 sm:$0xff]  }
  0x22   :  { %v4355_v33 = vld [vmem:[%s7018_s30] ss:$0 sm:$0xff] }
  0x24   :  { %v99_v9 = vld [vmem:[#allocation2 + $0x1] sm:$0xff]  ;;  %v100_v11 = vld [vmem:[#allocation2 + $0x11] sm:$0xff] }
  0x25   :  { %v95_v10 = vld [vmem:[#allocation2] sm:$0xff]  ;;  %v96_v12 = vld [vmem:[#allocation2 + $0x10] sm:$0xff]  ;;  %v101_v13 = vpack.c.bf16 %v100_v11, %v99_v9 }
  0x26   :  { %v97_v14 = vpack.c.bf16 %v96_v12, %v95_v10  ;;  %v199_v16 = vld [vmem:[#allocation2 + $0x2] sm:$0xff]  ;;  %v200_v17 = vld [vmem:[#allocation2 + $0x12] sm:$0xff] }
  0x27   :  { %4790 = vmatmul.mubr.msk.bf16.vlgmr.msra.gmra.mxu0 %vm92_vm3, %v101_v13  ;;  %v201_v18 = vpack.c.bf16 %v200_v17, %v199_v16  ;;  %v4363_v13 = vld [vmem:[%s6990_s6] ss:$0 sm:$0xff] }
  0x28   :  { %4796 = vmatmul.mubr.msk.bf16.vlgmr.msra.gmra.mxu1 %vm92_vm3, %v97_v14  ;;  %4800 = vmatpush3.bf16.msra.mxu0 %v208_v15 }
  0x29   :  { %4801 = vmatprep.mubr.msk.bf16.mxu0 %vm5655_vm1, %v5654_v1  ;;  %4811 = vmatprep.subr.bf16.mxu0 %v5654_v1 }
  0x2a   :  { %4807 = vmatprep.mubr.msk.bf16.mxu1 %vm5655_vm1, %v5654_v1  ;;  %4806 = vmatpush3.bf16.msra.mxu1 %v304_v21  ;;  %v4364_v21 = vld [vmem:[%s6991_s7] ss:$0 sm:$0xff] }
  0x2b   :  { %4817 = vmatprep.subr.bf16.mxu1 %v5654_v1 }
  0x2f   :  { %4802 = vmatmul.mubr.msk.bf16.vlgmr.msra.gmra.mxu0 %vm92_vm3, %v201_v18 }
  0x30   :  { %4813 = vmatprep.mubr.msk.bf16.mxu0 %vm5655_vm1, %v5654_v1  ;;  %4812 = vmatpush3.bf16.msra.mxu0 %v351_v22 }
  0x31   :  { %533 = vmatprep.subr.bf16.mxu0 %v5195_v61 }
  0xe7   :  { %v145_v23 = vpop.f32.mrf.mxu0 }
  0xe8   :  { %v192_v24 = vpop.f32.mrf.mxu1 }
  0xe9   :  { %v4791_v25 = vpop.f32.mrf.mxu0  ;;  %v193_v31 = vadd.f32 %v192_v24, %v145_v23 }
  0xea   :  { %v4797_v26 = vpop.f32.mrf.mxu1 }
  0xeb   :  { %v148_v27 = vpop.f32.mrf.mxu0  ;;  %v4365_v26 = vld [vmem:[%s6992_s8] ss:$0 sm:$0xff] }
  0xec   :  { %v195_v28 = vpop.f32.mrf.mxu1 }
  0xed   :  { %v4792_v29 = vpop.f32.mrf.mxu0  ;;  %v196_v36 = vadd.f32 %v195_v28, %v148_v27 }
  0xee   :  { %v4798_v30 = vpop.f32.mrf.mxu1 }
  0xef   :  { %v244_v32 = vpop.f32.mrf.mxu0  ;;  %v5880_v30 = vld [vmem:[%s6994_s10 + $0xa8] ss:$12 sps:$4 sm:$0xff]  }
  0xf0   :  { %v251_v34 = vadd.f32 %v244_v32, %v193_v31  ;;  %v5885_v31 = vld [vmem:[%s6994_s10 + $0xb0] ss:$12 sps:$4 sm:$0xff]  }
  0xf1   :  { %v4803_v35 = vpop.f32.mrf.mxu0 }
  0xf2   :  { %v260_v37 = vadd.f32 %v4355_v33, %v251_v34  ;;  %v5898_v34 = vld [vmem:[%s6994_s10 + $0x90] ss:$12 sps:$4 sm:$0xff]   ;;  %v5904_v35 = vld [vmem:[%s6994_s10 + $0x98] ss:$12 sps:$4 sm:$0xff]  }
  0xf3   :  { %v247_v39 = vpop.f32.mrf.mxu0 }
  0xf4   :  { %v262_v40 = vmax.f32 %v260_v37, 0.0  ;;  %v252_v41 = vadd.f32 %v247_v39, %v196_v36  ;;  %v5910_v36 = vld [vmem:[%s6994_s10 + $0x7c] ss:$12 sps:$4 sm:$0xff]   ;;  %v5920_v37 = vld [vmem:[%s6994_s10 + $0x78] ss:$12 sps:$4 sm:$0xff]  }
  0xf5   :  { %v4804_v43 = vpop.f32.mrf.mxu0  ;;  %v5932_v39 = vld [vmem:[%s6994_s10 + $0x64] ss:$12 sps:$4 sm:$0xff]  }
  0xf6   :  { %v271_v44 = vmul.f32 %v4356_v38, %v262_v40  ;;  %v261_v45 = vadd.f32 %v4355_v33, %v252_v41  ;;  %v5890_v33 = vld [vmem:[%s6994_s10 + $0x94] ss:$12 sps:$4 sm:$0xff]  }
  0xf7   :  { %v5939_v40 = vld [vmem:[%s6994_s10 + $0x60] ss:$12 sps:$4 sm:$0xff]   ;;  %v5945_v41 = vld [vmem:[%s6994_s10 + $0x68] ss:$12 sps:$4 sm:$0xff]  }
  0xf8   :  { %v280_v46 = vadd.f32 %v4357_v42, %v271_v44  ;;  %v263_v47 = vmax.f32 %v261_v45, 0.0  ;;  %v5958_v43 = vld [vmem:[%s6994_s10 + $0x48] ss:$12 sps:$4 sm:$0xff]   ;;  %v5964_v44 = vld [vmem:[%s6994_s10 + $0x50] ss:$12 sps:$4 sm:$0xff]  }
  0xf9   :  { %v5970_v45 = vld [vmem:[%s6994_s10 + $0x34] ss:$12 sps:$4 sm:$0xff]  }
  0xfa   :  { %288 = vst.msk [vmem:[#allocation3 + $0x1] sm:$0xff] %vm287_vm6, %v280_v46  ;;  %v272_v48 = vmul.f32 %v4356_v38, %v263_v47  ;;  %v5926_v38 = vld [vmem:[%s6994_s10 + $0x80] ss:$12 sps:$4 sm:$0xff]   ;;  %v5977_v46 = vld [vmem:[%s6994_s10 + $0x30] ss:$12 sps:$4 sm:$0xff]  }
  0xfb   :  { %v5983_v47 = vld [vmem:[%s6994_s10 + $0x38] ss:$12 sps:$4 sm:$0xff]  }
  0xfc   :  { %v281_v49 = vadd.f32 %v4357_v42, %v272_v48  ;;  %v5951_v42 = vld [vmem:[%s6994_s10 + $0x4c] ss:$12 sps:$4 sm:$0xff]   ;;  %v5989_v48 = vld [vmem:[%s6994_s10 + $0x1c] ss:$12 sps:$4 sm:$0xff]  }
  0xfe   :  { %289 = vst.msk [vmem:[#allocation3 + $0x11] sm:$0xff] %vm287_vm6, %v281_v49  ;;  %v5996_v49 = vld [vmem:[%s6994_s10 + $0x18] ss:$12 sps:$4 sm:$0xff]  }
 0x101   :  { %v294_v51 = vld [vmem:[#allocation3 + $0x1] sm:$0xff] }
 0x102   :  { %v290_v53 = vld [vmem:[#allocation3] sm:$0xff] }
 0x103   :  { %v394_v59 = vld [vmem:[#allocation3 + $0x2] sm:$0xff] }
 0x105   :  { %v295_v52 = vld [vmem:[#allocation3 + $0x11] sm:$0xff] }
 0x106   :  { %v291_v54 = vld [vmem:[#allocation3 + $0x10] sm:$0xff]  ;;  %v296_v55 = vpack.c.bf16 %v295_v52, %v294_v51  ;;  %v6015_v52 = vld [vmem:[%s6994_s10] ss:$12 sps:$4 sm:$0xff]  }
 0x107   :  { %v292_v56 = vpack.c.bf16 %v291_v54, %v290_v53  ;;  %v395_v58 = vld [vmem:[#allocation3 + $0x12] sm:$0xff] }
 0x108   :  { %4808 = vmatmul.mubr.msk.bf16.vlgmr.msra.gmra.mxu1 %vm287_vm6, %v296_v55  ;;  %v396_v60 = vpack.c.bf16 %v395_v58, %v394_v59  ;;  %v6008_v51 = vld [vmem:[%s6994_s10 + $0x4] ss:$12 sps:$4 sm:$0xff]   ;;  %v6021_v53 = vld [vmem:[%s6994_s10 + $0x8] ss:$12 sps:$4 sm:$0xff]   ;;  %v484_v58 = vlaneseq }
 0x109   :  { %4814 = vmatmul.mubr.msk.bf16.vlgmr.msra.gmra.mxu0 %vm287_vm6, %v292_v56  ;;  %4818 = vmatpush3.bf16.msra.mxu1 %v403_v57 }
 0x10a   :  { %4819 = vmatprep.mubr.msk.bf16.mxu1 %vm5655_vm1, %v5654_v1  ;;  %4823 = vmatprep.subr.bf16.mxu1 %v5654_v1 }
 0x10b   :  { %534 = vmatpush1.bf16.msra.mxu0 %v5193_v62  ;;  %551 = vmatprep.mubr.bf16.mxu0 %v5656_v2 }
 0x10c   :  { %764 = vmatprep.subr.bf16.mxu0 %v5863_v0 }
 0x110   :  { %4820 = vmatmul.mubr.msk.bf16.vlgmr.msra.gmra.mxu1 %vm287_vm6, %v396_v60  ;;  %v6066_v60 = vshrl.u32 %v484_v58, 7 }
 0x111   :  { %4825 = vmatprep.mubr.msk.bf16.mxu1 %vm5655_vm1, %v5654_v1  ;;  %4824 = vmatpush3.bf16.msra.mxu1 %v5196_v63  ;;  %v482_v63 = vld [vmem:[%s6995_s11] sm:$0x7] }
 0x112   :  { %4829 = vmatprep.subr.bf16.mxu1 %v5654_v1  ;;  %v6069_v62 = vsub.s32 0, %v6066_v60 }
 0x1c8   :  { %v340_v3 = vpop.f32.mrf.mxu1 }
 0x1c9   :  { %v387_v4 = vpop.f32.mrf.mxu0 }
 0x1ca   :  { %v4809_v5 = vpop.f32.mrf.mxu1  ;;  %v388_v11 = vadd.f32 %v387_v4, %v340_v3  ;;  %v487_v4 = vrot.slane %v482_v63, %v6069_v62 }
 0x1cb   :  { %v4815_v6 = vpop.f32.mrf.mxu0  ;;  %v6076_v5 = vsub.s32 1, %v6066_v60 }
 0x1cc   :  { %v343_v7 = vpop.f32.mrf.mxu1 }
 0x1cd   :  { %v390_v8 = vpop.f32.mrf.mxu0 }
 0x1ce   :  { %v4810_v9 = vpop.f32.mrf.mxu1  ;;  %v391_v16 = vadd.f32 %v390_v8, %v343_v7 }
 0x1cf   :  { %v4816_v10 = vpop.f32.mrf.mxu0 }
 0x1d0   :  { %v439_v12 = vpop.f32.mrf.mxu1  ;;  %v491_v10 = vrot.slane %v482_v63, %v6076_v5 }
 0x1d1   :  { %v446_v14 = vadd.f32 %v439_v12, %v388_v11 }
 0x1d2   :  { %v4821_v15 = vpop.f32.mrf.mxu1 }
 0x1d3   :  { %v455_v17 = vadd.f32 %v4363_v13, %v446_v14 }
 0x1d4   :  { %v442_v18 = vpop.f32.mrf.mxu1 }
 0x1d5   :  { %v457_v19 = vmax.f32 %v455_v17, 0.0  ;;  %v447_v20 = vadd.f32 %v442_v18, %v391_v16 }
 0x1d6   :  { %v4822_v22 = vpop.f32.mrf.mxu1 }
 0x1d7   :  { %v456_v23 = vadd.f32 %v4363_v13, %v447_v20  ;;  %v466_v24 = vmul.f32 %v4364_v21, %v457_v19 }
 0x1d9   :  { %v458_v25 = vmax.f32 %v456_v23, 0.0  ;;  %v475_v28 = vadd.f32 %v4365_v26, %v466_v24 }
 0x1db   :  { %v467_v27 = vmul.f32 %v4364_v21, %v458_v25 }
 0x1dd   :  { %v476_v29 = vadd.f32 %v4365_v26, %v467_v27 }
 0x1df   :  { %v477_v32 = vpack.c.bf16 %v476_v29, %v475_v28 }
 0x1e1   :  { %4369 = vmatmul.mubr.msk.bf16.vlgmr.msra.gmra.mxu0 %vm515_vm7, %v477_v32  ;;  %4826 = vmatmul.mubr.msk.bf16.vlgmr.msra.gmra.mxu1 %vm515_vm7, %v477_v32 }
 0x1e2   :  { %765 = vmatpush1.bf16.msra.mxu0 %v5880_v30  ;;  %4830 = vmatpush3.bf16.msra.mxu1 %v5885_v31 }
 0x1e3   :  { %766 = vmatprep.subr.bf16.mxu0 %v5890_v33  ;;  %4831 = vmatprep.subr.bf16.mxu1 %v5654_v1 }
 0x1e4   :  { %796 = vmatprep.mubr.bf16.mxu0 %v5656_v2  ;;  %4845 = vmatprep.mubr.msk.bf16.mxu1 %vm5655_vm1, %v5654_v1 }
 0x1e6   :  { %767 = vmatpush1.bf16.msra.mxu0 %v5898_v34  ;;  %4832 = vmatpush3.bf16.msra.mxu1 %v5904_v35 }
 0x1e7   :  { %768 = vmatprep.subr.bf16.mxu0 %v5910_v36  ;;  %4833 = vmatprep.subr.bf16.mxu1 %v5654_v1 }
 0x1ea   :  { %769 = vmatpush1.bf16.msra.mxu0 %v5920_v37  ;;  %4834 = vmatpush3.bf16.msra.mxu1 %v5926_v38 }
 0x1eb   :  { %770 = vmatprep.subr.bf16.mxu0 %v5932_v39  ;;  %4835 = vmatprep.subr.bf16.mxu1 %v5654_v1 }
 0x1ee   :  { %771 = vmatpush1.bf16.msra.mxu0 %v5939_v40  ;;  %4836 = vmatpush3.bf16.msra.mxu1 %v5945_v41 }
 0x1ef   :  { %772 = vmatprep.subr.bf16.mxu0 %v5951_v42  ;;  %4837 = vmatprep.subr.bf16.mxu1 %v5654_v1 }
 0x1f2   :  { %773 = vmatpush1.bf16.msra.mxu0 %v5958_v43  ;;  %4838 = vmatpush3.bf16.msra.mxu1 %v5964_v44 }
 0x1f3   :  { %774 = vmatprep.subr.bf16.mxu0 %v5970_v45  ;;  %4839 = vmatprep.subr.bf16.mxu1 %v5654_v1 }
 0x1f6   :  { %775 = vmatpush1.bf16.msra.mxu0 %v5977_v46  ;;  %4840 = vmatpush3.bf16.msra.mxu1 %v5983_v47 }
 0x1f7   :  { %776 = vmatprep.subr.bf16.mxu0 %v5989_v48  ;;  %4841 = vmatprep.subr.bf16.mxu1 %v5654_v1 }
 0x1fa   :  { %777 = vmatpush1.bf16.msra.mxu0 %v5996_v49  ;;  %4842 = vmatpush3.bf16.msra.mxu1 %v6002_v50 }
 0x1fb   :  { %778 = vmatprep.subr.bf16.mxu0 %v6008_v51  ;;  %4843 = vmatprep.subr.bf16.mxu1 %v5654_v1 }
 0x1fe   :  { %779 = vmatpush1.bf16.msra.mxu0 %v6015_v52  ;;  %4844 = vmatpush3.bf16.msra.mxu1 %v6021_v53 }
 0x1ff   :  { %919 = vmatprep.subr.bf16.mxu0 %v5863_v0  ;;  %4849 = vmatprep.subr.bf16.mxu1 %v5654_v1 }
 0x201   :  { %797 = vmatmul.mubr.bf16.vlgmr.msra.gmra.mxu0 %v5656_v2  ;;  %4846 = vmatmul.mubr.bf16.vlgmr.msra.gmra.mxu1 %v5656_v2 }
 0x202   :  { %920 = vmatpush1.bf16.msra.mxu0 %v5880_v30  ;;  %4850 = vmatpush3.bf16.msra.mxu1 %v5885_v31 }
 0x203   :  { %921 = vmatprep.subr.bf16.mxu0 %v5890_v33  ;;  %4851 = vmatprep.subr.bf16.mxu1 %v5654_v1 }
 0x204   :  { %951 = vmatprep.mubr.bf16.mxu0 %v5656_v2  ;;  %4865 = vmatprep.mubr.msk.bf16.mxu1 %vm5655_vm1, %v5654_v1 }
 0x206   :  { %922 = vmatpush1.bf16.msra.mxu0 %v5898_v34  ;;  %4852 = vmatpush3.bf16.msra.mxu1 %v5904_v35 }
 0x207   :  { %923 = vmatprep.subr.bf16.mxu0 %v5910_v36  ;;  %4853 = vmatprep.subr.bf16.mxu1 %v5654_v1 }
 0x20a   :  { %924 = vmatpush1.bf16.msra.mxu0 %v5920_v37  ;;  %4854 = vmatpush3.bf16.msra.mxu1 %v5926_v38 }
 0x20b   :  { %925 = vmatprep.subr.bf16.mxu0 %v5932_v39  ;;  %4855 = vmatprep.subr.bf16.mxu1 %v5654_v1 }
 0x20e   :  { %926 = vmatpush1.bf16.msra.mxu0 %v5939_v40  ;;  %4856 = vmatpush3.bf16.msra.mxu1 %v5945_v41 }
 0x20f   :  { %927 = vmatprep.subr.bf16.mxu0 %v5951_v42  ;;  %4857 = vmatprep.subr.bf16.mxu1 %v5654_v1 }
 0x212   :  { %928 = vmatpush1.bf16.msra.mxu0 %v5958_v43  ;;  %4858 = vmatpush3.bf16.msra.mxu1 %v5964_v44 }
 0x213   :  { %929 = vmatprep.subr.bf16.mxu0 %v5970_v45  ;;  %4859 = vmatprep.subr.bf16.mxu1 %v5654_v1 }
 0x216   :  { %930 = vmatpush1.bf16.msra.mxu0 %v5977_v46  ;;  %4860 = vmatpush3.bf16.msra.mxu1 %v5983_v47 }
 0x217   :  { %931 = vmatprep.subr.bf16.mxu0 %v5989_v48  ;;  %4861 = vmatprep.subr.bf16.mxu1 %v5654_v1 }
 0x21a   :  { %932 = vmatpush1.bf16.msra.mxu0 %v5996_v49  ;;  %4862 = vmatpush3.bf16.msra.mxu1 %v6002_v50 }
 0x21b   :  { %933 = vmatprep.subr.bf16.mxu0 %v6008_v51  ;;  %4863 = vmatprep.subr.bf16.mxu1 %v5654_v1 }
 0x21e   :  { %934 = vmatpush1.bf16.msra.mxu0 %v6015_v52  ;;  %4864 = vmatpush3.bf16.msra.mxu1 %v6021_v53 }
 0x21f   :  { %1073 = vmatprep.subr.bf16.mxu0 %v5863_v0  ;;  %4869 = vmatprep.subr.bf16.mxu1 %v5654_v1 }
 0x2a1   :  { %v596_v54 = vpop.f32.mrf.mxu1  ;;  %v553_v59 = vpop.f32.mrf.mxu0 }
 0x2a2   :  { %v6078_v7 = vadd.f32 %v553_v59, %v487_v4  ;;  %v6094_v59 = vld [vmem:[%s6996_s12] ss:$0 sm:$0xff] }
 0x2a3   :  { %v4827_v55 = vpop.f32.mrf.mxu1  ;;  %v555_v61 = vpop.f32.mrf.mxu0 }
 0x2a4   :  { %v6085_v20 = vadd.f32 %v555_v61, %v491_v10  ;;  %v6097_v61 = vsub.s32 2, %v6066_v60 }
 0x2a5   :  { %v599_v56 = vpop.f32.mrf.mxu1  ;;  %v557_v3 = vpop.f32.mrf.mxu0 }
 0x2a6   :  { %v6081_v11 = vadd.f32 %v557_v3, %v487_v4 }
 0x2a7   :  { %v4828_v57 = vpop.f32.mrf.mxu1  ;;  %v559_v6 = vpop.f32.mrf.mxu0 }
 0x2a8   :  { %v6087_v25 = vadd.f32 %v559_v6, %v491_v10 }
 0x2c1   :  { %v798_v8 = vpop.f32.mrf.mxu0  ;;  %v839_v9 = vpop.f32.mrf.mxu1 }
 0x2c2   :  { %v846_v12 = vrot.slane %v798_v8, 1  ;;  %v849_v13 = vadd.f32 %v798_v8, %v6078_v7  ;;  %v887_v4 = vadd.f32 %v6094_v59, %v839_v9  ;;  %v495_v8 = vrot.slane %v482_v63, %v6097_v61 }
 0x2c3   :  { %v800_v14 = vpop.f32.mrf.mxu0  ;;  %v4847_v15 = vpop.f32.mrf.mxu1 }
 0x2c4   :  { %v850_v16 = vadd.f32 %v846_v12, %v6081_v11  ;;  %v4395_v17 = vmul.f32 -1.442695, %v849_v13  ;;  %v864_v22 = vrot.slane %v800_v14, 1  ;;  %v867_v26 = vadd.f32 %v800_v14, %v6085_v20 }
 0x2c5   :  { %v802_v18 = vpop.f32.mrf.mxu0  ;;  %v842_v19 = vpop.f32.mrf.mxu1  ;;  %v889_v13 = vrot.slane %v887_v4, 1  ;;  %v6101_v15 = vadd.f32 %v596_v54, %v495_v8 }
 0x2c6   :  { %5412 = vpow2.f32 %v4395_v17  ;;  %v4396_v21 = vmul.f32 -1.442695, %v850_v16  ;;  %v868_v27 = vadd.f32 %v864_v22, %v6087_v25  ;;  %v4397_v28 = vmul.f32 -1.442695, %v867_v26 }
 0x2c7   :  { %v803_v23 = vpop.f32.mrf.mxu0  ;;  %v4848_v24 = vpop.f32.mrf.mxu1  ;;  %v6103_v18 = vadd.f32 %v599_v56, %v495_v8 }
 0x2c8   :  { %5414 = vpow2.f32 %v4396_v21  ;;  %v4398_v29 = vmul.f32 -1.442695, %v868_v27 }
 0x2c9   :  { %5416 = vpow2.f32 %v4397_v28 }
 0x2ca   :  { %5418 = vpow2.f32 %v4398_v29 }
 0x2d3   :  { %v5413_v32 = vpop.eup %5412 }
 0x2d4   :  { %v857_v55 = vadd.f32 1.0, %v5413_v32 }
 0x2d5   :  { %v5415_v57 = vpop.eup %5414 }
 0x2d6   :  { %v858_v58 = vadd.f32 1.0, %v5415_v57  ;;  %5420 = vrcp.f32 %v857_v55  ;;  %v5417_v3 = vpop.eup %5416 }
 0x2d7   :  { %v5419_v6 = vpop.eup %5418  ;;  %v875_v10 = vadd.f32 1.0, %v5417_v3 }
 0x2d8   :  { %5422 = vrcp.f32 %v858_v58  ;;  %v876_v12 = vadd.f32 1.0, %v5419_v6 }
 0x2d9   :  { %5424 = vrcp.f32 %v875_v10 }
 0x2da   :  { %5426 = vrcp.f32 %v876_v12 }
 0x2e3   :  { %v5421_v14 = vpop.eup %5420 }
 0x2e4   :  { %v892_v16 = vmul.f32 %v5421_v14, %v887_v4 }
 0x2e5   :  { %v5423_v17 = vpop.eup %5422 }
 0x2e6   :  { %v893_v19 = vmul.f32 %v5423_v17, %v889_v13  ;;  %v894_v21 = vadd.f32 %v892_v16, %v6101_v15  ;;  %v5425_v63 = vpop.eup %5424 }
 0x2e7   :  { %v5427_v22 = vpop.eup %5426  ;;  %v898_v23 = vsub.f32 1.0, %v5425_v63  ;;  %v902_v27 = vmul.f32 0.0, %v5425_v63 }
 0x2e8   :  { %v895_v9 = vadd.f32 %v893_v19, %v6103_v18  ;;  %5428 = vtanh.f32 %v894_v21  ;;  %v899_v54 = vsub.f32 1.0, %v5427_v22  ;;  %v903_v32 = vmul.f32 0.0, %v5427_v22 }
 0x2ea   :  { %5430 = vtanh.f32 %v895_v9 }
 0x2f5   :  { %v5429_v24 = vpop.eup %5428 }
 0x2f6   :  { %v900_v26 = vmul.f32 %v5429_v24, %v898_v23 }
 0x2f7   :  { %v5431_v28 = vpop.eup %5430 }
 0x2f8   :  { %v901_v29 = vmul.f32 %v5431_v28, %v899_v54  ;;  %v6107_v56 = vadd.f32 %v902_v27, %v900_v26 }
 0x2fa   :  { %v6109_v55 = vadd.f32 %v903_v32, %v901_v29  ;;  %906 = vst [vmem:[#allocation4] sm:$0x1] %v6107_v56  ;;  %v908_v57 = vpack.c.bf16 %v6107_v56, %v6107_v56 }
 0x2fc   :  { %907 = vst [vmem:[#allocation4 + $0x8] sm:$0x1] %v6109_v55  ;;  %v909_v58 = vpack.c.bf16 %v6109_v55, %v6109_v55  ;;  %v912_v4 = vunpack.c.l.b16 %v908_v57 }
 0x2fe   :  { %v913_v3 = vunpack.c.l.b16 %v909_v58 }
 0x300   :  { %v914_v6 = vrot.slane %v913_v3, 7 }
 0x302   :  { %v916_v8 = vsel %vm915_vm8, %v914_v6, %v912_v4 }
 0x303   :  { %v917_v10 = vpack.c.b16 %v916_v8, %v916_v8 }
 0x305   :  { %952 = vmatmul.mubr.bf16.vlgmr.msra.gmra.mxu0 %v917_v10  ;;  %4866 = vmatmul.mubr.bf16.vlgmr.msra.gmra.mxu1 %v917_v10 }
 0x306   :  { %1074 = vmatpush1.bf16.msra.mxu0 %v5880_v30  ;;  %4870 = vmatpush3.bf16.msra.mxu1 %v5885_v31 }
 0x307   :  { %1075 = vmatprep.subr.bf16.mxu0 %v5890_v33  ;;  %4871 = vmatprep.subr.bf16.mxu1 %v5654_v1 }
 0x308   :  { %1105 = vmatprep.mubr.bf16.mxu0 %v5656_v2  ;;  %4885 = vmatprep.mubr.msk.bf16.mxu1 %vm5655_vm1, %v5654_v1 }
 0x30a   :  { %1076 = vmatpush1.bf16.msra.mxu0 %v5898_v34  ;;  %4872 = vmatpush3.bf16.msra.mxu1 %v5904_v35 }
 0x30b   :  { %1077 = vmatprep.subr.bf16.mxu0 %v5910_v36  ;;  %4873 = vmatprep.subr.bf16.mxu1 %v5654_v1 }
 0x30e   :  { %1078 = vmatpush1.bf16.msra.mxu0 %v5920_v37  ;;  %4874 = vmatpush3.bf16.msra.mxu1 %v5926_v38 }
 0x30f   :  { %1079 = vmatprep.subr.bf16.mxu0 %v5932_v39  ;;  %4875 = vmatprep.subr.bf16.mxu1 %v5654_v1 }
 0x312   :  { %1080 = vmatpush1.bf16.msra.mxu0 %v5939_v40  ;;  %4876 = vmatpush3.bf16.msra.mxu1 %v5945_v41 }
 0x313   :  { %1081 = vmatprep.subr.bf16.mxu0 %v5951_v42  ;;  %4877 = vmatprep.subr.bf16.mxu1 %v5654_v1 }
 0x316   :  { %1082 = vmatpush1.bf16.msra.mxu0 %v5958_v43  ;;  %4878 = vmatpush3.bf16.msra.mxu1 %v5964_v44 }
 0x317   :  { %1083 = vmatprep.subr.bf16.mxu0 %v5970_v45  ;;  %4879 = vmatprep.subr.bf16.mxu1 %v5654_v1 }
 0x31a   :  { %1084 = vmatpush1.bf16.msra.mxu0 %v5977_v46  ;;  %4880 = vmatpush3.bf16.msra.mxu1 %v5983_v47 }
 0x31b   :  { %1085 = vmatprep.subr.bf16.mxu0 %v5989_v48  ;;  %4881 = vmatprep.subr.bf16.mxu1 %v5654_v1 }
 0x31e   :  { %1086 = vmatpush1.bf16.msra.mxu0 %v5996_v49  ;;  %4882 = vmatpush3.bf16.msra.mxu1 %v6002_v50 }
 0x31f   :  { %1087 = vmatprep.subr.bf16.mxu0 %v6008_v51  ;;  %4883 = vmatprep.subr.bf16.mxu1 %v5654_v1 }
 0x322   :  { %1088 = vmatpush1.bf16.msra.mxu0 %v6015_v52  ;;  %4884 = vmatpush3.bf16.msra.mxu1 %v6021_v53 }
 0x323   :  { %1231 = vmatprep.subr.bf16.mxu0 %v5863_v0  ;;  %4889 = vmatprep.subr.bf16.mxu1 %v5654_v1 }
 0x3c5   :  { %v953_v12 = vpop.f32.mrf.mxu0  ;;  %v994_v13 = vpop.f32.mrf.mxu1 }
 0x3c6   :  { %v1001_v14 = vrot.slane %v953_v12, 7  ;;  %v1005_v16 = vadd.f32 %v953_v12, %v6081_v11  ;;  %v1036_v10 = vadd.f32 %v6094_v59, %v994_v13  ;;  %v1054_v13 = vrot.slane %v6109_v55, 7 }
 0x3c7   :  { %v955_v17 = vpop.f32.mrf.mxu0  ;;  %v4867_v19 = vpop.f32.mrf.mxu1 }
 0x3c8   :  { %v1004_v21 = vadd.f32 %v1001_v14, %v6078_v7  ;;  %v4401_v9 = vmul.f32 -1.442695, %v1005_v16  ;;  %v1019_v24 = vrot.slane %v955_v17, 7  ;;  %v1023_v27 = vadd.f32 %v955_v17, %v6087_v25 }
 0x3c9   :  { %v957_v63 = vpop.f32.mrf.mxu0  ;;  %v997_v22 = vpop.f32.mrf.mxu1  ;;  %v1038_v17 = vrot.slane %v1036_v10, 7 }
 0x3ca   :  { %v4400_v23 = vmul.f32 -1.442695, %v1004_v21  ;;  %5432 = vpow2.f32 %v4401_v9  ;;  %v1022_v28 = vadd.f32 %v1019_v24, %v6085_v20  ;;  %v4403_v29 = vmul.f32 -1.442695, %v1023_v27 }
 0x3cb   :  { %v958_v26 = vpop.f32.mrf.mxu0  ;;  %v4868_v54 = vpop.f32.mrf.mxu1 }
 0x3cc   :  { %5434 = vpow2.f32 %v4400_v23  ;;  %v4402_v32 = vmul.f32 -1.442695, %v1022_v28 }
 0x3cd   :  { %5436 = vpow2.f32 %v4403_v29  ;;  %v1053_v29 = vrot.slane %v6107_v56, 7 }
 0x3ce   :  { %5438 = vpow2.f32 %v4402_v32 }
 0x3d7   :  { %v5433_v57 = vpop.eup %5432 }
 0x3d8   :  { %v1013_v58 = vadd.f32 1.0, %v5433_v57 }
 0x3d9   :  { %v5435_v3 = vpop.eup %5434 }
 0x3da   :  { %v1012_v4 = vadd.f32 1.0, %v5435_v3  ;;  %5440 = vrcp.f32 %v1013_v58  ;;  %v5437_v6 = vpop.eup %5436 }
 0x3db   :  { %v5439_v8 = vpop.eup %5438  ;;  %v1031_v12 = vadd.f32 1.0, %v5437_v6 }
 0x3dc   :  { %5442 = vrcp.f32 %v1012_v4  ;;  %v1030_v14 = vadd.f32 1.0, %v5439_v8 }
 0x3dd   :  { %5444 = vrcp.f32 %v1031_v12 }
 0x3de   :  { %5446 = vrcp.f32 %v1030_v14 }
 0x3e7   :  { %v5441_v16 = vpop.eup %5440 }
 0x3e8   :  { %v1042_v19 = vmul.f32 %v5441_v16, %v1036_v10 }
 0x3e9   :  { %v5443_v21 = vpop.eup %5442 }
 0x3ea   :  { %v1041_v9 = vmul.f32 %v5443_v21, %v1038_v17  ;;  %v1044_v63 = vadd.f32 %v1042_v19, %v6103_v18  ;;  %v5445_v23 = vpop.eup %5444 }
 0x3eb   :  { %v5447_v24 = vpop.eup %5446  ;;  %v1048_v26 = vsub.f32 1.0, %v5445_v23  ;;  %v1058_v32 = vmul.f32 %v5445_v23, %v1054_v13 }
 0x3ec   :  { %v1043_v22 = vadd.f32 %v1041_v9, %v6101_v15  ;;  %5448 = vtanh.f32 %v1044_v63  ;;  %v1047_v27 = vsub.f32 1.0, %v5447_v24  ;;  %v1057_v3 = vmul.f32 %v5447_v24, %v1053_v29 }
 0x3ee   :  { %5450 = vtanh.f32 %v1043_v22 }
 0x3f9   :  { %v5449_v54 = vpop.eup %5448 }
 0x3fa   :  { %v1050_v28 = vmul.f32 %v5449_v54, %v1048_v26 }
 0x3fb   :  { %v5451_v57 = vpop.eup %5450 }
 0x3fc   :  { %v1049_v58 = vmul.f32 %v5451_v57, %v1047_v27  ;;  %v6162_v4 = vadd.f32 %v1058_v32, %v1050_v28 }
 0x3fe   :  { %v6164_v6 = vadd.f32 %v1057_v3, %v1049_v58  ;;  %1062 = vst [vmem:[#allocation4 + $0x8] sm:$0x2] %v6162_v4  ;;  %v1064_v8 = vpack.c.bf16 %v6162_v4, %v6162_v4 }
 0x400   :  { %1061 = vst [vmem:[#allocation4] sm:$0x2] %v6164_v6  ;;  %v1063_v55 = vpack.c.bf16 %v6164_v6, %v6164_v6  ;;  %v1068_v56 = vunpack.c.l.b16 %v1064_v8 }
 0x402   :  { %v1067_v10 = vunpack.c.l.b16 %v1063_v55 }
 0x404   :  { %v1069_v12 = vrot.slane %v1067_v10, 1 }
 0x406   :  { %v1070_v14 = vsel %vm915_vm8, %v1068_v56, %v1069_v12 }
 0x407   :  { %v1071_v16 = vpack.c.b16 %v1070_v14, %v1070_v14 }
 0x409   :  { %1106 = vmatmul.mubr.bf16.vlgmr.msra.gmra.mxu0 %v1071_v16  ;;  %4886 = vmatmul.mubr.bf16.vlgmr.msra.gmra.mxu1 %v1071_v16 }
 0x40a   :  { %1232 = vmatpush1.bf16.msra.mxu0 %v5880_v30  ;;  %4890 = vmatpush3.bf16.msra.mxu1 %v5885_v31 }
 0x40b   :  { %1233 = vmatprep.subr.bf16.mxu0 %v5890_v33  ;;  %4891 = vmatprep.subr.bf16.mxu1 %v5654_v1 }
 0x40c   :  { %1263 = vmatprep.mubr.bf16.mxu0 %v5656_v2  ;;  %4905 = vmatprep.mubr.msk.bf16.mxu1 %vm5655_vm1, %v5654_v1 }
 0x40e   :  { %1234 = vmatpush1.bf16.msra.mxu0 %v5898_v34  ;;  %4892 = vmatpush3.bf16.msra.mxu1 %v5904_v35 }
 0x40f   :  { %1235 = vmatprep.subr.bf16.mxu0 %v5910_v36  ;;  %4893 = vmatprep.subr.bf16.mxu1 %v5654_v1 }
 0x412   :  { %1236 = vmatpush1.bf16.msra.mxu0 %v5920_v37  ;;  %4894 = vmatpush3.bf16.msra.mxu1 %v5926_v38 }
 0x413   :  { %1237 = vmatprep.subr.bf16.mxu0 %v5932_v39  ;;  %4895 = vmatprep.subr.bf16.mxu1 %v5654_v1 }
 0x416   :  { %1238 = vmatpush1.bf16.msra.mxu0 %v5939_v40  ;;  %4896 = vmatpush3.bf16.msra.mxu1 %v5945_v41 }
 0x417   :  { %1239 = vmatprep.subr.bf16.mxu0 %v5951_v42  ;;  %4897 = vmatprep.subr.bf16.mxu1 %v5654_v1 }
 0x41a   :  { %1240 = vmatpush1.bf16.msra.mxu0 %v5958_v43  ;;  %4898 = vmatpush3.bf16.msra.mxu1 %v5964_v44 }
 0x41b   :  { %1241 = vmatprep.subr.bf16.mxu0 %v5970_v45  ;;  %4899 = vmatprep.subr.bf16.mxu1 %v5654_v1 }
 0x41e   :  { %1242 = vmatpush1.bf16.msra.mxu0 %v5977_v46  ;;  %4900 = vmatpush3.bf16.msra.mxu1 %v5983_v47 }
 0x41f   :  { %1243 = vmatprep.subr.bf16.mxu0 %v5989_v48  ;;  %4901 = vmatprep.subr.bf16.mxu1 %v5654_v1 }
 0x422   :  { %1244 = vmatpush1.bf16.msra.mxu0 %v5996_v49  ;;  %4902 = vmatpush3.bf16.msra.mxu1 %v6002_v50 }
 0x423   :  { %1245 = vmatprep.subr.bf16.mxu0 %v6008_v51  ;;  %4903 = vmatprep.subr.bf16.mxu1 %v5654_v1 }
 0x426   :  { %1246 = vmatpush1.bf16.msra.mxu0 %v6015_v52  ;;  %4904 = vmatpush3.bf16.msra.mxu1 %v6021_v53 }
 0x427   :  { %1389 = vmatprep.subr.bf16.mxu0 %v5863_v0  ;;  %4909 = vmatprep.subr.bf16.mxu1 %v5654_v1 }
 0x4c9   :  { %v1107_v17 = vpop.f32.mrf.mxu0  ;;  %v1148_v19 = vpop.f32.mrf.mxu1 }
 0x4ca   :  { %v1155_v21 = vrot.slane %v1107_v17, 6  ;;  %v1156_v9 = vrot.slane %v1107_v17, 7 }
 0x4cb   :  { %v1109_v63 = vpop.f32.mrf.mxu0  ;;  %v4887_v22 = vpop.f32.mrf.mxu1 }
 0x4cc   :  { %v1159_v23 = vadd.f32 %v1155_v21, %v6078_v7  ;;  %v1160_v24 = vadd.f32 %v1156_v9, %v6081_v11  ;;  %v1174_v28 = vrot.slane %v1109_v63, 6  ;;  %v1175_v29 = vrot.slane %v1109_v63, 7 }
 0x4cd   :  { %v1111_v26 = vpop.f32.mrf.mxu0  ;;  %v1151_v13 = vpop.f32.mrf.mxu1  ;;  %v1192_v21 = vadd.f32 %v6094_v59, %v1148_v19  ;;  %v1210_v19 = vrot.slane %v6164_v6, 7 }
 0x4ce   :  { %v4404_v54 = vmul.f32 -1.442695, %v1159_v23  ;;  %v4405_v27 = vmul.f32 -1.442695, %v1160_v24  ;;  %v1178_v58 = vadd.f32 %v1174_v28, %v6085_v20  ;;  %v1179_v3 = vadd.f32 %v1175_v29, %v6087_v25 }
 0x4cf   :  { %v1112_v32 = vpop.f32.mrf.mxu0  ;;  %v4888_v57 = vpop.f32.mrf.mxu1  ;;  %v1194_v22 = vrot.slane %v1192_v21, 6  ;;  %v1195_v24 = vrot.slane %v1192_v21, 7 }
 0x4d0   :  { %5452 = vpow2.f32 %v4404_v54  ;;  %v4406_v55 = vmul.f32 -1.442695, %v1178_v58  ;;  %v4407_v8 = vmul.f32 -1.442695, %v1179_v3 }
 0x4d1   :  { %5454 = vpow2.f32 %v4405_v27 }
 0x4d2   :  { %5456 = vpow2.f32 %v4406_v55  ;;  %v1211_v55 = vrot.slane %v6162_v4, 7 }
 0x4d3   :  { %5458 = vpow2.f32 %v4407_v8 }
 0x4dd   :  { %v5453_v10 = vpop.eup %5452 }
 0x4de   :  { %v5455_v56 = vpop.eup %5454  ;;  %v1167_v12 = vadd.f32 1.0, %v5453_v10 }
 0x4df   :  { %v1168_v14 = vadd.f32 1.0, %v5455_v56  ;;  %v5457_v16 = vpop.eup %5456 }
 0x4e0   :  { %5460 = vrcp.f32 %v1167_v12  ;;  %v5459_v17 = vpop.eup %5458  ;;  %v1186_v9 = vadd.f32 1.0, %v5457_v16 }
 0x4e1   :  { %5462 = vrcp.f32 %v1168_v14  ;;  %v1187_v63 = vadd.f32 1.0, %v5459_v17 }
 0x4e2   :  { %5464 = vrcp.f32 %v1186_v9 }
 0x4e3   :  { %5466 = vrcp.f32 %v1187_v63 }
 0x4ed   :  { %v5461_v23 = vpop.eup %5460 }
 0x4ee   :  { %v5463_v26 = vpop.eup %5462  ;;  %v1198_v13 = vmul.f32 %v5461_v23, %v1194_v22 }
 0x4ef   :  { %v1199_v54 = vmul.f32 %v5463_v26, %v1195_v24  ;;  %v5465_v29 = vpop.eup %5464 }
 0x4f0   :  { %v1200_v27 = vadd.f32 %v1198_v13, %v6101_v15  ;;  %v5467_v32 = vpop.eup %5466  ;;  %v1204_v57 = vsub.f32 1.0, %v5465_v29  ;;  %v1214_v56 = vmul.f32 %v5465_v29, %v1210_v19 }
 0x4f1   :  { %v1201_v28 = vadd.f32 %v1199_v54, %v6103_v18  ;;  %v1205_v3 = vsub.f32 1.0, %v5467_v32  ;;  %v1215_v14 = vmul.f32 %v5467_v32, %v1211_v55 }
 0x4f2   :  { %5468 = vtanh.f32 %v1200_v27 }
 0x4f3   :  { %5470 = vtanh.f32 %v1201_v28 }
 0x4ff   :  { %v5469_v58 = vpop.eup %5468 }
 0x500   :  { %v5471_v8 = vpop.eup %5470  ;;  %v1206_v10 = vmul.f32 %v5469_v58, %v1204_v57 }
 0x501   :  { %v1207_v12 = vmul.f32 %v5471_v8, %v1205_v3 }
 0x502   :  { %v6217_v16 = vadd.f32 %v1214_v56, %v1206_v10 }
 0x503   :  { %v6219_v17 = vadd.f32 %v1215_v14, %v1207_v12 }
 0x504   :  { %1218 = vst [vmem:[#allocation4] sm:$0x4] %v6217_v16  ;;  %v1220_v21 = vpack.c.bf16 %v6217_v16, %v6217_v16 }
 0x505   :  { %1219 = vst [vmem:[#allocation4 + $0x8] sm:$0x4] %v6219_v17  ;;  %v1221_v6 = vpack.c.bf16 %v6219_v17, %v6219_v17 }
 0x506   :  { %v1224_v4 = vunpack.c.l.b16 %v1220_v21 }
 0x507   :  { %v1225_v9 = vunpack.c.l.b16 %v1221_v6 }
 0x508   :  { %v1226_v63 = vrot.slane %v1224_v4, 2 }
 0x509   :  { %v1227_v22 = vrot.slane %v1225_v9, 1 }
 0x50b   :  { %v1228_v23 = vsel %vm915_vm8, %v1227_v22, %v1226_v63 }
 0x50c   :  { %v1229_v24 = vpack.c.b16 %v1228_v23, %v1228_v23 }
 0x50e   :  { %1264 = vmatmul.mubr.bf16.vlgmr.msra.gmra.mxu0 %v1229_v24  ;;  %4906 = vmatmul.mubr.bf16.vlgmr.msra.gmra.mxu1 %v1229_v24 }
 0x50f   :  { %1390 = vmatpush1.bf16.msra.mxu0 %v5880_v30  ;;  %4910 = vmatpush3.bf16.msra.mxu1 %v5885_v31 }
 0x510   :  { %1391 = vmatprep.subr.bf16.mxu0 %v5890_v33  ;;  %4911 = vmatprep.subr.bf16.mxu1 %v5654_v1 }
 0x511   :  { %1421 = vmatprep.mubr.bf16.mxu0 %v5656_v2  ;;  %4925 = vmatprep.mubr.msk.bf16.mxu1 %vm5655_vm1, %v5654_v1 }
 0x513   :  { %1392 = vmatpush1.bf16.msra.mxu0 %v5898_v34  ;;  %4912 = vmatpush3.bf16.msra.mxu1 %v5904_v35 }
 0x514   :  { %1393 = vmatprep.subr.bf16.mxu0 %v5910_v36  ;;  %4913 = vmatprep.subr.bf16.mxu1 %v5654_v1 }
 0x517   :  { %1394 = vmatpush1.bf16.msra.mxu0 %v5920_v37  ;;  %4914 = vmatpush3.bf16.msra.mxu1 %v5926_v38 }
 0x518   :  { %1395 = vmatprep.subr.bf16.mxu0 %v5932_v39  ;;  %4915 = vmatprep.subr.bf16.mxu1 %v5654_v1 }
 0x51b   :  { %1396 = vmatpush1.bf16.msra.mxu0 %v5939_v40  ;;  %4916 = vmatpush3.bf16.msra.mxu1 %v5945_v41 }
 0x51c   :  { %1397 = vmatprep.subr.bf16.mxu0 %v5951_v42  ;;  %4917 = vmatprep.subr.bf16.mxu1 %v5654_v1 }
 0x51f   :  { %1398 = vmatpush1.bf16.msra.mxu0 %v5958_v43  ;;  %4918 = vmatpush3.bf16.msra.mxu1 %v5964_v44 }
 0x520   :  { %1399 = vmatprep.subr.bf16.mxu0 %v5970_v45  ;;  %4919 = vmatprep.subr.bf16.mxu1 %v5654_v1 }
 0x523   :  { %1400 = vmatpush1.bf16.msra.mxu0 %v5977_v46  ;;  %4920 = vmatpush3.bf16.msra.mxu1 %v5983_v47 }
 0x524   :  { %1401 = vmatprep.subr.bf16.mxu0 %v5989_v48  ;;  %4921 = vmatprep.subr.bf16.mxu1 %v5654_v1 }
 0x527   :  { %1402 = vmatpush1.bf16.msra.mxu0 %v5996_v49  ;;  %4922 = vmatpush3.bf16.msra.mxu1 %v6002_v50 }
 0x528   :  { %1403 = vmatprep.subr.bf16.mxu0 %v6008_v51  ;;  %4923 = vmatprep.subr.bf16.mxu1 %v5654_v1 }
 0x52b   :  { %1404 = vmatpush1.bf16.msra.mxu0 %v6015_v52  ;;  %4924 = vmatpush3.bf16.msra.mxu1 %v6021_v53 }
 0x52c   :  { %1547 = vmatprep.subr.bf16.mxu0 %v5863_v0  ;;  %4929 = vmatprep.subr.bf16.mxu1 %v5654_v1 }
 0x5ce   :  { %v1265_v26 = vpop.f32.mrf.mxu0  ;;  %v1306_v13 = vpop.f32.mrf.mxu1 }
 0x5cf   :  { %v1313_v54 = vrot.slane %v1265_v26, 5  ;;  %v1314_v27 = vrot.slane %v1265_v26, 6  ;;  %v1350_v26 = vadd.f32 %v6094_v59, %v1306_v13  ;;  %v1368_v13 = vrot.slane %v6217_v16, 7 }
 0x5d0   :  { %v1267_v28 = vpop.f32.mrf.mxu0  ;;  %v4907_v29 = vpop.f32.mrf.mxu1 }
 0x5d1   :  { %v1317_v32 = vadd.f32 %v1313_v54, %v6078_v7  ;;  %v1318_v57 = vadd.f32 %v1314_v27, %v6081_v11  ;;  %v1332_v8 = vrot.slane %v1267_v28, 5  ;;  %v1333_v10 = vrot.slane %v1267_v28, 6 }
 0x5d2   :  { %v1269_v19 = vpop.f32.mrf.mxu0  ;;  %v1309_v58 = vpop.f32.mrf.mxu1  ;;  %v1352_v28 = vrot.slane %v1350_v26, 5 }
 0x5d3   :  { %v4408_v3 = vmul.f32 -1.442695, %v1317_v32  ;;  %v4409_v55 = vmul.f32 -1.442695, %v1318_v57  ;;  %v1336_v12 = vadd.f32 %v1332_v8, %v6085_v20  ;;  %v1337_v14 = vadd.f32 %v1333_v10, %v6087_v25 }
 0x5d4   :  { %v1270_v56 = vpop.f32.mrf.mxu0  ;;  %v4908_v0 = vpop.f32.mrf.mxu1  ;;  %v1353_v32 = vrot.slane %v1350_v26, 6 }
 0x5d5   :  { %5472 = vpow2.f32 %v4408_v3  ;;  %v4410_v21 = vmul.f32 -1.442695, %v1336_v12  ;;  %v4411_v6 = vmul.f32 -1.442695, %v1337_v14  ;;  %v1369_v14 = vrot.slane %v6219_v17, 7 }
 0x5d6   :  { %5474 = vpow2.f32 %v4409_v55 }
 0x5d7   :  { %5476 = vpow2.f32 %v4410_v21 }
 0x5d8   :  { %5478 = vpow2.f32 %v4411_v6 }
 0x5e2   :  { %v5473_v4 = vpop.eup %5472 }
 0x5e3   :  { %v5475_v9 = vpop.eup %5474  ;;  %v1325_v63 = vadd.f32 1.0, %v5473_v4 }
 0x5e4   :  { %v1326_v22 = vadd.f32 1.0, %v5475_v9  ;;  %v5477_v23 = vpop.eup %5476 }
 0x5e5   :  { %5480 = vrcp.f32 %v1325_v63  ;;  %v5479_v24 = vpop.eup %5478  ;;  %v1344_v54 = vadd.f32 1.0, %v5477_v23 }
 0x5e6   :  { %5482 = vrcp.f32 %v1326_v22  ;;  %v1345_v27 = vadd.f32 1.0, %v5479_v24 }
 0x5e7   :  { %5484 = vrcp.f32 %v1344_v54 }
 0x5e8   :  { %5486 = vrcp.f32 %v1345_v27 }
 0x5f2   :  { %v5481_v29 = vpop.eup %5480 }
 0x5f3   :  { %v5483_v57 = vpop.eup %5482  ;;  %v1356_v19 = vmul.f32 %v5481_v29, %v1352_v28 }
 0x5f4   :  { %v1357_v58 = vmul.f32 %v5483_v57, %v1353_v32  ;;  %v5485_v8 = vpop.eup %5484 }
 0x5f5   :  { %v1358_v3 = vadd.f32 %v1356_v19, %v6101_v15  ;;  %v5487_v10 = vpop.eup %5486  ;;  %v1362_v56 = vsub.f32 1.0, %v5485_v8  ;;  %v1372_v4 = vmul.f32 %v5485_v8, %v1368_v13 }
 0x5f6   :  { %v1359_v55 = vadd.f32 %v1357_v58, %v6103_v18  ;;  %v1363_v12 = vsub.f32 1.0, %v5487_v10  ;;  %v1373_v63 = vmul.f32 %v5487_v10, %v1369_v14 }
 0x5f7   :  { %5488 = vtanh.f32 %v1358_v3 }
 0x5f8   :  { %5490 = vtanh.f32 %v1359_v55 }
 0x604   :  { %v5489_v0 = vpop.eup %5488 }
 0x605   :  { %v5491_v21 = vpop.eup %5490  ;;  %v1364_v6 = vmul.f32 %v5489_v0, %v1362_v56 }
 0x606   :  { %v1365_v9 = vmul.f32 %v5491_v21, %v1363_v12 }
 0x607   :  { %v6272_v22 = vadd.f32 %v1372_v4, %v1364_v6 }
 0x608   :  { %v6274_v23 = vadd.f32 %v1373_v63, %v1365_v9 }
 0x609   :  { %1376 = vst [vmem:[#allocation4] sm:$0x8] %v6272_v22  ;;  %v1378_v24 = vpack.c.bf16 %v6272_v22, %v6272_v22 }
 0x60a   :  { %1377 = vst [vmem:[#allocation4 + $0x8] sm:$0x8] %v6274_v23  ;;  %v1379_v16 = vpack.c.bf16 %v6274_v23, %v6274_v23 }
 0x60b   :  { %v1382_v17 = vunpack.c.l.b16 %v1378_v24 }
 0x60c   :  { %v1383_v26 = vunpack.c.l.b16 %v1379_v16 }
 0x60d   :  { %v1384_v54 = vrot.slane %v1382_v17, 3  ;;  %v1527_v17 = vrot.slane %v6274_v23, 7 }
 0x60e   :  { %v1385_v27 = vrot.slane %v1383_v26, 2 }
 0x610   :  { %v1386_v28 = vsel %vm915_vm8, %v1385_v27, %v1384_v54 }
 0x611   :  { %v1387_v29 = vpack.c.b16 %v1386_v28, %v1386_v28 }
 0x613   :  { %1422 = vmatmul.mubr.bf16.vlgmr.msra.gmra.mxu0 %v1387_v29  ;;  %4926 = vmatmul.mubr.bf16.vlgmr.msra.gmra.mxu1 %v1387_v29 }
 0x614   :  { %1548 = vmatpush1.bf16.msra.mxu0 %v5880_v30  ;;  %4930 = vmatpush3.bf16.msra.mxu1 %v5885_v31  ;;  %v6319_v30 = vld [vmem:[%s6994_s10 + $0xac] ss:$12 sps:$4 sm:$0xff]  }
 0x615   :  { %1549 = vmatprep.subr.bf16.mxu0 %v5890_v33  ;;  %4931 = vmatprep.subr.bf16.mxu1 %v5654_v1 }
 0x616   :  { %1579 = vmatprep.mubr.bf16.mxu0 %v5656_v2  ;;  %4945 = vmatprep.mubr.msk.bf16.mxu1 %vm5655_vm1, %v5654_v1 }
 0x618   :  { %1550 = vmatpush1.bf16.msra.mxu0 %v5898_v34  ;;  %4932 = vmatpush3.bf16.msra.mxu1 %v5904_v35 }
 0x619   :  { %1551 = vmatprep.subr.bf16.mxu0 %v5910_v36  ;;  %4933 = vmatprep.subr.bf16.mxu1 %v5654_v1 }
 0x61c   :  { %1552 = vmatpush1.bf16.msra.mxu0 %v5920_v37  ;;  %4934 = vmatpush3.bf16.msra.mxu1 %v5926_v38 }
 0x61d   :  { %1553 = vmatprep.subr.bf16.mxu0 %v5932_v39  ;;  %4935 = vmatprep.subr.bf16.mxu1 %v5654_v1 }
 0x620   :  { %1554 = vmatpush1.bf16.msra.mxu0 %v5939_v40  ;;  %4936 = vmatpush3.bf16.msra.mxu1 %v5945_v41 }
 0x621   :  { %1555 = vmatprep.subr.bf16.mxu0 %v5951_v42  ;;  %4937 = vmatprep.subr.bf16.mxu1 %v5654_v1 }
 0x624   :  { %1556 = vmatpush1.bf16.msra.mxu0 %v5958_v43  ;;  %4938 = vmatpush3.bf16.msra.mxu1 %v5964_v44 }
 0x625   :  { %1557 = vmatprep.subr.bf16.mxu0 %v5970_v45  ;;  %4939 = vmatprep.subr.bf16.mxu1 %v5654_v1 }
 0x628   :  { %1558 = vmatpush1.bf16.msra.mxu0 %v5977_v46  ;;  %4940 = vmatpush3.bf16.msra.mxu1 %v5983_v47 }
 0x629   :  { %1559 = vmatprep.subr.bf16.mxu0 %v5989_v48  ;;  %4941 = vmatprep.subr.bf16.mxu1 %v5654_v1 }
 0x62c   :  { %1560 = vmatpush1.bf16.msra.mxu0 %v5996_v49  ;;  %4942 = vmatpush3.bf16.msra.mxu1 %v6002_v50 }
 0x62d   :  { %1561 = vmatprep.subr.bf16.mxu0 %v6008_v51  ;;  %4943 = vmatprep.subr.bf16.mxu1 %v5654_v1 }
 0x630   :  { %1562 = vmatpush1.bf16.msra.mxu0 %v6015_v52  ;;  %4944 = vmatpush3.bf16.msra.mxu1 %v6021_v53 }
 0x631   :  { %1705 = vmatprep.subr.bf16.mxu0 %v6319_v30  ;;  %4949 = vmatprep.subr.bf16.mxu1 %v5654_v1 }
 0x6d3   :  { %v1423_v31 = vpop.f32.mrf.mxu0  ;;  %v1464_v33 = vpop.f32.mrf.mxu1 }
 0x6d4   :  { %v1471_v34 = vrot.slane %v1423_v31, 4  ;;  %v1472_v35 = vrot.slane %v1423_v31, 5  ;;  %v1508_v3 = vadd.f32 %v6094_v59, %v1464_v33  ;;  %v1526_v59 = vrot.slane %v6272_v22, 7 }
 0x6d5   :  { %v1425_v36 = vpop.f32.mrf.mxu0  ;;  %v4927_v37 = vpop.f32.mrf.mxu1 }
 0x6d6   :  { %v1475_v38 = vadd.f32 %v1471_v34, %v6078_v7  ;;  %v1476_v39 = vadd.f32 %v1472_v35, %v6081_v11  ;;  %v1490_v44 = vrot.slane %v1425_v36, 4  ;;  %v1491_v45 = vrot.slane %v1425_v36, 5 }
 0x6d7   :  { %v1427_v40 = vpop.f32.mrf.mxu0  ;;  %v1467_v41 = vpop.f32.mrf.mxu1  ;;  %v1510_v10 = vrot.slane %v1508_v3, 4  ;;  %v1511_v13 = vrot.slane %v1508_v3, 5  ;;  %v6463_v3 = vld [vmem:[%s6994_s10 + $0x18] ss:$12 sps:$4 sm:$0xff]  }
 0x6d8   :  { %v4412_v42 = vmul.f32 -1.442695, %v1475_v38  ;;  %v4413_v43 = vmul.f32 -1.442695, %v1476_v39  ;;  %v1494_v48 = vadd.f32 %v1490_v44, %v6085_v20  ;;  %v1495_v49 = vadd.f32 %v1491_v45, %v6087_v25  ;;  %v6346_v40 = vld [vmem:[%s6994_s10 + $0xa8] ss:$12 sps:$4 sm:$0xff]  }
 0x6d9   :  { %v1428_v46 = vpop.f32.mrf.mxu0  ;;  %v4928_v47 = vpop.f32.mrf.mxu1  ;;  %v6352_v41 = vld [vmem:[%s6994_s10 + $0xb0] ss:$12 sps:$4 sm:$0xff]   ;;  %v6374_v44 = vld [vmem:[%s6994_s10 + $0x98] ss:$12 sps:$4 sm:$0xff]  }
 0x6da   :  { %5492 = vpow2.f32 %v4412_v42  ;;  %v4414_v50 = vmul.f32 -1.442695, %v1494_v48  ;;  %v4415_v51 = vmul.f32 -1.442695, %v1495_v49  ;;  %v6358_v42 = vld [vmem:[%s6994_s10 + $0x94] ss:$12 sps:$4 sm:$0xff]  }
 0x6db   :  { %5494 = vpow2.f32 %v4413_v43  ;;  %v6368_v43 = vld [vmem:[%s6994_s10 + $0x90] ss:$12 sps:$4 sm:$0xff]   ;;  %v6387_v46 = vld [vmem:[%s6994_s10 + $0x78] ss:$12 sps:$4 sm:$0xff]   ;;  %v6393_v47 = vld [vmem:[%s6994_s10 + $0x80] ss:$12 sps:$4 sm:$0xff]  }
 0x6dc   :  { %5496 = vpow2.f32 %v4414_v50  ;;  %v6380_v45 = vld [vmem:[%s6994_s10 + $0x7c] ss:$12 sps:$4 sm:$0xff]   ;;  %v6399_v48 = vld [vmem:[%s6994_s10 + $0x64] ss:$12 sps:$4 sm:$0xff]   ;;  %v6406_v49 = vld [vmem:[%s6994_s10 + $0x60] ss:$12 sps:$4 sm:$0xff]  }
 0x6dd   :  { %5498 = vpow2.f32 %v4415_v51  ;;  %v6412_v50 = vld [vmem:[%s6994_s10 + $0x68] ss:$12 sps:$4 sm:$0xff]   ;;  %v6418_v51 = vld [vmem:[%s6994_s10 + $0x4c] ss:$12 sps:$4 sm:$0xff]  }
 0x6e7   :  { %v5493_v52 = vpop.eup %5492 }
 0x6e8   :  { %v5495_v53 = vpop.eup %5494  ;;  %v1483_v32 = vadd.f32 1.0, %v5493_v52  ;;  %v6425_v52 = vld [vmem:[%s6994_s10 + $0x48] ss:$12 sps:$4 sm:$0xff]  }
 0x6e9   :  { %v1484_v57 = vadd.f32 1.0, %v5495_v53  ;;  %v5497_v19 = vpop.eup %5496  ;;  %v6431_v53 = vld [vmem:[%s6994_s10 + $0x50] ss:$12 sps:$4 sm:$0xff]  }
 0x6ea   :  { %5500 = vrcp.f32 %v1483_v32  ;;  %v5499_v58 = vpop.eup %5498  ;;  %v1502_v55 = vadd.f32 1.0, %v5497_v19  ;;  %v6437_v32 = vld [vmem:[%s6994_s10 + $0x34] ss:$12 sps:$4 sm:$0xff]   ;;  %v6450_v19 = vld [vmem:[%s6994_s10 + $0x38] ss:$12 sps:$4 sm:$0xff]  }
 0x6eb   :  { %5502 = vrcp.f32 %v1484_v57  ;;  %v1503_v8 = vadd.f32 1.0, %v5499_v58  ;;  %v6444_v57 = vld [vmem:[%s6994_s10 + $0x30] ss:$12 sps:$4 sm:$0xff]  }
 0x6ec   :  { %5504 = vrcp.f32 %v1502_v55  ;;  %v6456_v58 = vld [vmem:[%s6994_s10 + $0x1c] ss:$12 sps:$4 sm:$0xff]   ;;  %v6469_v55 = vld [vmem:[%s6994_s10 + $0x20] ss:$12 sps:$4 sm:$0xff]  }
 0x6ed   :  { %5506 = vrcp.f32 %v1503_v8  ;;  %v6475_v8 = vld [vmem:[%s6994_s10 + $0x4] ss:$12 sps:$4 sm:$0xff]  }
 0x6f7   :  { %v5501_v56 = vpop.eup %5500 }
 0x6f8   :  { %v5503_v0 = vpop.eup %5502  ;;  %v1514_v12 = vmul.f32 %v5501_v56, %v1510_v10  ;;  %v6482_v10 = vld [vmem:[%s6994_s10] ss:$12 sps:$4 sm:$0xff]   ;;  %v6488_v56 = vld [vmem:[%s6994_s10 + $0x8] ss:$12 sps:$4 sm:$0xff]  }
 0x6f9   :  { %v1515_v14 = vmul.f32 %v5503_v0, %v1511_v13  ;;  %v5505_v4 = vpop.eup %5504 }
 0x6fa   :  { %v1516_v21 = vadd.f32 %v1514_v12, %v6101_v15  ;;  %v5507_v9 = vpop.eup %5506  ;;  %v1520_v63 = vsub.f32 1.0, %v5505_v4  ;;  %v1530_v27 = vmul.f32 %v5505_v4, %v1526_v59 }
 0x6fb   :  { %v1517_v6 = vadd.f32 %v1515_v14, %v6103_v18  ;;  %v1521_v16 = vsub.f32 1.0, %v5507_v9  ;;  %v1531_v29 = vmul.f32 %v5507_v9, %v1527_v17 }
 0x6fc   :  { %5508 = vtanh.f32 %v1516_v21 }
 0x6fd   :  { %5510 = vtanh.f32 %v1517_v6 }
 0x709   :  { %v5509_v24 = vpop.eup %5508 }
 0x70a   :  { %v5511_v26 = vpop.eup %5510  ;;  %v1522_v54 = vmul.f32 %v5509_v24, %v1520_v63 }
 0x70b   :  { %v1523_v28 = vmul.f32 %v5511_v26, %v1521_v16 }
 0x70c   :  { %v6332_v31 = vadd.f32 %v1530_v27, %v1522_v54 }
 0x70d   :  { %v6334_v33 = vadd.f32 %v1531_v29, %v1523_v28 }
 0x70e   :  { %1534 = vst [vmem:[#allocation4] sm:$0x10] %v6332_v31  ;;  %v1536_v34 = vpack.c.bf16 %v6332_v31, %v6332_v31 }
 0x70f   :  { %1535 = vst [vmem:[#allocation4 + $0x8] sm:$0x10] %v6334_v33  ;;  %v1537_v22 = vpack.c.bf16 %v6334_v33, %v6334_v33 }
 0x710   :  { %v1540_v23 = vunpack.c.l.b16 %v1536_v34 }
 0x711   :  { %v1541_v35 = vunpack.c.l.b16 %v1537_v22 }
 0x712   :  { %v1542_v36 = vrot.slane %v1540_v23, 4 }
 0x713   :  { %v1543_v37 = vrot.slane %v1541_v35, 3 }
 0x715   :  { %v1544_v38 = vsel %vm915_vm8, %v1543_v37, %v1542_v36 }
 0x716   :  { %v1545_v39 = vpack.c.b16 %v1544_v38, %v1544_v38 }
 0x718   :  { %1580 = vmatmul.mubr.bf16.vlgmr.msra.gmra.mxu0 %v1545_v39  ;;  %4946 = vmatmul.mubr.bf16.vlgmr.msra.gmra.mxu1 %v1545_v39  ;;  %v6500_v39 = vld [vmem:[%s6996_s12] ss:$0 sm:$0xff] }
 0x719   :  { %1706 = vmatpush1.bf16.msra.mxu0 %v6346_v40  ;;  %4950 = vmatpush3.bf16.msra.mxu1 %v6352_v41 }
 0x71a   :  { %1707 = vmatprep.subr.bf16.mxu0 %v6358_v42  ;;  %4951 = vmatprep.subr.bf16.mxu1 %v5654_v1 }
 0x71b   :  { %1737 = vmatprep.mubr.bf16.mxu0 %v5656_v2  ;;  %4965 = vmatprep.mubr.msk.bf16.mxu1 %vm5655_vm1, %v5654_v1 }
 0x71d   :  { %1708 = vmatpush1.bf16.msra.mxu0 %v6368_v43  ;;  %4952 = vmatpush3.bf16.msra.mxu1 %v6374_v44 }
 0x71e   :  { %1709 = vmatprep.subr.bf16.mxu0 %v6380_v45  ;;  %4953 = vmatprep.subr.bf16.mxu1 %v5654_v1 }
 0x721   :  { %1710 = vmatpush1.bf16.msra.mxu0 %v6387_v46  ;;  %4954 = vmatpush3.bf16.msra.mxu1 %v6393_v47 }
 0x722   :  { %1711 = vmatprep.subr.bf16.mxu0 %v6399_v48  ;;  %4955 = vmatprep.subr.bf16.mxu1 %v5654_v1 }
 0x725   :  { %1712 = vmatpush1.bf16.msra.mxu0 %v6406_v49  ;;  %4956 = vmatpush3.bf16.msra.mxu1 %v6412_v50 }
 0x726   :  { %1713 = vmatprep.subr.bf16.mxu0 %v6418_v51  ;;  %4957 = vmatprep.subr.bf16.mxu1 %v5654_v1 }
 0x729   :  { %1714 = vmatpush1.bf16.msra.mxu0 %v6425_v52  ;;  %4958 = vmatpush3.bf16.msra.mxu1 %v6431_v53 }
 0x72a   :  { %1715 = vmatprep.subr.bf16.mxu0 %v6437_v32  ;;  %4959 = vmatprep.subr.bf16.mxu1 %v5654_v1 }
 0x72d   :  { %1716 = vmatpush1.bf16.msra.mxu0 %v6444_v57  ;;  %4960 = vmatpush3.bf16.msra.mxu1 %v6450_v19 }
 0x72e   :  { %1717 = vmatprep.subr.bf16.mxu0 %v6456_v58  ;;  %4961 = vmatprep.subr.bf16.mxu1 %v5654_v1 }
 0x731   :  { %1718 = vmatpush1.bf16.msra.mxu0 %v6463_v3  ;;  %4962 = vmatpush3.bf16.msra.mxu1 %v6469_v55 }
 0x732   :  { %1719 = vmatprep.subr.bf16.mxu0 %v6475_v8  ;;  %4963 = vmatprep.subr.bf16.mxu1 %v5654_v1 }
 0x735   :  { %1720 = vmatpush1.bf16.msra.mxu0 %v6482_v10  ;;  %4964 = vmatpush3.bf16.msra.mxu1 %v6488_v56 }
 0x736   :  { %1863 = vmatprep.subr.bf16.mxu0 %v6319_v30  ;;  %4969 = vmatprep.subr.bf16.mxu1 %v5654_v1 }
 0x7d8   :  { %v1581_v13 = vpop.f32.mrf.mxu0  ;;  %v1622_v0 = vpop.f32.mrf.mxu1 }
 0x7d9   :  { %v1629_v12 = vrot.slane %v1581_v13, 3  ;;  %v1630_v14 = vrot.slane %v1581_v13, 4  ;;  %v1666_v13 = vadd.f32 %v6500_v39, %v1622_v0  ;;  %v1684_v0 = vrot.slane %v6332_v31, 7 }
 0x7da   :  { %v1583_v21 = vpop.f32.mrf.mxu0  ;;  %v4947_v6 = vpop.f32.mrf.mxu1 }
 0x7db   :  { %v1633_v4 = vadd.f32 %v1629_v12, %v6078_v7  ;;  %v1634_v9 = vadd.f32 %v1630_v14, %v6081_v11  ;;  %v1648_v17 = vrot.slane %v1583_v21, 3  ;;  %v1649_v26 = vrot.slane %v1583_v21, 4 }
 0x7dc   :  { %v1585_v63 = vpop.f32.mrf.mxu0  ;;  %v1625_v59 = vpop.f32.mrf.mxu1  ;;  %v1668_v21 = vrot.slane %v1666_v13, 3 }
 0x7dd   :  { %v4416_v24 = vmul.f32 -1.442695, %v1633_v4  ;;  %v4417_v16 = vmul.f32 -1.442695, %v1634_v9  ;;  %v1652_v27 = vadd.f32 %v1648_v17, %v6085_v20  ;;  %v1653_v28 = vadd.f32 %v1649_v26, %v6087_v25 }
 0x7de   :  { %v1586_v54 = vpop.f32.mrf.mxu0  ;;  %v4948_v30 = vpop.f32.mrf.mxu1  ;;  %v1669_v4 = vrot.slane %v1666_v13, 4 }
 0x7df   :  { %5512 = vpow2.f32 %v4416_v24  ;;  %v4418_v29 = vmul.f32 -1.442695, %v1652_v27  ;;  %v4419_v34 = vmul.f32 -1.442695, %v1653_v28  ;;  %v1685_v28 = vrot.slane %v6334_v33, 7 }
 0x7e0   :  { %5514 = vpow2.f32 %v4417_v16 }
 0x7e1   :  { %5516 = vpow2.f32 %v4418_v29 }
 0x7e2   :  { %5518 = vpow2.f32 %v4419_v34 }
 0x7ec   :  { %v5513_v22 = vpop.eup %5512 }
 0x7ed   :  { %v5515_v23 = vpop.eup %5514  ;;  %v1641_v35 = vadd.f32 1.0, %v5513_v22 }
 0x7ee   :  { %v1642_v36 = vadd.f32 1.0, %v5515_v23  ;;  %v5517_v37 = vpop.eup %5516 }
 0x7ef   :  { %5520 = vrcp.f32 %v1641_v35  ;;  %v5519_v38 = vpop.eup %5518  ;;  %v1660_v12 = vadd.f32 1.0, %v5517_v37 }
 0x7f0   :  { %5522 = vrcp.f32 %v1642_v36  ;;  %v1661_v14 = vadd.f32 1.0, %v5519_v38 }
 0x7f1   :  { %5524 = vrcp.f32 %v1660_v12 }
 0x7f2   :  { %5526 = vrcp.f32 %v1661_v14 }
 0x7fc   :  { %v5521_v6 = vpop.eup %5520 }
 0x7fd   :  { %v5523_v9 = vpop.eup %5522  ;;  %v1672_v63 = vmul.f32 %v5521_v6, %v1668_v21 }
 0x7fe   :  { %v1673_v59 = vmul.f32 %v5523_v9, %v1669_v4  ;;  %v5525_v17 = vpop.eup %5524 }
 0x7ff   :  { %v1674_v24 = vadd.f32 %v1672_v63, %v6101_v15  ;;  %v5527_v26 = vpop.eup %5526  ;;  %v1678_v54 = vsub.f32 1.0, %v5525_v17  ;;  %v1688_v22 = vmul.f32 %v5525_v17, %v1684_v0 }
 0x800   :  { %v1675_v16 = vadd.f32 %v1673_v59, %v6103_v18  ;;  %v1679_v27 = vsub.f32 1.0, %v5527_v26  ;;  %v1689_v35 = vmul.f32 %v5527_v26, %v1685_v28 }
 0x801   :  { %5528 = vtanh.f32 %v1674_v24 }
 0x802   :  { %5530 = vtanh.f32 %v1675_v16 }
 0x80e   :  { %v5529_v30 = vpop.eup %5528 }
 0x80f   :  { %v5531_v29 = vpop.eup %5530  ;;  %v1680_v34 = vmul.f32 %v5529_v30, %v1678_v54 }
 0x810   :  { %v1681_v23 = vmul.f32 %v5531_v29, %v1679_v27 }
 0x811   :  { %v6507_v36 = vadd.f32 %v1688_v22, %v1680_v34 }
 0x812   :  { %v6509_v37 = vadd.f32 %v1689_v35, %v1681_v23 }
 0x813   :  { %1692 = vst [vmem:[#allocation4] sm:$0x20] %v6507_v36  ;;  %v1694_v38 = vpack.c.bf16 %v6507_v36, %v6507_v36  ;;  %v1842_v35 = vrot.slane %v6507_v36, 7 }
 0x814   :  { %1693 = vst [vmem:[#allocation4 + $0x8] sm:$0x20] %v6509_v37  ;;  %v1695_v31 = vpack.c.bf16 %v6509_v37, %v6509_v37 }
 0x815   :  { %v1698_v33 = vunpack.c.l.b16 %v1694_v38 }
 0x816   :  { %v1699_v13 = vunpack.c.l.b16 %v1695_v31 }
 0x817   :  { %v1700_v12 = vrot.slane %v1698_v33, 5  ;;  %v1843_v33 = vrot.slane %v6509_v37, 7 }
 0x818   :  { %v1701_v14 = vrot.slane %v1699_v13, 4 }
 0x81a   :  { %v1702_v21 = vsel %vm915_vm8, %v1701_v14, %v1700_v12 }
 0x81b   :  { %v1703_v6 = vpack.c.b16 %v1702_v21, %v1702_v21 }
 0x81d   :  { %1738 = vmatmul.mubr.bf16.vlgmr.msra.gmra.mxu0 %v1703_v6  ;;  %4966 = vmatmul.mubr.bf16.vlgmr.msra.gmra.mxu1 %v1703_v6 }
 0x81e   :  { %1864 = vmatpush1.bf16.msra.mxu0 %v6346_v40  ;;  %4970 = vmatpush3.bf16.msra.mxu1 %v6352_v41 }
 0x81f   :  { %1865 = vmatprep.subr.bf16.mxu0 %v6358_v42  ;;  %4971 = vmatprep.subr.bf16.mxu1 %v5654_v1 }
 0x820   :  { %1895 = vmatprep.mubr.bf16.mxu0 %v5656_v2  ;;  %4985 = vmatprep.mubr.msk.bf16.mxu1 %vm5655_vm1, %v5654_v1 }
 0x822   :  { %1866 = vmatpush1.bf16.msra.mxu0 %v6368_v43  ;;  %4972 = vmatpush3.bf16.msra.mxu1 %v6374_v44 }
 0x823   :  { %1867 = vmatprep.subr.bf16.mxu0 %v6380_v45  ;;  %4973 = vmatprep.subr.bf16.mxu1 %v5654_v1 }
 0x826   :  { %1868 = vmatpush1.bf16.msra.mxu0 %v6387_v46  ;;  %4974 = vmatpush3.bf16.msra.mxu1 %v6393_v47 }
 0x827   :  { %1869 = vmatprep.subr.bf16.mxu0 %v6399_v48  ;;  %4975 = vmatprep.subr.bf16.mxu1 %v5654_v1 }
 0x82a   :  { %1870 = vmatpush1.bf16.msra.mxu0 %v6406_v49  ;;  %4976 = vmatpush3.bf16.msra.mxu1 %v6412_v50 }
 0x82b   :  { %1871 = vmatprep.subr.bf16.mxu0 %v6418_v51  ;;  %4977 = vmatprep.subr.bf16.mxu1 %v5654_v1 }
 0x82e   :  { %1872 = vmatpush1.bf16.msra.mxu0 %v6425_v52  ;;  %4978 = vmatpush3.bf16.msra.mxu1 %v6431_v53 }
 0x82f   :  { %1873 = vmatprep.subr.bf16.mxu0 %v6437_v32  ;;  %4979 = vmatprep.subr.bf16.mxu1 %v5654_v1 }
 0x832   :  { %1874 = vmatpush1.bf16.msra.mxu0 %v6444_v57  ;;  %4980 = vmatpush3.bf16.msra.mxu1 %v6450_v19 }
 0x833   :  { %1875 = vmatprep.subr.bf16.mxu0 %v6456_v58  ;;  %4981 = vmatprep.subr.bf16.mxu1 %v5654_v1 }
 0x836   :  { %1876 = vmatpush1.bf16.msra.mxu0 %v6463_v3  ;;  %4982 = vmatpush3.bf16.msra.mxu1 %v6469_v55 }
 0x837   :  { %1877 = vmatprep.subr.bf16.mxu0 %v6475_v8  ;;  %4983 = vmatprep.subr.bf16.mxu1 %v5654_v1 }
 0x83a   :  { %1878 = vmatpush1.bf16.msra.mxu0 %v6482_v10  ;;  %4984 = vmatpush3.bf16.msra.mxu1 %v6488_v56 }
 0x8dd   :  { %v1739_v40 = vpop.f32.mrf.mxu0  ;;  %v1780_v41 = vpop.f32.mrf.mxu1 }
 0x8de   :  { %v1787_v42 = vrot.slane %v1739_v40, 2  ;;  %v1788_v43 = vrot.slane %v1739_v40, 3  ;;  %v1824_v59 = vadd.f32 %v6500_v39, %v1780_v41 }
 0x8df   :  { %v1741_v44 = vpop.f32.mrf.mxu0  ;;  %v4967_v45 = vpop.f32.mrf.mxu1 }
 0x8e0   :  { %v1791_v46 = vadd.f32 %v1787_v42, %v6078_v7  ;;  %v1792_v47 = vadd.f32 %v1788_v43, %v6081_v11  ;;  %v1806_v52 = vrot.slane %v1741_v44, 2  ;;  %v1807_v53 = vrot.slane %v1741_v44, 3 }
 0x8e1   :  { %v1743_v48 = vpop.f32.mrf.mxu0  ;;  %v1783_v49 = vpop.f32.mrf.mxu1  ;;  %v1826_v17 = vrot.slane %v1824_v59, 2  ;;  %v1827_v54 = vrot.slane %v1824_v59, 3  ;;  %v5253_v59 = vld [vmem:[#allocation6 + $0x120] ss:$48 sps:$4 sm:$0xff]  }
 0x8e2   :  { %v4420_v50 = vmul.f32 -1.442695, %v1791_v46  ;;  %v4421_v51 = vmul.f32 -1.442695, %v1792_v47  ;;  %v1810_v19 = vadd.f32 %v1806_v52, %v6085_v20  ;;  %v1811_v58 = vadd.f32 %v1807_v53, %v6087_v25  ;;  %v5231_v48 = vld [vmem:[#allocation6 + $0x2a4] ss:$48 sps:$4 sm:$0xff]  }
 0x8e3   :  { %v1744_v32 = vpop.f32.mrf.mxu0  ;;  %v4968_v57 = vpop.f32.mrf.mxu1  ;;  %v5234_v49 = vld [vmem:[#allocation6 + $0x2ac] ss:$48 sps:$4 sm:$0xff]   ;;  %2653 = vmatprep.subr.bf16.mxu0 %v5231_v48  ;;  %v5237_v52 = vld [vmem:[#allocation6 + $0x244] ss:$48 sps:$4 sm:$0xff]  }
 0x8e4   :  { %5532 = vpow2.f32 %v4420_v50  ;;  %v4422_v3 = vmul.f32 -1.442695, %v1810_v19  ;;  %v4423_v55 = vmul.f32 -1.442695, %v1811_v58  ;;  %v5229_v50 = vld [vmem:[#allocation6 + $0x2a0] ss:$48 sps:$4 sm:$0xff]   ;;  %2696 = vmatprep.subr.bf16.mxu1 %v5234_v49 }
 0x8e5   :  { %5534 = vpow2.f32 %v4421_v51  ;;  %v5232_v51 = vld [vmem:[#allocation6 + $0x2a8] ss:$48 sps:$4 sm:$0xff]   ;;  %v5240_v53 = vld [vmem:[#allocation6 + $0x24c] ss:$48 sps:$4 sm:$0xff]   ;;  %v5235_v32 = vld [vmem:[#allocation6 + $0x240] ss:$48 sps:$4 sm:$0xff]  }
 0x8e6   :  { %5536 = vpow2.f32 %v4422_v3  ;;  %v5238_v57 = vld [vmem:[#allocation6 + $0x248] ss:$48 sps:$4 sm:$0xff]   ;;  %v5243_v19 = vld [vmem:[#allocation6 + $0x1e4] ss:$48 sps:$4 sm:$0xff]   ;;  %v5246_v58 = vld [vmem:[#allocation6 + $0x1ec] ss:$48 sps:$4 sm:$0xff]  }
 0x8e7   :  { %5538 = vpow2.f32 %v4423_v55  ;;  %v5241_v3 = vld [vmem:[#allocation6 + $0x1e0] ss:$48 sps:$4 sm:$0xff]   ;;  %v5244_v55 = vld [vmem:[#allocation6 + $0x1e8] ss:$48 sps:$4 sm:$0xff]  }
 0x8f1   :  { %v5533_v8 = vpop.eup %5532 }
 0x8f2   :  { %v5535_v10 = vpop.eup %5534  ;;  %v1799_v56 = vadd.f32 1.0, %v5533_v8  ;;  %v5249_v8 = vld [vmem:[#allocation6 + $0x184] ss:$48 sps:$4 sm:$0xff]  }
 0x8f3   :  { %v1800_v4 = vadd.f32 1.0, %v5535_v10  ;;  %v5537_v9 = vpop.eup %5536  ;;  %v5252_v10 = vld [vmem:[#allocation6 + $0x18c] ss:$48 sps:$4 sm:$0xff]  }
 0x8f4   :  { %5540 = vrcp.f32 %v1799_v56  ;;  %v5539_v63 = vpop.eup %5538  ;;  %v1818_v24 = vadd.f32 1.0, %v5537_v9  ;;  %v5247_v56 = vld [vmem:[#allocation6 + $0x180] ss:$48 sps:$4 sm:$0xff]   ;;  %v5255_v9 = vld [vmem:[#allocation6 + $0x124] ss:$48 sps:$4 sm:$0xff]  }
 0x8f5   :  { %5542 = vrcp.f32 %v1800_v4  ;;  %v1819_v16 = vadd.f32 1.0, %v5539_v63  ;;  %v5250_v4 = vld [vmem:[#allocation6 + $0x188] ss:$48 sps:$4 sm:$0xff]   ;;  %v5258_v63 = vld [vmem:[#allocation6 + $0x12c] ss:$48 sps:$4 sm:$0xff]  }
 0x8f6   :  { %5544 = vrcp.f32 %v1818_v24  ;;  %v5256_v24 = vld [vmem:[#allocation6 + $0x128] ss:$48 sps:$4 sm:$0xff]  }
 0x8f7   :  { %5546 = vrcp.f32 %v1819_v16  ;;  %v5261_v16 = vld [vmem:[#allocation6 + $0xc4] ss:$48 sps:$4 sm:$0xff]  }
 0x901   :  { %v5541_v26 = vpop.eup %5540 }
 0x902   :  { %v5543_v0 = vpop.eup %5542  ;;  %v1830_v30 = vmul.f32 %v5541_v26, %v1826_v17  ;;  %v5264_v17 = vld [vmem:[#allocation6 + $0xcc] ss:$48 sps:$4 sm:$0xff]   ;;  %v5259_v26 = vld [vmem:[#allocation6 + $0xc0] ss:$48 sps:$4 sm:$0xff]  }
 0x903   :  { %v1831_v27 = vmul.f32 %v5543_v0, %v1827_v54  ;;  %v5545_v34 = vpop.eup %5544  ;;  %v5262_v54 = vld [vmem:[#allocation6 + $0xc8] ss:$48 sps:$4 sm:$0xff]   ;;  %v5265_v0 = vld [vmem:[#allocation6 + $0x60] ss:$48 sps:$4 sm:$0xff]  }
 0x904   :  { %v1832_v28 = vadd.f32 %v1830_v30, %v6101_v15  ;;  %v5547_v22 = vpop.eup %5546  ;;  %v1836_v23 = vsub.f32 1.0, %v5545_v34  ;;  %v1846_v14 = vmul.f32 %v5545_v34, %v1842_v35  ;;  %v5267_v30 = vld [vmem:[#allocation6 + $0x64] ss:$48 sps:$4 sm:$0xff]   ;;  %v5276_v34 = vld [vmem:[#allocation6 + $0xc] ss:$48 sps:$4 sm:$0xff]  }
 0x905   :  { %v1833_v29 = vadd.f32 %v1831_v27, %v6103_v18  ;;  %v1837_v31 = vsub.f32 1.0, %v5547_v22  ;;  %v1847_v6 = vmul.f32 %v5547_v22, %v1843_v33  ;;  %v5268_v27 = vld [vmem:[#allocation6 + $0x68] ss:$48 sps:$4 sm:$0xff]   ;;  %v5271_v22 = vld [vmem:[#allocation6] ss:$48 sps:$4 sm:$0xff]  }
 0x906   :  { %5548 = vtanh.f32 %v1832_v28  ;;  %v5270_v28 = vld [vmem:[#allocation6 + $0x6c] ss:$48 sps:$4 sm:$0xff]   ;;  %v5279_v35 = vld [vmem:[#allocation6 + $0x2b4] ss:$48 sps:$4 sm:$0xff]  }
 0x907   :  { %5550 = vtanh.f32 %v1833_v29  ;;  %v5273_v29 = vld [vmem:[#allocation6 + $0x4] ss:$48 sps:$4 sm:$0xff]  }
 0x913   :  { %v5549_v38 = vpop.eup %5548 }
 0x914   :  { %v5551_v13 = vpop.eup %5550  ;;  %v1838_v12 = vmul.f32 %v5549_v38, %v1836_v23  ;;  %v5274_v23 = vld [vmem:[#allocation6 + $0x8] ss:$48 sps:$4 sm:$0xff]   ;;  %v5282_v38 = vld [vmem:[#allocation6 + $0x2bc] ss:$48 sps:$4 sm:$0xff]  }
 0x915   :  { %v1839_v21 = vmul.f32 %v5551_v13, %v1837_v31 }
 0x916   :  { %v6560_v40 = vadd.f32 %v1846_v14, %v1838_v12 }
 0x917   :  { %v6562_v41 = vadd.f32 %v1847_v6, %v1839_v21 }
 0x918   :  { %1850 = vst [vmem:[#allocation4] sm:$0x40] %v6560_v40  ;;  %v1852_v42 = vpack.c.bf16 %v6560_v40, %v6560_v40 }
 0x919   :  { %1851 = vst [vmem:[#allocation4 + $0x8] sm:$0x40] %v6562_v41  ;;  %v1853_v36 = vpack.c.bf16 %v6562_v41, %v6562_v41 }
 0x91a   :  { %v1856_v37 = vunpack.c.l.b16 %v1852_v42 }
 0x91b   :  { %v1857_v43 = vunpack.c.l.b16 %v1853_v36 }
 0x91c   :  { %v1858_v44 = vrot.slane %v1856_v37, 6 }
 0x91d   :  { %v1859_v45 = vrot.slane %v1857_v43, 5 }
 0x91f   :  { %v1860_v46 = vsel %vm915_vm8, %v1859_v45, %v1858_v44 }
 0x920   :  { %v1861_v47 = vpack.c.b16 %v1860_v46, %v1860_v46 }
 0x922   :  { %1896 = vmatmul.mubr.bf16.vlgmr.msra.gmra.mxu0 %v1861_v47  ;;  %4986 = vmatmul.mubr.bf16.vlgmr.msra.gmra.mxu1 %v1861_v47 }
 0x923   :  { %2685 = vmatprep.mubr.bf16.mxu0 %v5656_v2  ;;  %2728 = vmatprep.mubr.bf16.mxu1 %v5656_v2 }
 0x924   :  { %2654 = vmatpush1.bf16.msra.mxu0 %v5229_v50  ;;  %2697 = vmatpush1.bf16.msra.mxu1 %v5232_v51 }
 0x925   :  { %2655 = vmatprep.subr.bf16.mxu0 %v5237_v52  ;;  %2698 = vmatprep.subr.bf16.mxu1 %v5240_v53 }
 0x928   :  { %2656 = vmatpush1.bf16.msra.mxu0 %v5235_v32  ;;  %2699 = vmatpush1.bf16.msra.mxu1 %v5238_v57 }
 0x929   :  { %2657 = vmatprep.subr.bf16.mxu0 %v5243_v19  ;;  %2700 = vmatprep.subr.bf16.mxu1 %v5246_v58 }
 0x92c   :  { %2658 = vmatpush1.bf16.msra.mxu0 %v5241_v3  ;;  %2701 = vmatpush1.bf16.msra.mxu1 %v5244_v55 }
 0x92d   :  { %2659 = vmatprep.subr.bf16.mxu0 %v5249_v8  ;;  %2702 = vmatprep.subr.bf16.mxu1 %v5252_v10 }
 0x930   :  { %2660 = vmatpush1.bf16.msra.mxu0 %v5247_v56  ;;  %2703 = vmatpush1.bf16.msra.mxu1 %v5250_v4 }
 0x931   :  { %2661 = vmatprep.subr.bf16.mxu0 %v5255_v9  ;;  %2704 = vmatprep.subr.bf16.mxu1 %v5258_v63 }
 0x934   :  { %2662 = vmatpush1.bf16.msra.mxu0 %v5253_v59  ;;  %2705 = vmatpush1.bf16.msra.mxu1 %v5256_v24 }
 0x935   :  { %2663 = vmatprep.subr.bf16.mxu0 %v5261_v16  ;;  %2706 = vmatprep.subr.bf16.mxu1 %v5264_v17 }
 0x938   :  { %2664 = vmatpush1.bf16.msra.mxu0 %v5259_v26  ;;  %2707 = vmatpush1.bf16.msra.mxu1 %v5262_v54  ;;  %v2001_v26 = vrot.slane %v6562_v41, 7  ;;  %v5283_v41 = vld [vmem:[#allocation6 + $0x250] ss:$48 sps:$4 sm:$0xff]  }
 0x939   :  { %2665 = vmatprep.subr.bf16.mxu0 %v5267_v30  ;;  %2708 = vmatprep.subr.bf16.mxu1 %v5270_v28 }
 0x93c   :  { %2666 = vmatpush1.bf16.msra.mxu0 %v5265_v0  ;;  %2709 = vmatpush1.bf16.msra.mxu1 %v5268_v27 }
 0x93d   :  { %2667 = vmatprep.subr.bf16.mxu0 %v5273_v29  ;;  %2710 = vmatprep.subr.bf16.mxu1 %v5276_v34 }
 0x940   :  { %2668 = vmatpush1.bf16.msra.mxu0 %v5271_v22  ;;  %2711 = vmatpush1.bf16.msra.mxu1 %v5274_v23  ;;  %v5277_v22 = vld [vmem:[#allocation6 + $0x2b0] ss:$48 sps:$4 sm:$0xff]   ;;  %v5280_v23 = vld [vmem:[#allocation6 + $0x2b8] ss:$48 sps:$4 sm:$0xff]  }
 0x941   :  { %2739 = vmatprep.subr.bf16.mxu0 %v5279_v35  ;;  %2782 = vmatprep.subr.bf16.mxu1 %v5282_v38 }
 0x9e2   :  { %v1897_v31 = vpop.f32.mrf.mxu0  ;;  %v1938_v33 = vpop.f32.mrf.mxu1 }
 0x9e3   :  { %v1945_v13 = vrot.slane %v1897_v31, 1  ;;  %v1946_v12 = vrot.slane %v1897_v31, 2  ;;  %v1982_v58 = vadd.f32 %v6500_v39, %v1938_v33  ;;  %v2000_v39 = vrot.slane %v6560_v40, 7  ;;  %v5285_v40 = vld [vmem:[#allocation6 + $0x254] ss:$48 sps:$4 sm:$0xff]  }
 0x9e4   :  { %v1899_v14 = vpop.f32.mrf.mxu0  ;;  %v4987_v21 = vpop.f32.mrf.mxu1  ;;  %v5288_v31 = vld [vmem:[#allocation6 + $0x25c] ss:$48 sps:$4 sm:$0xff]   ;;  %v5286_v33 = vld [vmem:[#allocation6 + $0x258] ss:$48 sps:$4 sm:$0xff]  }
 0x9e5   :  { %v1949_v6 = vadd.f32 %v1945_v13, %v6078_v7  ;;  %v1950_v42 = vadd.f32 %v1946_v12, %v6081_v11  ;;  %v1964_v45 = vrot.slane %v1899_v14, 1  ;;  %v1965_v46 = vrot.slane %v1899_v14, 2  ;;  %v5291_v13 = vld [vmem:[#allocation6 + $0x1f4] ss:$48 sps:$4 sm:$0xff]   ;;  %v5294_v12 = vld [vmem:[#allocation6 + $0x1fc] ss:$48 sps:$4 sm:$0xff]  }
 0x9e6   :  { %v1901_v36 = vpop.f32.mrf.mxu0  ;;  %v1941_v37 = vpop.f32.mrf.mxu1  ;;  %v1984_v8 = vrot.slane %v1982_v58, 1  ;;  %v1985_v10 = vrot.slane %v1982_v58, 2  ;;  %v5289_v14 = vld [vmem:[#allocation6 + $0x1f0] ss:$48 sps:$4 sm:$0xff]   ;;  %v5292_v21 = vld [vmem:[#allocation6 + $0x1f8] ss:$48 sps:$4 sm:$0xff]  }
 0x9e7   :  { %v4424_v43 = vmul.f32 -1.442695, %v1949_v6  ;;  %v4425_v44 = vmul.f32 -1.442695, %v1950_v42  ;;  %v1968_v49 = vadd.f32 %v1964_v45, %v6085_v20  ;;  %v1969_v50 = vadd.f32 %v1965_v46, %v6087_v25  ;;  %v5297_v6 = vld [vmem:[#allocation6 + $0x194] ss:$48 sps:$4 sm:$0xff]  }
 0x9e8   :  { %v1902_v47 = vpop.f32.mrf.mxu0  ;;  %v4988_v48 = vpop.f32.mrf.mxu1  ;;  %v5300_v42 = vld [vmem:[#allocation6 + $0x19c] ss:$48 sps:$4 sm:$0xff]   ;;  %v5295_v36 = vld [vmem:[#allocation6 + $0x190] ss:$48 sps:$4 sm:$0xff]   ;;  %v5298_v37 = vld [vmem:[#allocation6 + $0x198] ss:$48 sps:$4 sm:$0xff]  }
 0x9e9   :  { %5552 = vpow2.f32 %v4424_v43  ;;  %v4426_v51 = vmul.f32 -1.442695, %v1968_v49  ;;  %v4427_v52 = vmul.f32 -1.442695, %v1969_v50  ;;  %v5303_v43 = vld [vmem:[#allocation6 + $0x134] ss:$48 sps:$4 sm:$0xff]  }
 0x9ea   :  { %5554 = vpow2.f32 %v4425_v44  ;;  %v5306_v44 = vld [vmem:[#allocation6 + $0x13c] ss:$48 sps:$4 sm:$0xff]   ;;  %v5301_v45 = vld [vmem:[#allocation6 + $0x130] ss:$48 sps:$4 sm:$0xff]   ;;  %v5304_v46 = vld [vmem:[#allocation6 + $0x138] ss:$48 sps:$4 sm:$0xff]  }
 0x9eb   :  { %5556 = vpow2.f32 %v4426_v51  ;;  %v5309_v47 = vld [vmem:[#allocation6 + $0xd4] ss:$48 sps:$4 sm:$0xff]   ;;  %v5312_v48 = vld [vmem:[#allocation6 + $0xdc] ss:$48 sps:$4 sm:$0xff]   ;;  %v5307_v49 = vld [vmem:[#allocation6 + $0xd0] ss:$48 sps:$4 sm:$0xff]  }
 0x9ec   :  { %5558 = vpow2.f32 %v4427_v52  ;;  %v5310_v50 = vld [vmem:[#allocation6 + $0xd8] ss:$48 sps:$4 sm:$0xff]   ;;  %v5315_v51 = vld [vmem:[#allocation6 + $0x74] ss:$48 sps:$4 sm:$0xff]   ;;  %v5318_v52 = vld [vmem:[#allocation6 + $0x7c] ss:$48 sps:$4 sm:$0xff]  }
 0x9ed   :  { %v5327_v58 = vld [vmem:[#allocation6 + $0x2c4] ss:$48 sps:$4 sm:$0xff]  }
 0x9f6   :  { %v5553_v7 = vpop.eup %5552 }
 0x9f7   :  { %v5555_v11 = vpop.eup %5554  ;;  %v1957_v53 = vadd.f32 1.0, %v5553_v7  ;;  %v5313_v7 = vld [vmem:[#allocation6 + $0x70] ss:$48 sps:$4 sm:$0xff]  }
 0x9f8   :  { %v1958_v32 = vadd.f32 1.0, %v5555_v11  ;;  %v5557_v57 = vpop.eup %5556  ;;  %v5316_v11 = vld [vmem:[#allocation6 + $0x78] ss:$48 sps:$4 sm:$0xff]  }
 0x9f9   :  { %5560 = vrcp.f32 %v1957_v53  ;;  %v5559_v19 = vpop.eup %5558  ;;  %v1976_v3 = vadd.f32 1.0, %v5557_v57  ;;  %v5321_v53 = vld [vmem:[#allocation6 + $0x14] ss:$48 sps:$4 sm:$0xff]   ;;  %v5319_v57 = vld [vmem:[#allocation6 + $0x10] ss:$48 sps:$4 sm:$0xff]  }
 0x9fa   :  { %5562 = vrcp.f32 %v1958_v32  ;;  %v1977_v55 = vadd.f32 1.0, %v5559_v19  ;;  %v5324_v32 = vld [vmem:[#allocation6 + $0x1c] ss:$48 sps:$4 sm:$0xff]   ;;  %v5322_v19 = vld [vmem:[#allocation6 + $0x18] ss:$48 sps:$4 sm:$0xff]  }
 0x9fb   :  { %5564 = vrcp.f32 %v1976_v3  ;;  %v5330_v3 = vld [vmem:[#allocation6 + $0x2cc] ss:$48 sps:$4 sm:$0xff]  }
 0x9fc   :  { %5566 = vrcp.f32 %v1977_v55  ;;  %v5325_v55 = vld [vmem:[#allocation6 + $0x2c0] ss:$48 sps:$4 sm:$0xff]  }
 0xa06   :  { %v5561_v20 = vpop.eup %5560 }
 0xa07   :  { %v5563_v25 = vpop.eup %5562  ;;  %v1988_v56 = vmul.f32 %v5561_v20, %v1984_v8  ;;  %v5328_v8 = vld [vmem:[#allocation6 + $0x2c8] ss:$48 sps:$4 sm:$0xff]   ;;  %v5333_v20 = vld [vmem:[#allocation6 + $0x264] ss:$48 sps:$4 sm:$0xff]  }
 0xa08   :  { %v1989_v4 = vmul.f32 %v5563_v25, %v1985_v10  ;;  %v5565_v59 = vpop.eup %5564  ;;  %v5336_v10 = vld [vmem:[#allocation6 + $0x26c] ss:$48 sps:$4 sm:$0xff]   ;;  %v5331_v25 = vld [vmem:[#allocation6 + $0x260] ss:$48 sps:$4 sm:$0xff]  }
 0xa09   :  { %v1990_v9 = vadd.f32 %v1988_v56, %v6101_v15  ;;  %v5567_v24 = vpop.eup %5566  ;;  %v1994_v16 = vsub.f32 1.0, %v5565_v59  ;;  %v2004_v27 = vmul.f32 %v5565_v59, %v2000_v39  ;;  %v5334_v56 = vld [vmem:[#allocation6 + $0x268] ss:$48 sps:$4 sm:$0xff]   ;;  %v5348_v39 = vld [vmem:[#allocation6 + $0x1ac] ss:$48 sps:$4 sm:$0xff]  }
 0xa0a   :  { %v1991_v63 = vadd.f32 %v1989_v4, %v6103_v18  ;;  %v1995_v54 = vsub.f32 1.0, %v5567_v24  ;;  %v2005_v29 = vmul.f32 %v5567_v24, %v2001_v26  ;;  %v5339_v4 = vld [vmem:[#allocation6 + $0x204] ss:$48 sps:$4 sm:$0xff]   ;;  %v5340_v59 = vld [vmem:[#allocation6 + $0x208] ss:$48 sps:$4 sm:$0xff]  }
 0xa0b   :  { %5568 = vtanh.f32 %v1990_v9  ;;  %v5342_v9 = vld [vmem:[#allocation6 + $0x20c] ss:$48 sps:$4 sm:$0xff]   ;;  %v5345_v24 = vld [vmem:[#allocation6 + $0x1a4] ss:$48 sps:$4 sm:$0xff]  }
 0xa0c   :  { %5570 = vtanh.f32 %v1991_v63  ;;  %v5337_v63 = vld [vmem:[#allocation6 + $0x200] ss:$48 sps:$4 sm:$0xff]   ;;  %v5351_v26 = vld [vmem:[#allocation6 + $0x144] ss:$48 sps:$4 sm:$0xff]  }
 0xa18   :  { %v5569_v17 = vpop.eup %5568 }
 0xa19   :  { %v5571_v0 = vpop.eup %5570  ;;  %v1996_v30 = vmul.f32 %v5569_v17, %v1994_v16  ;;  %v5343_v16 = vld [vmem:[#allocation6 + $0x1a0] ss:$48 sps:$4 sm:$0xff]   ;;  %v5346_v17 = vld [vmem:[#allocation6 + $0x1a8] ss:$48 sps:$4 sm:$0xff]  }
 0xa1a   :  { %v1997_v28 = vmul.f32 %v5571_v0, %v1995_v54  ;;  %v5354_v54 = vld [vmem:[#allocation6 + $0x14c] ss:$48 sps:$4 sm:$0xff]   ;;  %v5349_v0 = vld [vmem:[#allocation6 + $0x140] ss:$48 sps:$4 sm:$0xff]  }
 0xa1b   :  { %v2006_v34 = vadd.f32 %v2004_v27, %v1996_v30  ;;  %v5357_v30 = vld [vmem:[#allocation6 + $0xe4] ss:$48 sps:$4 sm:$0xff]   ;;  %v5360_v27 = vld [vmem:[#allocation6 + $0xec] ss:$48 sps:$4 sm:$0xff]  }
 0xa1c   :  { %v2007_v15 = vadd.f32 %v2005_v29, %v1997_v28  ;;  %v5355_v28 = vld [vmem:[#allocation6 + $0xe0] ss:$48 sps:$4 sm:$0xff]   ;;  %v5358_v29 = vld [vmem:[#allocation6 + $0xe8] ss:$48 sps:$4 sm:$0xff]  }
 0xa1d   :  { %2008 = vst [vmem:[#allocation4] sm:$0x80] %v2006_v34  ;;  %v5363_v34 = vld [vmem:[#allocation6 + $0x84] ss:$48 sps:$4 sm:$0xff]  }
 0xa1e   :  { %2009 = vst [vmem:[#allocation4 + $0x8] sm:$0x80] %v2007_v15  ;;  %v5366_v15 = vld [vmem:[#allocation6 + $0x8c] ss:$48 sps:$4 sm:$0xff]  }
 0xa24   :  { %v2010_v18 = vld [vmem:[#allocation4] sm:$0xff] }
 0xa25   :  { %v2011_v35 = vld [vmem:[#allocation4 + $0x8] sm:$0xff] }
 0xa26   :  { %v6582_v38 = vpack.c.bf16 %v2011_v35, %v2010_v18  ;;  %v5361_v18 = vld [vmem:[#allocation6 + $0x80] ss:$48 sps:$4 sm:$0xff]   ;;  %v5372_v35 = vld [vmem:[#allocation6 + $0x2c] ss:$48 sps:$4 sm:$0xff]  }
 0xa28   :  { %2686 = vmatmul.mubr.bf16.vlgmr.msra.gmra.mxu0 %v6582_v38  ;;  %2729 = vmatmul.mubr.bf16.vlgmr.msra.gmra.mxu1 %v6582_v38 }
 0xa29   :  { %2740 = vmatpush1.bf16.msra.mxu0 %v5277_v22  ;;  %2783 = vmatpush1.bf16.msra.mxu1 %v5280_v23  ;;  %v5364_v22 = vld [vmem:[#allocation6 + $0x88] ss:$48 sps:$4 sm:$0xff]   ;;  %v5369_v23 = vld [vmem:[#allocation6 + $0x24] ss:$48 sps:$4 sm:$0xff]  }
 0xa2a   :  { %2741 = vmatprep.subr.bf16.mxu0 %v5285_v40  ;;  %2784 = vmatprep.subr.bf16.mxu1 %v5288_v31  ;;  %v5367_v40 = vld [vmem:[#allocation6 + $0x20] ss:$48 sps:$4 sm:$0xff]   ;;  %v5370_v31 = vld [vmem:[#allocation6 + $0x28] ss:$48 sps:$4 sm:$0xff]  }
 0xa2b   :  { %2771 = vmatprep.mubr.bf16.mxu0 %v5656_v2  ;;  %2814 = vmatprep.mubr.bf16.mxu1 %v5656_v2 }
 0xa2d   :  { %2742 = vmatpush1.bf16.msra.mxu0 %v5283_v41  ;;  %2785 = vmatpush1.bf16.msra.mxu1 %v5286_v33  ;;  %v6603_v41 = vld [vmem:[%s6998_s14] sm:$0xff] }
 0xa2e   :  { %2743 = vmatprep.subr.bf16.mxu0 %v5291_v13  ;;  %2786 = vmatprep.subr.bf16.mxu1 %v5294_v12  ;;  %v6607_v33 = vrot.slane %v6603_v41, %v6097_v61 }
 0xa31   :  { %2744 = vmatpush1.bf16.msra.mxu0 %v5289_v14  ;;  %2787 = vmatpush1.bf16.msra.mxu1 %v5292_v21 }
 0xa32   :  { %2745 = vmatprep.subr.bf16.mxu0 %v5297_v6  ;;  %2788 = vmatprep.subr.bf16.mxu1 %v5300_v42  ;;  %v2131_v6 = vsub.s32 4, %v6066_v60  ;;  %v2139_v42 = vsub.s32 6, %v6066_v60 }
 0xa35   :  { %2746 = vmatpush1.bf16.msra.mxu0 %v5295_v36  ;;  %2789 = vmatpush1.bf16.msra.mxu1 %v5298_v37 }
 0xa36   :  { %2747 = vmatprep.subr.bf16.mxu0 %v5303_v43  ;;  %2790 = vmatprep.subr.bf16.mxu1 %v5306_v44  ;;  %v2132_v43 = vrot.slane %v6603_v41, %v2131_v6  ;;  %v6622_v44 = vrot.slane %v6603_v41, %v2139_v42 }
 0xa39   :  { %2748 = vmatpush1.bf16.msra.mxu0 %v5301_v45  ;;  %2791 = vmatpush1.bf16.msra.mxu1 %v5304_v46 }
 0xa3a   :  { %2749 = vmatprep.subr.bf16.mxu0 %v5309_v47  ;;  %2792 = vmatprep.subr.bf16.mxu1 %v5312_v48 }
 0xa3d   :  { %2750 = vmatpush1.bf16.msra.mxu0 %v5307_v49  ;;  %2793 = vmatpush1.bf16.msra.mxu1 %v5310_v50 }
 0xa3e   :  { %2751 = vmatprep.subr.bf16.mxu0 %v5315_v51  ;;  %2794 = vmatprep.subr.bf16.mxu1 %v5318_v52  ;;  %v2116_v51 = vrot.slane %v6603_v41, %v6069_v62 }
 0xa41   :  { %2752 = vmatpush1.bf16.msra.mxu0 %v5313_v7  ;;  %2795 = vmatpush1.bf16.msra.mxu1 %v5316_v11 }
 0xa42   :  { %2753 = vmatprep.subr.bf16.mxu0 %v5321_v53  ;;  %2796 = vmatprep.subr.bf16.mxu1 %v5324_v32 }
 0xa45   :  { %2754 = vmatpush1.bf16.msra.mxu0 %v5319_v57  ;;  %2797 = vmatpush1.bf16.msra.mxu1 %v5322_v19 }
 0xa46   :  { %2825 = vmatprep.subr.bf16.mxu0 %v5327_v58  ;;  %2868 = vmatprep.subr.bf16.mxu1 %v5330_v3 }
 0xa48   :  { %2772 = vmatmul.mubr.bf16.vlgmr.msra.gmra.mxu0 %v6582_v38  ;;  %2815 = vmatmul.mubr.bf16.vlgmr.msra.gmra.mxu1 %v6582_v38 }
 0xa49   :  { %2826 = vmatpush1.bf16.msra.mxu0 %v5325_v55  ;;  %2869 = vmatpush1.bf16.msra.mxu1 %v5328_v8 }
 0xa4a   :  { %2827 = vmatprep.subr.bf16.mxu0 %v5333_v20  ;;  %2870 = vmatprep.subr.bf16.mxu1 %v5336_v10  ;;  %v2110_v20 = vld [vmem:[%s6998_s14 + $0x8] sm:$0xf]  ;;  %v2127_v10 = vsub.s32 3, %v6066_v60 }
 0xa4b   :  { %2857 = vmatprep.mubr.bf16.mxu0 %v5656_v2  ;;  %2900 = vmatprep.mubr.bf16.mxu1 %v5656_v2  ;;  %v5352_v2 = vld [vmem:[#allocation6 + $0x148] ss:$48 sps:$4 sm:$0xff]  }
 0xa4d   :  { %2828 = vmatpush1.bf16.msra.mxu0 %v5331_v25  ;;  %2871 = vmatpush1.bf16.msra.mxu1 %v5334_v56  ;;  %v2148_v25 = vrot.slane %v2110_v20, %v6069_v62  ;;  %v2156_v56 = vrot.slane %v2110_v20, %v6097_v61 }
 0xa4e   :  { %2829 = vmatprep.subr.bf16.mxu0 %v5339_v4  ;;  %2872 = vmatprep.subr.bf16.mxu1 %v5342_v9 }
 0xa51   :  { %2830 = vmatpush1.bf16.msra.mxu0 %v5337_v63  ;;  %2873 = vmatpush1.bf16.msra.mxu1 %v5340_v59  ;;  %v6656_v63 = vrot.slane %v2110_v20, %v6076_v5  ;;  %v6660_v59 = vrot.slane %v2110_v20, %v2127_v10  ;;  %v2135_v20 = vsub.s32 5, %v6066_v60 }
 0xa52   :  { %2831 = vmatprep.subr.bf16.mxu0 %v5345_v24  ;;  %2874 = vmatprep.subr.bf16.mxu1 %v5348_v39 }
 0xa55   :  { %2832 = vmatpush1.bf16.msra.mxu0 %v5343_v16  ;;  %2875 = vmatpush1.bf16.msra.mxu1 %v5346_v17 }
 0xa56   :  { %2833 = vmatprep.subr.bf16.mxu0 %v5351_v26  ;;  %2876 = vmatprep.subr.bf16.mxu1 %v5354_v54 }
 0xa59   :  { %2834 = vmatpush1.bf16.msra.mxu0 %v5349_v0  ;;  %2877 = vmatpush1.bf16.msra.mxu1 %v5352_v2 }
 0xa5a   :  { %2835 = vmatprep.subr.bf16.mxu0 %v5357_v30  ;;  %2878 = vmatprep.subr.bf16.mxu1 %v5360_v27 }
 0xa5d   :  { %2836 = vmatpush1.bf16.msra.mxu0 %v5355_v28  ;;  %2879 = vmatpush1.bf16.msra.mxu1 %v5358_v29 }
 0xa5e   :  { %2837 = vmatprep.subr.bf16.mxu0 %v5363_v34  ;;  %2880 = vmatprep.subr.bf16.mxu1 %v5366_v15 }
 0xa61   :  { %2838 = vmatpush1.bf16.msra.mxu0 %v5361_v18  ;;  %2881 = vmatpush1.bf16.msra.mxu1 %v5364_v22 }
 0xa62   :  { %2839 = vmatprep.subr.bf16.mxu0 %v5369_v23  ;;  %2882 = vmatprep.subr.bf16.mxu1 %v5372_v35 }
 0xa65   :  { %2840 = vmatpush1.bf16.msra.mxu0 %v5367_v40  ;;  %2883 = vmatpush1.bf16.msra.mxu1 %v5370_v31 }
 0xa66   :  { %4989 = vmatprep.subr.bf16.mxu0 %v5654_v1  ;;  %4995 = vmatprep.subr.bf16.mxu1 %v5654_v1 }
 0xa68   :  { %2858 = vmatmul.mubr.bf16.vlgmr.msra.gmra.mxu0 %v6582_v38  ;;  %2901 = vmatmul.mubr.bf16.vlgmr.msra.gmra.mxu1 %v6582_v38 }
 0xa69   :  { %4991 = vmatprep.mubr.msk.bf16.mxu0 %vm5655_vm1, %v5654_v1  ;;  %4997 = vmatprep.mubr.msk.bf16.mxu1 %vm5655_vm1, %v5654_v1 }
 0xae8   :  { %v2730_v13 = vpop.f32.mrf.mxu1  ;;  %v2687_v38 = vpop.f32.mrf.mxu0 }
 0xae9   :  { %v6610_v12 = vadd.f32 %v2730_v13, %v6607_v33  ;;  %v2688_v32 = vadd.f32 %v2687_v38, %v2116_v51 }
 0xaea   :  { %v6612_v14 = vpop.f32.mrf.mxu0  ;;  %v6614_v21 = vpop.f32.mrf.mxu1 }
 0xaeb   :  { %v2911_v19 = vpack.c.bf16 %v2688_v32, %v2688_v32 }
 0xaec   :  { %v2691_v36 = vpop.f32.mrf.mxu0  ;;  %v6618_v37 = vpop.f32.mrf.mxu1 }
 0xaed   :  { %v2692_v58 = vadd.f32 %v2691_v36, %v2116_v51 }
 0xaee   :  { %v6624_v45 = vpop.f32.mrf.mxu0  ;;  %v6626_v46 = vpop.f32.mrf.mxu1 }
 0xaef   :  { %v2912_v3 = vpack.c.bf16 %v2692_v58, %v2692_v58 }
 0xb08   :  { %v2773_v47 = vpop.f32.mrf.mxu0  ;;  %v2816_v48 = vpop.f32.mrf.mxu1 }
 0xb09   :  { %v2774_v49 = vadd.f32 %v2773_v47, %v2132_v43  ;;  %v6629_v50 = vadd.f32 %v2816_v48, %v6622_v44 }
 0xb0a   :  { %v6633_v52 = vpop.f32.mrf.mxu0  ;;  %v6641_v55 = vpop.f32.mrf.mxu1 }
 0xb0b   :  { %v2913_v7 = vpack.c.bf16 %v2774_v49, %v2774_v49 }
 0xb0c   :  { %v2777_v11 = vpop.f32.mrf.mxu0  ;;  %v6643_v8 = vpop.f32.mrf.mxu1 }
 0xb0d   :  { %v2778_v53 = vadd.f32 %v2777_v11, %v2132_v43  ;;  %4990 = vmatpush3.bf16.xpose.msra.mxu0 %v2913_v7 }
 0xb0e   :  { %5001 = vmatprep.subr.bf16.mxu0 %v5654_v1  ;;  %v6651_v4 = vpop.f32.mrf.mxu0  ;;  %v6653_v9 = vpop.f32.mrf.mxu1 }
 0xb0f   :  { %v2914_v57 = vpack.c.bf16 %v2778_v53, %v2778_v53 }
 0xb11   :  { %4996 = vmatpush3.bf16.xpose.msra.mxu1 %v2914_v57 }
 0xb12   :  { %5007 = vmatprep.subr.bf16.mxu1 %v5654_v1 }
 0xb14   :  { %4992 = vmatmul.mubr.bf16.vlgmr.msra.gmra.mxu0 %v2911_v19 }
 0xb15   :  { %5003 = vmatprep.mubr.msk.bf16.mxu0 %vm5655_vm1, %v5654_v1 }
 0xb18   :  { %4998 = vmatmul.mubr.bf16.vlgmr.msra.gmra.mxu1 %v2912_v3 }
 0xb19   :  { %5009 = vmatprep.mubr.msk.bf16.mxu1 %vm5655_vm1, %v5654_v1 }
 0xb28   :  { %v2859_v24 = vpop.f32.mrf.mxu0  ;;  %v2902_v39 = vpop.f32.mrf.mxu1 }
 0xb29   :  { %v2860_v16 = vadd.f32 %v2859_v24, %v2148_v25  ;;  %v6662_v17 = vadd.f32 %v2902_v39, %v2156_v56 }
 0xb2a   :  { %v2861_v26 = vpop.f32.mrf.mxu0  ;;  %v2904_v62 = vpop.f32.mrf.mxu1 }
 0xb2b   :  { %v2915_v54 = vpack.c.bf16 %v2860_v16, %v2860_v16  ;;  %v6665_v61 = vadd.f32 %v2861_v26, %v6656_v63  ;;  %v6668_v0 = vadd.f32 %v2904_v62, %v6660_v59  ;;  %v2120_v16 = vrot.slane %v6603_v41, %v6076_v5 }
 0xb2c   :  { %v2863_v2 = vpop.f32.mrf.mxu0  ;;  %v2906_v30 = vpop.f32.mrf.mxu1 }
 0xb2d   :  { %v3025_v27 = vsel %vm302_vm5, %v2915_v54, 0  ;;  %v2864_v28 = vadd.f32 %v2863_v2, %v2148_v25  ;;  %v6671_v29 = vadd.f32 %v2906_v30, %v2156_v56  ;;  %v2136_v25 = vrot.slane %v6603_v41, %v2135_v20 }
 0xb2e   :  { %5002 = vmatpush3.bf16.msra.mxu0 %v3025_v27  ;;  %v2865_v18 = vpop.f32.mrf.mxu0  ;;  %v6677_v35 = vpop.f32.mrf.mxu1  ;;  %v2690_v27 = vadd.f32 %v6612_v14, %v2120_v16  ;;  %v3134_v5 = vpack.c.bf16 %v6665_v61, %v6665_v61 }
 0xb2f   :  { %5013 = vmatprep.subr.bf16.mxu0 %v5654_v1  ;;  %v2916_v34 = vpack.c.bf16 %v2864_v28, %v2864_v28  ;;  %v2776_v24 = vadd.f32 %v6633_v52, %v2136_v25  ;;  %v2780_v2 = vadd.f32 %v6651_v4, %v2136_v25 }
 0xb30   :  { %v3130_v4 = vpack.c.bf16 %v2690_v27, %v2690_v27  ;;  %v3244_v14 = vsel %vm302_vm5, %v3134_v5, 0  ;;  %v5374_v5 = vld [vmem:[%s6999_s15 + $0x30] sm:$0xff]  }
 0xb31   :  { %v3071_v15 = vsel %vm302_vm5, %v2916_v34, 0  ;;  %v3132_v54 = vpack.c.bf16 %v2776_v24, %v2776_v24  ;;  %v3133_v52 = vpack.c.bf16 %v2780_v2, %v2780_v2  ;;  %v2866_v34 = vadd.f32 %v2865_v18, %v6656_v63 }
 0xb32   :  { %5008 = vmatpush3.bf16.msra.mxu1 %v3071_v15  ;;  %v2694_v15 = vadd.f32 %v6624_v45, %v2120_v16 }
 0xb33   :  { %5019 = vmatprep.subr.bf16.mxu1 %v5654_v1 }
 0xb34   :  { %v3131_v63 = vpack.c.bf16 %v2694_v15, %v2694_v15  ;;  %v5375_v15 = vld [vmem:[%s6999_s15 + $0x28] sm:$0xff]  }
 0xbd4   :  { %v2951_v22 = vpop.f32.mrf.mxu0 }
 0xbd5   :  { %v2997_v23 = vsel %vm287_vm6, %v2951_v22, -inf }
 0xbd6   :  { %2998 = vmax.xlane.f32.xlu1 %v2997_v23  ;;  %v4993_v40 = vpop.f32.mrf.mxu0 }
 0xbd8   :  { %v2954_v31 = vpop.f32.mrf.mxu0  ;;  %v2991_v13 = vpop.f32.mrf.mxu1 }
 0xbd9   :  { %v3000_v38 = vsel %vm287_vm6, %v2991_v13, -inf }
 0xbda   :  { %v4994_v6 = vpop.f32.mrf.mxu0  ;;  %3001 = vmax.xlane.f32.xlu0 %v3000_v38  ;;  %v4999_v42 = vpop.f32.mrf.mxu1 }
 0xbdc   :  { %v2994_v36 = vpop.f32.mrf.mxu1 }
 0xbde   :  { %v5000_v43 = vpop.f32.mrf.mxu1 }
 0xc5f   :  { %v2999_v47 = vpop.xlane.xlu1 %2998 }
 0xc60   :  { %v3003_v48 = vsub.f32 %v2951_v22, %v2999_v47  ;;  %v3135_v22 = vpack.c.bf16 %v2866_v34, %v2866_v34  ;;  %v5381_v34 = vld [vmem:[%s6999_s15 + $0x78] sm:$0xff]  }
 0xc62   :  { %v3005_v49 = vmul.f32 1.442695, %v3003_v48  ;;  %v3290_v61 = vsel %vm302_vm5, %v3135_v22, 0  ;;  %v5376_v22 = vld [vmem:[%s6999_s15 + $0x20] sm:$0xff]  }
 0xc63   :  { %v3002_v51 = vpop.xlane.xlu0 %3001 }
 0xc64   :  { %5572 = vpow2.f32 %v3005_v49  ;;  %v3004_v7 = vsub.f32 %v2991_v13, %v3002_v51 }
 0xc66   :  { %v3007_v11 = vmul.f32 1.442695, %v3004_v7 }
 0xc68   :  { %5574 = vpow2.f32 %v3007_v11 }
 0xc71   :  { %v5573_v53 = vpop.eup %5572 }
 0xc72   :  { %v3009_v32 = vsel %vm287_vm6, %v5573_v53, 0.0 }
 0xc73   :  { %3010 = vadd.xlane.f32.xlu1 %v3009_v32 }
 0xc75   :  { %v5575_v57 = vpop.eup %5574 }
 0xc76   :  { %v3012_v19 = vsel %vm287_vm6, %v5575_v57, 0.0 }
 0xc77   :  { %3013 = vadd.xlane.f32.xlu0 %v3012_v19 }
 0xcfc   :  { %v3011_v58 = vpop.xlane.xlu1 %3010 }
 0xcfd   :  { %5576 = vrcp.f32 %v3011_v58 }
 0xd00   :  { %v3014_v3 = vpop.xlane.xlu0 %3013 }
 0xd01   :  { %5578 = vrcp.f32 %v3014_v3 }
 0xd0a   :  { %v5577_v56 = vpop.eup %5576 }
 0xd0b   :  { %v3016_v39 = vmul.f32 %v5577_v56, %v5573_v53 }
 0xd0d   :  { %v3019_v26 = vpack.c.bf16 %v3016_v39, %v3016_v39 }
 0xd0e   :  { %v5579_v62 = vpop.eup %5578 }
 0xd0f   :  { %5004 = vmatmul.mubr.msk.bf16.vlgmr.msra.gmra.mxu0 %vm287_vm6, %v3019_v26  ;;  %v3018_v30 = vmul.f32 %v5579_v62, %v5575_v57 }
 0xd10   :  { %5014 = vmatpush3.bf16.xpose.msra.mxu0 %v3132_v54  ;;  %5015 = vmatprep.mubr.msk.bf16.mxu0 %vm5655_vm1, %v5654_v1 }
 0xd11   :  { %v3020_v28 = vpack.c.bf16 %v3018_v30, %v3018_v30  ;;  %5025 = vmatprep.subr.bf16.mxu0 %v5654_v1  ;;  %v5373_v30 = vld [vmem:[%s6999_s15 + $0x38] sm:$0xff]  }
 0xd13   :  { %5010 = vmatmul.mubr.msk.bf16.vlgmr.msra.gmra.mxu1 %vm287_vm6, %v3020_v28 }
 0xd14   :  { %5020 = vmatpush3.bf16.xpose.msra.mxu1 %v3133_v52  ;;  %5021 = vmatprep.mubr.msk.bf16.mxu1 %vm5655_vm1, %v5654_v1 }
 0xd15   :  { %5031 = vmatprep.subr.bf16.mxu1 %v5654_v1 }
 0xd17   :  { %5016 = vmatmul.mubr.bf16.vlgmr.msra.gmra.mxu0 %v3130_v4 }
 0xd18   :  { %5026 = vmatpush3.bf16.msra.mxu0 %v3244_v14  ;;  %5027 = vmatprep.mubr.msk.bf16.mxu0 %vm5655_vm1, %v5654_v1  ;;  %v5382_v14 = vld [vmem:[%s6999_s15 + $0x70] sm:$0xff]  }
 0xd19   :  { %5037 = vmatprep.subr.bf16.mxu0 %v5654_v1 }
 0xd1b   :  { %5022 = vmatmul.mubr.bf16.vlgmr.msra.gmra.mxu1 %v3131_v63  ;;  %v5383_v63 = vld [vmem:[%s6999_s15 + $0x68] sm:$0xff]  }
 0xd1c   :  { %5032 = vmatpush3.bf16.msra.mxu1 %v3290_v61  ;;  %5033 = vmatprep.mubr.msk.bf16.mxu1 %vm5655_vm1, %v5654_v1  ;;  %v5377_v61 = vld [vmem:[%s6999_s15 + $0x18] sm:$0xff]  }
 0xd1d   :  { %5057 = vmatprep.subr.bf16.mxu1 %v5654_v1 }
 0xdcf   :  { %v6709_v45 = vpop.f32.mrf.mxu0 }
 0xdd1   :  { %v5005_v18 = vpop.f32.mrf.mxu0 }
 0xdd2   :  { %v5384_v18 = vld [vmem:[%s6999_s15 + $0x60] sm:$0xff]  }
 0xdd3   :  { %v3064_v23 = vpop.f32.mrf.mxu0  ;;  %v6711_v40 = vpop.f32.mrf.mxu1 }
 0xdd4   :  { %v3113_v31 = vpack.c.bf16 %v6711_v40, %v6709_v45  ;;  %v5378_v23 = vld [vmem:[%s6999_s15 + $0x10] sm:$0xff]   ;;  %v5388_v45 = vld [vmem:[%s6999_s15 + $0x40] sm:$0xff]  }
 0xdd5   :  { %v5006_v13 = vpop.f32.mrf.mxu0  ;;  %v5011_v38 = vpop.f32.mrf.mxu1 }
 0xdd6   :  { %v5385_v13 = vld [vmem:[%s6999_s15 + $0x58] sm:$0xff]   ;;  %v5379_v38 = vld [vmem:[%s6999_s15 + $0x8] sm:$0xff]  }
 0xdd7   :  { %v3110_v6 = vpop.f32.mrf.mxu1  ;;  %v3170_v42 = vpop.f32.mrf.mxu0 }
 0xdd8   :  { %v3216_v53 = vsel %vm287_vm6, %v3170_v42, -inf  ;;  %v5386_v6 = vld [vmem:[%s6999_s15 + $0x50] sm:$0xff]  }
 0xdd9   :  { %v5012_v36 = vpop.f32.mrf.mxu1  ;;  %v5017_v43 = vpop.f32.mrf.mxu0 }
 0xdda   :  { %v5387_v36 = vld [vmem:[%s6999_s15 + $0x48] sm:$0xff]   ;;  %v2821_v43 = vadd.f32 %v6643_v8, %v6622_v44  ;;  %v3533_v44 = vpack.c.bf16 %v6671_v29, %v6671_v29 }
 0xddb   :  { %v3173_v47 = vpop.f32.mrf.mxu0  ;;  %v3210_v48 = vpop.f32.mrf.mxu1 }
 0xddc   :  { %v3219_v49 = vsel %vm287_vm6, %v3210_v48, -inf  ;;  %v3531_v47 = vpack.c.bf16 %v2821_v43, %v2821_v43 }
 0xddd   :  { %v5018_v51 = vpop.f32.mrf.mxu0  ;;  %3220 = vmax.xlane.f32.xlu0 %v3219_v49  ;;  %v5023_v7 = vpop.f32.mrf.mxu1  ;;  %v3688_v49 = vsel %vm302_vm5, %v3533_v44, 0 }
 0xdde   :  { %v3530_v51 = vpack.c.bf16 %v6629_v50, %v6629_v50 }
 0xddf   :  { %v3213_v11 = vpop.f32.mrf.mxu1 }
 0xde1   :  { %3217 = vmax.xlane.f32.xlu0 %v3216_v53  ;;  %v5024_v32 = vpop.f32.mrf.mxu1 }
 0xe66   :  { %v3221_v57 = vpop.xlane.xlu0 %3220 }
 0xe67   :  { %v3223_v19 = vsub.f32 %v3210_v48, %v3221_v57  ;;  %v2735_v48 = vadd.f32 %v6618_v37, %v6607_v33  ;;  %v3532_v57 = vpack.c.bf16 %v6662_v17, %v6662_v17 }
 0xe69   :  { %v3226_v58 = vmul.f32 1.442695, %v3223_v19  ;;  %v3529_v8 = vpack.c.bf16 %v2735_v48, %v2735_v48  ;;  %v3528_v19 = vpack.c.bf16 %v6610_v12, %v6610_v12 }
 0xe6a   :  { %v3218_v3 = vpop.xlane.xlu0 %3217 }
 0xe6b   :  { %5580 = vpow2.f32 %v3226_v58  ;;  %v3222_v20 = vsub.f32 %v3170_v42, %v3218_v3  ;;  %v5380_v42 = vld [vmem:[%s6999_s15] sm:$0xff]   ;;  %v3642_v58 = vsel %vm302_vm5, %v3532_v57, 0 }
 0xe6d   :  { %v3224_v25 = vmul.f32 1.442695, %v3222_v20 }
 0xe6f   :  { %5582 = vpow2.f32 %v3224_v25 }
 0xe78   :  { %v5581_v56 = vpop.eup %5580 }
 0xe79   :  { %v3231_v24 = vsel %vm287_vm6, %v5581_v56, 0.0 }
 0xe7a   :  { %3232 = vadd.xlane.f32.xlu1 %v3231_v24 }
 0xe7c   :  { %v5583_v39 = vpop.eup %5582 }
 0xe7d   :  { %v3228_v16 = vsel %vm287_vm6, %v5583_v39, 0.0 }
 0xe7e   :  { %3229 = vadd.xlane.f32.xlu1 %v3228_v16 }
 0xf03   :  { %v3233_v26 = vpop.xlane.xlu1 %3232 }
 0xf04   :  { %5584 = vrcp.f32 %v3233_v26 }
 0xf07   :  { %v3230_v62 = vpop.xlane.xlu1 %3229 }
 0xf08   :  { %5586 = vrcp.f32 %v3230_v62 }
 0xf11   :  { %v5585_v54 = vpop.eup %5584 }
 0xf12   :  { %v3237_v2 = vmul.f32 %v5585_v54, %v5581_v56 }
 0xf14   :  { %v3239_v27 = vpack.c.bf16 %v3237_v2, %v3237_v2 }
 0xf15   :  { %v5587_v28 = vpop.eup %5586 }
 0xf16   :  { %5034 = vmatmul.mubr.msk.bf16.vlgmr.msra.gmra.mxu1 %vm287_vm6, %v3239_v27  ;;  %v3235_v52 = vmul.f32 %v5587_v28, %v5583_v39 }
 0xf17   :  { %5058 = vmatpush3.bf16.msra.mxu1 %v5373_v30  ;;  %5073 = vmatprep.mubr.msk.bf16.mxu1 %vm5655_vm1, %v5654_v1 }
 0xf18   :  { %5059 = vmatprep.subr.bf16.mxu1 %v5654_v1  ;;  %v3238_v4 = vpack.c.bf16 %v3235_v52, %v3235_v52 }
 0xf1a   :  { %5028 = vmatmul.mubr.msk.bf16.vlgmr.msra.gmra.mxu0 %vm287_vm6, %v3238_v4 }
 0xf1b   :  { %5060 = vmatpush3.bf16.msra.mxu1 %v5374_v5  ;;  %5038 = vmatpush3.bf16.msra.mxu0 %v5381_v34 }
 0xf1c   :  { %5061 = vmatprep.subr.bf16.mxu1 %v5654_v1  ;;  %5039 = vmatprep.subr.bf16.mxu0 %v5654_v1 }
 0xf1d   :  { %5053 = vmatprep.mubr.msk.bf16.mxu0 %vm5655_vm1, %v5654_v1 }
 0xf1f   :  { %5062 = vmatpush3.bf16.msra.mxu1 %v5375_v15  ;;  %5040 = vmatpush3.bf16.msra.mxu0 %v5382_v14 }
 0xf20   :  { %5063 = vmatprep.subr.bf16.mxu1 %v5654_v1  ;;  %5041 = vmatprep.subr.bf16.mxu0 %v5654_v1 }
 0xf23   :  { %5064 = vmatpush3.bf16.msra.mxu1 %v5376_v22  ;;  %5042 = vmatpush3.bf16.msra.mxu0 %v5383_v63  ;;  %v2143_v63 = vsub.s32 7, %v6066_v60 }
 0xf24   :  { %5065 = vmatprep.subr.bf16.mxu1 %v5654_v1  ;;  %5043 = vmatprep.subr.bf16.mxu0 %v5654_v1 }
 0xf27   :  { %5066 = vmatpush3.bf16.msra.mxu1 %v5377_v61  ;;  %5044 = vmatpush3.bf16.msra.mxu0 %v5384_v18  ;;  %v2144_v61 = vrot.slane %v6603_v41, %v2143_v63 }
 0xf28   :  { %5067 = vmatprep.subr.bf16.mxu1 %v5654_v1  ;;  %5045 = vmatprep.subr.bf16.mxu0 %v5654_v1 }
 0xf29   :  { %v2823_v43 = vadd.f32 %v6653_v9, %v2144_v61 }
 0xf2b   :  { %5068 = vmatpush3.bf16.msra.mxu1 %v5378_v23  ;;  %5046 = vmatpush3.bf16.msra.mxu0 %v5385_v13  ;;  %v2819_v23 = vadd.f32 %v6641_v55, %v2144_v61 }
 0xf2c   :  { %5069 = vmatprep.subr.bf16.mxu1 %v5654_v1  ;;  %5047 = vmatprep.subr.bf16.mxu0 %v5654_v1 }
 0xf2f   :  { %5070 = vmatpush3.bf16.msra.mxu1 %v5379_v38  ;;  %5048 = vmatpush3.bf16.msra.mxu0 %v5386_v6  ;;  %v2128_v38 = vrot.slane %v6603_v41, %v2127_v10  ;;  %v3843_v41 = vpack.c.bf16 %v6668_v0, %v6668_v0 }
 0xf30   :  { %5071 = vmatprep.subr.bf16.mxu1 %v5654_v1  ;;  %5049 = vmatprep.subr.bf16.mxu0 %v5654_v1 }
 0xf31   :  { %v2737_v60 = vadd.f32 %v6626_v46, %v2128_v38 }
 0xf33   :  { %5072 = vmatpush3.bf16.msra.mxu1 %v5380_v42  ;;  %5050 = vmatpush3.bf16.msra.mxu0 %v5387_v36  ;;  %v3841_v42 = vpack.c.bf16 %v2819_v23, %v2819_v23  ;;  %v2733_v36 = vadd.f32 %v6614_v21, %v2128_v38  ;;  %v3840_v10 = vpack.c.bf16 %v2737_v60, %v2737_v60  ;;  %v3953_v21 = vsel %vm302_vm5, %v3843_v41, 0 }
 0xf34   :  { %5083 = vmatprep.subr.bf16.mxu1 %v5654_v1  ;;  %5051 = vmatprep.subr.bf16.mxu0 %v5654_v1 }
 0xf35   :  { %v3839_v55 = vpack.c.bf16 %v2733_v36, %v2733_v36 }
 0xf36   :  { %5074 = vmatmul.mubr.bf16.vlgmr.msra.gmra.mxu1 %v3113_v31 }
 0xf37   :  { %5084 = vmatpush3.bf16.xpose.msra.mxu1 %v3531_v47  ;;  %5085 = vmatprep.mubr.msk.bf16.mxu1 %vm5655_vm1, %v5654_v1  ;;  %v3842_v47 = vpack.c.bf16 %v2823_v43, %v2823_v43 }
 0xf38   :  { %5095 = vmatprep.subr.bf16.mxu1 %v5654_v1  ;;  %5052 = vmatpush3.bf16.msra.mxu0 %v5388_v45 }
 0xf39   :  { %5077 = vmatprep.subr.bf16.mxu0 %v5654_v1 }
 0xf3e   :  { %5086 = vmatmul.mubr.bf16.vlgmr.msra.gmra.mxu1 %v3529_v8 }
 0xf3f   :  { %5096 = vmatpush3.bf16.msra.mxu1 %v3688_v49  ;;  %5097 = vmatprep.mubr.msk.bf16.mxu1 %vm5655_vm1, %v5654_v1 }
 0xf40   :  { %5121 = vmatprep.subr.bf16.mxu1 %v5654_v1 }
 0xfd6   :  { %v3326_v33 = vpop.f32.mrf.mxu1 }
 0xfd8   :  { %v5035_v37 = vpop.f32.mrf.mxu1 }
 0xfda   :  { %v3280_v29 = vpop.f32.mrf.mxu0  ;;  %v3329_v40 = vpop.f32.mrf.mxu1 }
 0xfdb   :  { %v3332_v31 = vpack.c.bf16 %v3326_v33, %v3280_v29 }
 0xfdc   :  { %v5029_v7 = vpop.f32.mrf.mxu0  ;;  %v5036_v11 = vpop.f32.mrf.mxu1 }
 0xfdd   :  { %5054 = vmatmul.mubr.bf16.vlgmr.msra.gmra.mxu0 %v3332_v31 }
 0xfde   :  { %5078 = vmatpush3.bf16.xpose.msra.mxu0 %v3530_v51  ;;  %v3283_v53 = vpop.f32.mrf.mxu0  ;;  %5079 = vmatprep.mubr.msk.bf16.mxu0 %vm5655_vm1, %v5654_v1 }
 0xfdf   :  { %5089 = vmatprep.subr.bf16.mxu0 %v5654_v1 }
 0xfe0   :  { %v5030_v32 = vpop.f32.mrf.mxu0 }
 0xfe5   :  { %5080 = vmatmul.mubr.bf16.vlgmr.msra.gmra.mxu0 %v3528_v19 }
 0xfe6   :  { %5090 = vmatpush3.bf16.msra.mxu0 %v3642_v58  ;;  %5091 = vmatprep.mubr.msk.bf16.mxu0 %vm5655_vm1, %v5654_v1 }
 0xfe7   :  { %5101 = vmatprep.subr.bf16.mxu0 %v5654_v1 }
 0xff6   :  { %v6818_v50 = vpop.f32.mrf.mxu1 }
 0xff8   :  { %v5075_v3 = vpop.f32.mrf.mxu1 }
 0xffa   :  { %v6820_v20 = vpop.f32.mrf.mxu1 }
 0xffc   :  { %v5076_v25 = vpop.f32.mrf.mxu1 }
 0xffe   :  { %v3608_v56 = vpop.f32.mrf.mxu1 }
 0xfff   :  { %v3617_v17 = vsel %vm287_vm6, %v3608_v56, -inf }
0x1000   :  { %3618 = vmax.xlane.f32.xlu0 %v3617_v17  ;;  %v5087_v12 = vpop.f32.mrf.mxu1 }
0x1002   :  { %v3611_v24 = vpop.f32.mrf.mxu1 }
0x1004   :  { %v5088_v39 = vpop.f32.mrf.mxu1 }
0x1089   :  { %v3619_v16 = vpop.xlane.xlu0 %3618 }
0x108a   :  { %v3621_v26 = vsub.f32 %v3608_v56, %v3619_v16 }
0x108c   :  { %v3624_v62 = vmul.f32 1.442695, %v3621_v26 }
0x108e   :  { %5588 = vpow2.f32 %v3624_v62 }
0x109b   :  { %v5589_v54 = vpop.eup %5588 }
0x109c   :  { %v3629_v2 = vsel %vm287_vm6, %v5589_v54, 0.0 }
0x109d   :  { %3630 = vadd.xlane.f32.xlu1 %v3629_v2  ;;  %v6824_v30 = vpop.f32.mrf.mxu0 }
0x109f   :  { %v5055_v27 = vpop.f32.mrf.mxu0 }
0x10a0   :  { %v5389_v27 = vld [vmem:[%s6999_s15 + $0xb8] sm:$0xff]  }
0x10a1   :  { %v6826_v28 = vpop.f32.mrf.mxu0 }
0x10a3   :  { %v5056_v52 = vpop.f32.mrf.mxu0 }
0x10a4   :  { %v5390_v52 = vld [vmem:[%s6999_s15 + $0xb0] sm:$0xff]  }
0x10a5   :  { %v3568_v5 = vpop.f32.mrf.mxu0 }
0x10a6   :  { %v3614_v34 = vsel %vm287_vm6, %v3568_v5, -inf }
0x10a7   :  { %3615 = vmax.xlane.f32.xlu0 %v3614_v34  ;;  %v5081_v4 = vpop.f32.mrf.mxu0  ;;  %v5392_v34 = vld [vmem:[%s6999_s15 + $0xa0] sm:$0xff]  }
0x10a8   :  { %v5393_v4 = vld [vmem:[%s6999_s15 + $0x98] sm:$0xff]  }
0x10a9   :  { %v3571_v15 = vpop.f32.mrf.mxu0 }
0x10aa   :  { %v5394_v15 = vld [vmem:[%s6999_s15 + $0x90] sm:$0xff]  }
0x10ab   :  { %v5082_v14 = vpop.f32.mrf.mxu0 }
0x10ac   :  { %v5395_v14 = vld [vmem:[%s6999_s15 + $0x88] sm:$0xff]  }
0x1126   :  { %v3631_v22 = vpop.xlane.xlu1 %3630 }
0x1127   :  { %5590 = vrcp.f32 %v3631_v22  ;;  %v5396_v22 = vld [vmem:[%s6999_s15 + $0x80] sm:$0xff]  }
0x1130   :  { %v3616_v9 = vpop.xlane.xlu0 %3615 }
0x1131   :  { %v3620_v48 = vsub.f32 %v3568_v5, %v3616_v9  ;;  %v5391_v5 = vld [vmem:[%s6999_s15 + $0xa8] sm:$0xff]  }
0x1132   :  { %v5399_v9 = vld [vmem:[%s6999_s15 + $0xe8] sm:$0xff]  }
0x1133   :  { %v3622_v44 = vmul.f32 1.442695, %v3620_v48  ;;  %v5400_v48 = vld [vmem:[%s6999_s15 + $0xe0] sm:$0xff]  }
0x1134   :  { %v5591_v18 = vpop.eup %5590 }
0x1135   :  { %v3635_v13 = vmul.f32 %v5591_v18, %v5589_v54  ;;  %5592 = vpow2.f32 %v3622_v44  ;;  %v2909_v18 = vadd.f32 %v6677_v35, %v6660_v59  ;;  %v5397_v35 = vld [vmem:[%s6999_s15 + $0xf8] sm:$0xff]  }
0x1136   :  { %v5401_v44 = vld [vmem:[%s6999_s15 + $0xd8] sm:$0xff]  }
0x1137   :  { %v3637_v6 = vpack.c.bf16 %v3635_v13, %v3635_v13  ;;  %v3844_v13 = vpack.c.bf16 %v2909_v18, %v2909_v18 }
0x1139   :  { %5098 = vmatmul.mubr.msk.bf16.vlgmr.msra.gmra.mxu1 %vm287_vm6, %v3637_v6 }
0x113a   :  { %5122 = vmatpush3.bf16.xpose.msra.mxu1 %v3841_v42  ;;  %5123 = vmatprep.mubr.msk.bf16.mxu1 %vm5655_vm1, %v5654_v1  ;;  %v3999_v42 = vsel %vm302_vm5, %v3844_v13, 0 }
0x113b   :  { %5127 = vmatprep.subr.bf16.mxu1 %v5654_v1 }
0x1141   :  { %5124 = vmatmul.mubr.bf16.vlgmr.msra.gmra.mxu1 %v3839_v55 }
0x1142   :  { %5128 = vmatpush3.bf16.xpose.msra.mxu1 %v3842_v47  ;;  %5129 = vmatprep.mubr.msk.bf16.mxu1 %vm5655_vm1, %v5654_v1  ;;  %v5593_v37 = vpop.eup %5592 }
0x1143   :  { %5133 = vmatprep.subr.bf16.mxu1 %v5654_v1  ;;  %v3626_v31 = vsel %vm287_vm6, %v5593_v37, 0.0 }
0x1149   :  { %5130 = vmatmul.mubr.bf16.vlgmr.msra.gmra.mxu1 %v3840_v10  ;;  %v5398_v10 = vld [vmem:[%s6999_s15 + $0xf0] sm:$0xff]  }
0x114a   :  { %5134 = vmatpush3.bf16.msra.mxu1 %v3953_v21  ;;  %5135 = vmatprep.mubr.msk.bf16.mxu1 %vm5655_vm1, %v5654_v1 }
0x114b   :  { %5139 = vmatprep.subr.bf16.mxu1 %v5654_v1 }
0x11f9   :  { %v6851_v46 = vpop.f32.mrf.mxu1 }
0x11fb   :  { %v5099_v8 = vpop.f32.mrf.mxu1 }
0x11fc   :  { %v5403_v8 = vld [vmem:[%s6999_s15 + $0xc8] sm:$0xff]  }
0x11fd   :  { %v3727_v49 = vpop.f32.mrf.mxu1 }
0x11fe   :  { %v5404_v49 = vld [vmem:[%s6999_s15 + $0xc0] sm:$0xff]  }
0x11ff   :  { %v5100_v45 = vpop.f32.mrf.mxu1 }
0x1201   :  { %v3879_v0 = vpop.f32.mrf.mxu1 }
0x1202   :  { %v3925_v33 = vsel %vm287_vm6, %v3879_v0, -inf }
0x1203   :  { %3926 = vmax.xlane.f32.xlu1 %v3925_v33  ;;  %v5125_v29 = vpop.f32.mrf.mxu1 }
0x1205   :  { %v3882_v40 = vpop.f32.mrf.mxu1 }
0x1207   :  { %v5126_v51 = vpop.f32.mrf.mxu1  ;;  %3627 = vadd.xlane.f32.xlu1 %v3626_v31 }
0x1209   :  { %v3919_v7 = vpop.f32.mrf.mxu1 }
0x120a   :  { %v3928_v11 = vsel %vm287_vm6, %v3919_v7, -inf }
0x120b   :  { %v5131_v53 = vpop.f32.mrf.mxu1  ;;  %3929 = vmax.xlane.f32.xlu0 %v3928_v11  ;;  %v3522_v11 = vadd.f32 %v6818_v50, %v6824_v30  ;;  %v5406_v50 = vld [vmem:[%s7001_s17 + $0x20] sm:$0xff]   ;;  %v5408_v30 = vld [vmem:[%s7001_s17 + $0x10] sm:$0xff]  }
0x120d   :  { %v3922_v32 = vpop.f32.mrf.mxu1 }
0x120f   :  { %v5132_v57 = vpop.f32.mrf.mxu1 }
0x128c   :  { %v3927_v19 = vpop.xlane.xlu1 %3926 }
0x128d   :  { %v3931_v58 = vsub.f32 %v3879_v0, %v3927_v19  ;;  %v3525_v19 = vadd.f32 %v6820_v20, %v6826_v28  ;;  %v5407_v20 = vld [vmem:[%s7001_s17 + $0x18] sm:$0xff]   ;;  %v5409_v28 = vld [vmem:[%s7001_s17 + $0x8] sm:$0xff]  }
0x128f   :  { %v3933_v3 = vmul.f32 1.442695, %v3931_v58 }
0x1290   :  { %v3628_v25 = vpop.xlane.xlu1 %3627 }
0x1291   :  { %5594 = vpow2.f32 %v3933_v3 }
0x1292   :  { %5596 = vrcp.f32 %v3628_v25 }
0x1294   :  { %v3930_v56 = vpop.xlane.xlu0 %3929 }
0x1295   :  { %v3932_v17 = vsub.f32 %v3919_v7, %v3930_v56  ;;  %v5405_v56 = vld [vmem:[%s7001_s17 + $0x28] sm:$0xff]  }
0x1297   :  { %v3935_v12 = vmul.f32 1.442695, %v3932_v17  ;;  %v5410_v17 = vld [vmem:[%s7001_s17] sm:$0xff]  }
0x1299   :  { %5598 = vpow2.f32 %v3935_v12 }
0x129e   :  { %v5595_v24 = vpop.eup %5594 }
0x129f   :  { %v5597_v39 = vpop.eup %5596  ;;  %v3937_v16 = vsel %vm287_vm6, %v5595_v24, 0.0 }
0x12a0   :  { %3938 = vadd.xlane.f32.xlu0 %v3937_v16  ;;  %v3633_v26 = vmul.f32 %v5597_v39, %v5593_v37 }
0x12a2   :  { %v3636_v62 = vpack.c.bf16 %v3633_v26, %v3633_v26 }
0x12a4   :  { %5092 = vmatmul.mubr.msk.bf16.vlgmr.msra.gmra.mxu0 %vm287_vm6, %v3636_v62 }
0x12a5   :  { %5117 = vmatprep.mubr.msk.bf16.mxu0 %vm5655_vm1, %v5654_v1  ;;  %5102 = vmatpush3.bf16.msra.mxu0 %v5389_v27 }
0x12a6   :  { %v5599_v54 = vpop.eup %5598  ;;  %5103 = vmatprep.subr.bf16.mxu0 %v5654_v1 }
0x12a7   :  { %v3940_v2 = vsel %vm287_vm6, %v5599_v54, 0.0 }
0x12a8   :  { %3941 = vadd.xlane.f32.xlu1 %v3940_v2 }
0x12a9   :  { %5104 = vmatpush3.bf16.msra.mxu0 %v5390_v52 }
0x12aa   :  { %5105 = vmatprep.subr.bf16.mxu0 %v5654_v1 }
0x12ad   :  { %5106 = vmatpush3.bf16.msra.mxu0 %v5391_v5 }
0x12ae   :  { %5107 = vmatprep.subr.bf16.mxu0 %v5654_v1 }
0x12b1   :  { %5108 = vmatpush3.bf16.msra.mxu0 %v5392_v34 }
0x12b2   :  { %5109 = vmatprep.subr.bf16.mxu0 %v5654_v1 }
0x12b5   :  { %5110 = vmatpush3.bf16.msra.mxu0 %v5393_v4 }
0x12b6   :  { %5111 = vmatprep.subr.bf16.mxu0 %v5654_v1 }
0x12b9   :  { %5112 = vmatpush3.bf16.msra.mxu0 %v5394_v15 }
0x12ba   :  { %5113 = vmatprep.subr.bf16.mxu0 %v5654_v1 }
0x12bd   :  { %5114 = vmatpush3.bf16.msra.mxu0 %v5395_v14 }
0x12be   :  { %5115 = vmatprep.subr.bf16.mxu0 %v5654_v1 }
0x12c1   :  { %5116 = vmatpush3.bf16.msra.mxu0 %v5396_v22 }
0x12c2   :  { %5145 = vmatprep.subr.bf16.mxu0 %v5654_v1 }
0x1329   :  { %v3939_v63 = vpop.xlane.xlu0 %3938 }
0x132a   :  { %5600 = vrcp.f32 %v3939_v63 }
0x1331   :  { %v3942_v61 = vpop.xlane.xlu1 %3941 }
0x1332   :  { %5602 = vrcp.f32 %v3942_v61 }
0x1337   :  { %v5601_v23 = vpop.eup %5600 }
0x1338   :  { %v3944_v38 = vmul.f32 %v5601_v23, %v5595_v24  ;;  %v4612_v24 = vld [vmem:[%s7000_s16] ss:$0 sm:$0xff] }
0x133a   :  { %v3947_v6 = vpack.c.bf16 %v3944_v38, %v3944_v38 }
0x133c   :  { %5136 = vmatmul.mubr.msk.bf16.vlgmr.msra.gmra.mxu1 %vm287_vm6, %v3947_v6 }
0x133d   :  { %5140 = vmatpush3.bf16.msra.mxu1 %v3999_v42  ;;  %5141 = vmatprep.mubr.msk.bf16.mxu1 %vm5655_vm1, %v5654_v1 }
0x133e   :  { %5165 = vmatprep.subr.bf16.mxu1 %v5654_v1 }
0x133f   :  { %v5603_v36 = vpop.eup %5602 }
0x1340   :  { %v3946_v43 = vmul.f32 %v5603_v36, %v5599_v54 }
0x1342   :  { %v3948_v55 = vpack.c.bf16 %v3946_v43, %v3946_v43 }
0x1344   :  { %5142 = vmatmul.mubr.msk.bf16.vlgmr.msra.gmra.mxu1 %vm287_vm6, %v3948_v55 }
0x1345   :  { %5177 = vmatprep.mubr.msk.bf16.mxu1 %vm5655_vm1, %v5654_v1  ;;  %5166 = vmatpush3.bf16.msra.mxu1 %v5405_v56 }
0x1346   :  { %5167 = vmatprep.subr.bf16.mxu1 %v5654_v1 }
0x1349   :  { %5168 = vmatpush3.bf16.msra.mxu1 %v5406_v50 }
0x134a   :  { %5169 = vmatprep.subr.bf16.mxu1 %v5654_v1 }
0x134d   :  { %5170 = vmatpush3.bf16.msra.mxu1 %v5407_v20 }
0x134e   :  { %5171 = vmatprep.subr.bf16.mxu1 %v5654_v1 }
0x1351   :  { %5172 = vmatpush3.bf16.msra.mxu1 %v5408_v30 }
0x1352   :  { %5173 = vmatprep.subr.bf16.mxu1 %v5654_v1 }
0x1355   :  { %5174 = vmatpush3.bf16.msra.mxu1 %v5409_v28 }
0x1356   :  { %5175 = vmatprep.subr.bf16.mxu1 %v5654_v1 }
0x1359   :  { %5176 = vmatpush3.bf16.msra.mxu1 %v5410_v17 }
0x135a   :  { %5181 = vmatprep.subr.bf16.mxu1 %v5654_v1 }
0x1364   :  { %v3678_v59 = vpop.f32.mrf.mxu0 }
0x1365   :  { %v3730_v47 = vpack.c.bf16 %v6851_v46, %v3678_v59  ;;  %v5402_v46 = vld [vmem:[%s6999_s15 + $0xd0] sm:$0xff]  }
0x1366   :  { %v5093_v60 = vpop.f32.mrf.mxu0 }
0x1367   :  { %5118 = vmatmul.mubr.bf16.vlgmr.msra.gmra.mxu0 %v3730_v47 }
0x1368   :  { %v3681_v41 = vpop.f32.mrf.mxu0  ;;  %5146 = vmatpush3.bf16.msra.mxu0 %v5397_v35  ;;  %5161 = vmatprep.mubr.msk.bf16.mxu0 %vm5655_vm1, %v5654_v1 }
0x1369   :  { %5147 = vmatprep.subr.bf16.mxu0 %v5654_v1  ;;  %v5411_v41 = vld [vmem:[%s7003_s19] sm:$0xff]  }
0x136a   :  { %v5094_v21 = vpop.f32.mrf.mxu0 }
0x136c   :  { %5148 = vmatpush3.bf16.msra.mxu0 %v5398_v10  ;;  %v4613_v10 = vld [vmem:[%s7002_s18] ss:$0 sm:$0xff] }
0x136d   :  { %5149 = vmatprep.subr.bf16.mxu0 %v5654_v1 }
0x1370   :  { %5150 = vmatpush3.bf16.msra.mxu0 %v5399_v9 }
0x1371   :  { %5151 = vmatprep.subr.bf16.mxu0 %v5654_v1 }
0x1374   :  { %5152 = vmatpush3.bf16.msra.mxu0 %v5400_v48 }
0x1375   :  { %5153 = vmatprep.subr.bf16.mxu0 %v5654_v1 }
0x1378   :  { %5154 = vmatpush3.bf16.msra.mxu0 %v5401_v44 }
0x1379   :  { %5155 = vmatprep.subr.bf16.mxu0 %v5654_v1 }
0x137c   :  { %5156 = vmatpush3.bf16.msra.mxu0 %v5402_v46 }
0x137d   :  { %5157 = vmatprep.subr.bf16.mxu0 %v5654_v1 }
0x1380   :  { %5158 = vmatpush3.bf16.msra.mxu0 %v5403_v8 }
0x1381   :  { %5159 = vmatprep.subr.bf16.mxu0 %v5654_v1 }
0x1384   :  { %5160 = vmatpush3.bf16.msra.mxu0 %v5404_v49 }
0x13fc   :  { %v3989_v45 = vpop.f32.mrf.mxu1 }
0x13fe   :  { %v5137_v0 = vpop.f32.mrf.mxu1 }
0x1400   :  { %v3992_v33 = vpop.f32.mrf.mxu1 }
0x1402   :  { %v5138_v37 = vpop.f32.mrf.mxu1 }
0x1404   :  { %v4035_v29 = vpop.f32.mrf.mxu1 }
0x1405   :  { %v4041_v40 = vpack.c.bf16 %v4035_v29, %v3989_v45  ;;  %v4621_v45 = vld [vmem:[#allocation5] ss:$0 sm:$0xff] }
0x1406   :  { %v5143_v31 = vpop.f32.mrf.mxu1 }
0x1407   :  { %5162 = vmatmul.mubr.bf16.vlgmr.msra.gmra.mxu0 %v4041_v40 }
0x1408   :  { %v4038_v51 = vpop.f32.mrf.mxu1 }
0x140a   :  { %v5144_v7 = vpop.f32.mrf.mxu1 }
0x1427   :  { %v3830_v53 = vpop.f32.mrf.mxu0 }
0x1428   :  { %v3837_v32 = vadd.f32 %v3830_v53, %v3522_v11 }
0x1429   :  { %v5119_v57 = vpop.f32.mrf.mxu0 }
0x142b   :  { %v3833_v58 = vpop.f32.mrf.mxu0 }
0x142c   :  { %v3838_v3 = vadd.f32 %v3833_v58, %v3525_v19 }
0x142d   :  { %v5120_v25 = vpop.f32.mrf.mxu0 }
0x14c7   :  { %v4141_v12 = vpop.f32.mrf.mxu0 }
0x14c8   :  { %v4148_v39 = vadd.f32 %v4141_v12, %v3837_v32 }
0x14c9   :  { %v5163_v16 = vpop.f32.mrf.mxu0 }
0x14ca   :  { %v4157_v26 = vadd.f32 %v4612_v24, %v4148_v39 }
0x14cb   :  { %v4144_v62 = vpop.f32.mrf.mxu0 }
0x14cc   :  { %v4160_v54 = vsel %vm4159_vm9, %v4157_v26, 0.0  ;;  %v4149_v2 = vadd.f32 %v4144_v62, %v3838_v3 }
0x14cd   :  { %v4161_v27 = vrot.slane %v4160_v54, 4  ;;  %v5164_v52 = vpop.f32.mrf.mxu0 }
0x14ce   :  { %v4158_v5 = vadd.f32 %v4612_v24, %v4149_v2 }
0x14cf   :  { %v4162_v34 = vadd.f32 %v4161_v27, %v4160_v54 }
0x14d0   :  { %v4167_v4 = vsel %vm4159_vm9, %v4158_v5, 0.0 }
0x14d1   :  { %v4163_v15 = vrot.slane %v4162_v34, 2  ;;  %v4168_v14 = vrot.slane %v4167_v4, 4 }
0x14d3   :  { %v4164_v22 = vadd.f32 %v4163_v15, %v4162_v34  ;;  %v4169_v63 = vadd.f32 %v4168_v14, %v4167_v4 }
0x14d5   :  { %v4165_v61 = vrot.slane %v4164_v22, 1  ;;  %v4170_v18 = vrot.slane %v4169_v63, 2 }
0x14d7   :  { %v4166_v23 = vadd.f32 %v4165_v61, %v4164_v22  ;;  %v4171_v13 = vadd.f32 %v4170_v18, %v4169_v63 }
0x14d9   :  { %v4175_v38 = vmul.f32 0.125, %v4166_v23  ;;  %v4172_v6 = vrot.slane %v4171_v13, 1 }
0x14db   :  { %v4173_v42 = vadd.f32 %v4172_v6, %v4171_v13  ;;  %v4177_v36 = vpack.c.bf16 %v4175_v38, %v4175_v38 }
0x14dd   :  { %v4176_v43 = vmul.f32 0.125, %v4173_v42  ;;  %v4200_v59 = vunpack.c.l.b16 %v4177_v36 }
0x14df   :  { %v4178_v55 = vpack.c.bf16 %v4176_v43, %v4176_v43 }
0x14e1   :  { %v4201_v35 = vunpack.c.l.b16 %v4178_v55 }
0x14e3   :  { %v4202_v47 = vsel %vm915_vm8, %v4201_v35, %v4200_v59 }
0x14e4   :  { %v4203_v60 = vpack.c.b16 %v4202_v47, %v4202_v47 }
0x14e6   :  { %5178 = vmatmul.mubr.msk.bf16.vlgmr.msra.gmra.mxu1 %vm4159_vm9, %v4203_v60 }
0x14e7   :  { %5183 = vmatprep.mubr.msk.bf16.mxu1 %vm5655_vm1, %v5654_v1  ;;  %5182 = vmatpush3.bf16.msra.mxu1 %v5411_v41 }
0x15a6   :  { %v4277_v21 = vpop.f32.mrf.mxu1 }
0x15a7   :  { %v4278_v9 = vadd.f32 %v4613_v10, %v4277_v21 }
0x15a8   :  { %v5179_v48 = vpop.f32.mrf.mxu1 }
0x15a9   :  { %v4283_v44 = vmax.f32 %v4278_v9, 0.0 }
0x15aa   :  { %v4280_v46 = vpop.f32.mrf.mxu1 }
0x15ab   :  { %v4284_v8 = vpack.c.bf16 %v4283_v44, %v4283_v44 }
0x15ac   :  { %v5180_v49 = vpop.f32.mrf.mxu1 }
0x15ad   :  { %5184 = vmatmul.mubr.msk.bf16.vlgmr.msra.gmra.mxu1 %vm515_vm7, %v4284_v8 }
0x166d   :  { %v4337_v1 = vpop.f32.mrf.mxu1 }
0x166e   :  { %v4338_v0 = vadd.f32 %v4621_v45, %v4337_v1 }
0x166f   :  { %v5185_v33 = vpop.f32.mrf.mxu1 }
0x1670   :  { %4344 = vst.msk [vmem:[%s7005_s21] sm:$0x3] %vm4343_vm10, %v4338_v0 }
0x1671   :  { %v4340_v37 = vpop.f32.mrf.mxu1 }
0x1673   :  { %v5186_v29 = vpop.f32.mrf.mxu1 }
0x1674   :  { %4349 = vsyncpa [#allocation7], 1 }

</bundles_post_ra>
